<compile_context>
chip_gen: v5e
topology: v5e:2x2
jax: 0.10.0
libtpu: 0.0.40
codegen_flags: <defaults>
</compile_context>

<pallas_src>
import functools

import numpy as np
import jax
import jax.numpy as jnp
from jax.experimental import pallas as pl
from jax.experimental.pallas import tpu as pltpu

MIN_SECOND = 0.05
SAMPLE_RATE = 16000

HIDDEN = 32                 # hidden size of every layer
KERNEL = 16                 # conv kernel == stride == downsample rate
NUM_LAYERS = 3              # feature-extractor output + 2 encoder layers

PACK = 8                    # frames packed per lane-row (PACK=4 would suit v5e's 128x128 MXU)
ROW = PACK * KERNEL         # 128 waveform samples per packed row (lane axis)
PACKED_H = PACK * HIDDEN    # 256 output lanes per packed row
TARGET_TR = 1024            # max packed rows per grid tile (multiple of 16)
LN_EPS = 1e-5

_STEP_OVERHEAD_ROWS = 128   # ~0.35us per-grid-step overhead, in row-equivalents


def _round_up(x, m):
    return ((x + m - 1) // m) * m


def _choose_tiling(n_rows, target_tr):
    """Pick (tile_rows, padded_rows).

    Rows are padded only to a multiple of 16 (bf16 sublane tile), NOT to a
    full TARGET_TR multiple; the tile size minimizes padded work plus
    per-grid-step pipeline overhead.
    """
    r16 = _round_up(max(n_rows, 1), 16)
    if r16 <= target_tr:
        return r16, r16          # single tile, zero extra padding
    best = None
    for cand in range(target_tr, 63, -16):
        pad = _round_up(r16, cand)
        cost = pad + (pad // cand) * _STEP_OVERHEAD_ROWS
        if best is None or cost < best[0]:
            best = (cost, cand, pad)
    _, tr, r_pad = best
    return tr, r_pad


# ----------------------------------------------------------------------------
# Pallas kernel: fused synthetic upstream (+ optional per-frame layer-norm)
# ----------------------------------------------------------------------------
def _upstream_kernel(normalize, wavs_len_ref, x_ref,
                     w0_ref, b0_ref, w1_ref, b1_ref, w2_ref, b2_ref, *rest):
    """One (batch b, row-tile j) grid step.

    x_ref:   (1, TR, 128) f32 packed waveform rows (8 frames of 16 samples)
    w*_ref:  block-diagonal packed bf16 weights (128,256)/(256,256); b*: (1,256) f32
    savg:    (256,256) bf16 block-diag frame-averaging matrix (only if normalize)
    h*_ref:  (1, TR, 256) bf16 packed per-layer outputs (lane-dense)
    """
    if normalize:
        savg_ref, h0_ref, h1_ref, h2_ref = rest
    else:
        savg_ref = None
        h0_ref, h1_ref, h2_ref = rest

    b = pl.program_id(0)
    j = pl.program_id(1)
    tr = x_ref.shape[1]

    wav_len = wavs_len_ref[b]
    # First waveform sample covered by this tile (int32; fine for any realistic
    # audio length, overflows only past ~2^31 samples).
    tile_start = j * (tr * ROW)

    @pl.when(tile_start >= wav_len)
    def _():
        # Whole tile is past this utterance's valid length: skip all MXU work.
        # These frames lie beyond the reported h_len, so zeros are fine.
        zero = jnp.zeros((1, tr, PACKED_H), jnp.bfloat16)
        h0_ref[...] = zero
        h1_ref[...] = zero
        h2_ref[...] = zero

    @pl.when(tile_start < wav_len)
    def _():
        x = x_ref[0]                                         # (tr, 128) f32

        # Validity masking in-kernel (via scalar-prefetched wavs_len): zero out
        # samples >= this utterance's length.  Tile-local index vs. a single
        # scalar threshold keeps the VPU cost minimal.
        rows = jax.lax.broadcasted_iota(jnp.int32, (tr, ROW), 0)
        lanes = jax.lax.broadcasted_iota(jnp.int32, (tr, ROW), 1)
        x = jnp.where(rows * ROW + lanes < (wav_len - tile_start), x, 0.0)

        def seg_avg(v):
            # Per-frame (32-lane block) average via the block-diagonal bf16
            # averaging matmul.  hi/lo split of the f32 operand recovers ~f32
            # accuracy (1/32 is exact in bf16) while staying on the cheap
            # bf16 MXU path instead of an expensive f32 matmul.
            hi = v.astype(jnp.bfloat16)
            lo = (v - hi.astype(jnp.float32)).astype(jnp.bfloat16)
            s = savg_ref[...]
            return (jnp.dot(hi, s, preferred_element_type=jnp.float32)
                    + jnp.dot(lo, s, preferred_element_type=jnp.float32))

        def maybe_norm(h):
            # Per-frame F.layer_norm over the 32 hidden dims of each packed
            # frame (eps=1e-5, no affine).  Row-wise, so it commutes with the
            # length slicing done later in the wrapper.  Stats stay in f32.
            if not normalize:
                return h
            mean = seg_avg(h)
            d = h - mean
            var = seg_avg(d * d)
            return d * jax.lax.rsqrt(var + LN_EPS)

        # bf16 MXU operands, f32 accumulation.
        h0 = jnp.dot(x.astype(jnp.bfloat16), w0_ref[...],
                     preferred_element_type=jnp.float32) + b0_ref[...]
        h1 = jnp.tanh(jnp.dot(h0.astype(jnp.bfloat16), w1_ref[...],
                              preferred_element_type=jnp.float32) + b1_ref[...])
        h2 = jnp.tanh(jnp.dot(h1.astype(jnp.bfloat16), w2_ref[...],
                              preferred_element_type=jnp.float32) + b2_ref[...])

        # bf16 writeback halves the dominant HBM traffic; upcast in wrapper.
        h0_ref[0] = maybe_norm(h0).astype(jnp.bfloat16)
        h1_ref[0] = maybe_norm(h1).astype(jnp.bfloat16)
        h2_ref[0] = maybe_norm(h2).astype(jnp.bfloat16)


def _run_upstream(wav_rows, wavs_len_i32, pp, normalize, tr):
    """wav_rows: (B, R_pad, 128) f32 -> 3 x (B, R_pad, 256) bf16 (packed)."""
    B, r_pad, _ = wav_rows.shape
    assert r_pad % tr == 0
    grid = (B, r_pad // tr)

    def resident(arr):
        shape = arr.shape
        return pl.BlockSpec(shape, lambda b, j, wl: (0,) * len(shape))

    in_specs = [
        pl.BlockSpec((1, tr, ROW), lambda b, j, wl: (b, j, 0)),
        resident(pp["w0"]), resident(pp["b0"]),
        resident(pp["w1"]), resident(pp["b1"]),
        resident(pp["w2"]), resident(pp["b2"]),
    ]
    args = [wav_rows, pp["w0"], pp["b0"], pp["w1"], pp["b1"], pp["w2"], pp["b2"]]
    if normalize:
        in_specs.append(resident(pp["savg"]))
        args.append(pp["savg"])

    out_specs = tuple(
        pl.BlockSpec((1, tr, PACKED_H), lambda b, j, wl: (b, j, 0))
        for _ in range(NUM_LAYERS))
    out_shape = tuple(
        jax.ShapeDtypeStruct((B, r_pad, PACKED_H), jnp.bfloat16)
        for _ in range(NUM_LAYERS))

    grid_spec = pltpu.PrefetchScalarGridSpec(
        num_scalar_prefetch=1,
        grid=grid,
        in_specs=in_specs,
        out_specs=out_specs,
    )

    return pl.pallas_call(
        functools.partial(_upstream_kernel, normalize),
        grid_spec=grid_spec,
        out_shape=out_shape,
        compiler_params=pltpu.CompilerParams(
            dimension_semantics=("parallel", "parallel"),
            vmem_limit_bytes=48 * 1024 * 1024),
    )(wavs_len_i32, *args)


# ----------------------------------------------------------------------------
# Parameter init (deterministic, xavier-normal like the PyTorch randomize)
# ----------------------------------------------------------------------------
def init_params(seed=0):
    key = jax.random.PRNGKey(seed)

    def xavier(k, shape):
        fan_in, fan_out = shape
        std = (2.0 / (fan_in + fan_out)) ** 0.5
        return std * jax.random.normal(k, shape, jnp.float32)

    k0, k1, k2, k3, k4, k5 = jax.random.split(key, 6)
    return {
        "w0": xavier(k0, (KERNEL, HIDDEN)),
        "b0": 0.02 * jax.random.normal(k1, (1, HIDDEN), jnp.float32),
        "w1": xavier(k2, (HIDDEN, HIDDEN)),
        "b1": 0.02 * jax.random.normal(k3, (1, HIDDEN), jnp.float32),
        "w2": xavier(k4, (HIDDEN, HIDDEN)),
        "b2": 0.02 * jax.random.normal(k5, (1, HIDDEN), jnp.float32),
    }


def build_packed_params(params):
    """Block-diagonal (8-frame packed) weights, built once on the host.

    Matmul weights are stored in bf16 (native MXU dtype); biases stay f32 and
    are added to the f32 accumulators.  savg entries are 1/32 (exact in bf16).
    """
    eye = jnp.eye(PACK, dtype=jnp.float32)
    savg = jnp.kron(eye, jnp.full((HIDDEN, HIDDEN), 1.0 / HIDDEN, jnp.float32))
    return {
        "w0": jnp.kron(eye, params["w0"]).astype(jnp.bfloat16),   # (128, 256)
        "w1": jnp.kron(eye, params["w1"]).astype(jnp.bfloat16),   # (256, 256)
        "w2": jnp.kron(eye, params["w2"]).astype(jnp.bfloat16),   # (256, 256)
        "b0": jnp.tile(params["b0"], (1, PACK)),                  # (1, 256) f32
        "b1": jnp.tile(params["b1"], (1, PACK)),
        "b2": jnp.tile(params["b2"], (1, PACK)),
        "savg": savg.astype(jnp.bfloat16),                        # (256, 256)
    }


# ----------------------------------------------------------------------------
# S3PRLUpstream.forward equivalent
# ----------------------------------------------------------------------------
def _match_length(xs, target_max_len):
    """Exact port of S3PRLUpstream._match_length (xs: (B, L, H))."""
    xs_max_len = xs.shape[1]
    if xs_max_len > target_max_len:
        assert xs_max_len // target_max_len == 1, f"{xs_max_len}, {target_max_len}"
        xs = xs[:, :target_max_len, :]
    elif xs_max_len < target_max_len:
        assert target_max_len // xs_max_len == 1, f"{target_max_len}, {xs_max_len}"
        pad = jnp.tile(xs[:, -1:, :], (1, target_max_len - xs_max_len, 1))
        xs = jnp.concatenate((xs, pad), axis=1)
    return xs


def s3prl_upstream_forward(wavs, wavs_len, params, normalize=True,
                           packed_params=None):
    """
    Args:
      wavs:     (B, T) or (B, T, 1) float32
      wavs_len: (B,) int (host-side, like a LongTensor in eager PyTorch)
    Returns:
      all_hs:   list of (B, max_h_len, H) float32
      all_lens: list of (B,) int32
    """
    if wavs.ndim == 3:
        wavs = jnp.squeeze(wavs, axis=-1)

    wavs_len = np.asarray(wavs_len, dtype=np.int64)
    original_wavs_len = wavs_len

    # MIN_SECOND padding (host-side scalar logic, as in eager PyTorch)
    if int(original_wavs_len.max()) < MIN_SECOND * SAMPLE_RATE:
        padded_samples = int(MIN_SECOND * SAMPLE_RATE) - int(original_wavs_len.max())
        wavs = jnp.concatenate(
            (wavs, jnp.zeros((wavs.shape[0], padded_samples), wavs.dtype)), axis=1)
        wavs_len = wavs_len + padded_samples

    B, T = wavs.shape
    max_wav_len = int(wavs_len.max())

    # Pack 8 frames (128 samples) per lane-row.  Rows are padded only to a
    # multiple of 16 (not to a full tile); the tile size is chosen to minimize
    # padded work + per-step pipeline overhead.  Padding samples are masked to
    # zero in-kernel, so they never affect valid frames.
    n_rows = -(-T // ROW)
    tr, r_pad = _choose_tiling(n_rows, TARGET_TR)
    t_pad = r_pad * ROW
    if t_pad > T:
        wavs = jnp.concatenate(
            (wavs, jnp.zeros((B, t_pad - T), wavs.dtype)), axis=1)
    wav_rows = wavs.reshape(B, r_pad, ROW)

    if packed_params is None:
        packed_params = build_packed_params(params)

    # --- hot path: one fused, gridded Pallas kernel (masking+matmuls+tanh+LN) ---
    hs_packed = _run_upstream(
        wav_rows, jnp.asarray(wavs_len, jnp.int32), packed_params, normalize, tr)

    downsample_rates = [KERNEL] * NUM_LAYERS
    assert len(hs_packed) == NUM_LAYERS

    all_hs, all_lens = [], []
    for h_packed, stride in zip(hs_packed, downsample_rates):
        expected_max_h_len = len(range(0, max_wav_len, stride))
        # unpack (B, r_pad, PACK*H) -> (B, r_pad*PACK, H) frames and keep the
        # frames the upstream logically produced.
        h = h_packed.reshape(B, r_pad * PACK, HIDDEN)[:, :expected_max_h_len, :]
        h = _match_length(h, expected_max_h_len)
        assert h.shape[1] == expected_max_h_len
        h_len = (original_wavs_len - 1) // stride + 1
        h = h[:, : int(h_len.max()), :]
        # Layer-norm (if requested) is fused into the kernel (per-frame, so it
        # commutes with the slicing above); hidden states are stored as bf16
        # for HBM bandwidth and upcast to f32 here to keep the public dtype.
        all_hs.append(h.astype(jnp.float32))
        all_lens.append(jnp.asarray(h_len, dtype=jnp.int32))
    return all_hs, all_lens


# ----------------------------------------------------------------------------
if __name__ == "__main__":
    params = init_params(seed=0)

    key = jax.random.PRNGKey(0)
    B, T = 2, 640                       # small shapes; 640 < 800 triggers MIN pad
    wavs = jax.random.normal(key, (B, T), jnp.float32)
    wavs_len = np.array([512, 640], dtype=np.int64)

    all_hs, all_lens = s3prl_upstream_forward(wavs, wavs_len, params, normalize=True)

    for hs, hs_len in zip(all_hs, all_lens):
        hs = jax.block_until_ready(hs)
        hs_len = np.asarray(jax.block_until_ready(hs_len))
        bsz, max_seq_len, hidden_size = hs.shape
        assert hs.dtype == jnp.float32
        assert hs_len.ndim == 1 and bsz == B and hidden_size == HIDDEN
        # expected: stride 16, orig lens (512, 640) -> h_len (32, 40), max 40
        assert max_seq_len == 40
        assert list(hs_len) == [32, 40]
        assert bool(jnp.all(jnp.isfinite(hs)))

    assert len(all_hs) == NUM_LAYERS and len(all_lens) == NUM_LAYERS
    print("KERNEL_OK")
</pallas_src>

<mosaic_0001>
module attributes {stable_mosaic.version = 11 : i64} {
  func.func @_upstream_kernel(%arg0: i32, %arg1: i32, %arg2: memref<2xi32, #tpu.memory_space<smem>>, %arg3: memref<1x16x128xf32, #tpu.memory_space<vmem>>, %arg4: memref<128x256xbf16, #tpu.memory_space<vmem>>, %arg5: memref<1x256xf32, #tpu.memory_space<vmem>>, %arg6: memref<256x256xbf16, #tpu.memory_space<vmem>>, %arg7: memref<1x256xf32, #tpu.memory_space<vmem>>, %arg8: memref<256x256xbf16, #tpu.memory_space<vmem>>, %arg9: memref<1x256xf32, #tpu.memory_space<vmem>>, %arg10: memref<256x256xbf16, #tpu.memory_space<vmem>>, %arg11: memref<1x16x256xbf16, #tpu.memory_space<vmem>>, %arg12: memref<1x16x256xbf16, #tpu.memory_space<vmem>>, %arg13: memref<1x16x256xbf16, #tpu.memory_space<vmem>>) attributes {dimension_semantics = [#tpu.dimension_semantics<parallel>, #tpu.dimension_semantics<parallel>], iteration_bounds = array<i64: 2, 1>, scalar_prefetch = 1 : i64, scratch_operands = 0 : i64, tpu.core_type = #tpu.core_type<tc>, window_params = [{transform_indices = @transform_0, window_bounds = array<i64: 1, 16, 128>}, {pipeline_mode = #tpu.pipeline_mode<synchronous>, transform_indices = @transform_1, window_bounds = array<i64: 128, 256>}, {pipeline_mode = #tpu.pipeline_mode<synchronous>, transform_indices = @transform_2, window_bounds = array<i64: 1, 256>}, {pipeline_mode = #tpu.pipeline_mode<synchronous>, transform_indices = @transform_3, window_bounds = array<i64: 256, 256>}, {pipeline_mode = #tpu.pipeline_mode<synchronous>, transform_indices = @transform_4, window_bounds = array<i64: 1, 256>}, {pipeline_mode = #tpu.pipeline_mode<synchronous>, transform_indices = @transform_5, window_bounds = array<i64: 256, 256>}, {pipeline_mode = #tpu.pipeline_mode<synchronous>, transform_indices = @transform_6, window_bounds = array<i64: 1, 256>}, {pipeline_mode = #tpu.pipeline_mode<synchronous>, transform_indices = @transform_7, window_bounds = array<i64: 256, 256>}, {transform_indices = @transform_8, window_bounds = array<i64: 1, 16, 256>}, {transform_indices = @transform_9, window_bounds = array<i64: 1, 16, 256>}, {transform_indices = @transform_10, window_bounds = array<i64: 1, 16, 256>}]} {
    %0 = arith.index_cast %arg0 : i32 to index
    %1 = memref.load %arg2[%0] : memref<2xi32, #tpu.memory_space<smem>>
    %c2048_i32 = arith.constant 2048 : i32
    %2 = arith.muli %arg1, %c2048_i32 : i32
    %3 = arith.cmpi sge, %2, %1 : i32
    %4 = arith.extui %3 : i1 to i32
    %c0_i32 = arith.constant 0 : i32
    %5 = arith.cmpi ne, %4, %c0_i32 : i32
    scf.if %5 {
      %cst = arith.constant 0.000000e+00 : bf16
      %9 = vector.broadcast %cst : bf16 to vector<1x16x256xbf16>
      %c0 = arith.constant 0 : index
      %c0_1 = arith.constant 0 : index
      %c0_2 = arith.constant 0 : index
      %10 = vector.load %arg11[%c0, %c0_1, %c0_2] : memref<1x16x256xbf16, #tpu.memory_space<vmem>>, vector<1x16x256xbf16>
      tpu.vector_store %arg11[%c0, %c0_1, %c0_2], %9 {strides = array<i32>} : memref<1x16x256xbf16, #tpu.memory_space<vmem>>, vector<1x16x256xbf16>,
      %c0_3 = arith.constant 0 : index
      %c0_4 = arith.constant 0 : index
      %c0_5 = arith.constant 0 : index
      %11 = vector.load %arg12[%c0_3, %c0_4, %c0_5] : memref<1x16x256xbf16, #tpu.memory_space<vmem>>, vector<1x16x256xbf16>
      tpu.vector_store %arg12[%c0_3, %c0_4, %c0_5], %9 {strides = array<i32>} : memref<1x16x256xbf16, #tpu.memory_space<vmem>>, vector<1x16x256xbf16>,
      %c0_6 = arith.constant 0 : index
      %c0_7 = arith.constant 0 : index
      %c0_8 = arith.constant 0 : index
      %12 = vector.load %arg13[%c0_6, %c0_7, %c0_8] : memref<1x16x256xbf16, #tpu.memory_space<vmem>>, vector<1x16x256xbf16>
      tpu.vector_store %arg13[%c0_6, %c0_7, %c0_8], %9 {strides = array<i32>} : memref<1x16x256xbf16, #tpu.memory_space<vmem>>, vector<1x16x256xbf16>,
    } else {
    }
    %6 = arith.cmpi slt, %2, %1 : i32
    %7 = arith.extui %6 : i1 to i32
    %c0_i32_0 = arith.constant 0 : i32
    %8 = arith.cmpi ne, %7, %c0_i32_0 : i32
    scf.if %8 {
      %c0 = arith.constant 0 : index
      %c0_1 = arith.constant 0 : index
      %c0_2 = arith.constant 0 : index
      %9 = vector.load %arg3[%c0, %c0_1, %c0_2] : memref<1x16x128xf32, #tpu.memory_space<vmem>>, vector<1x16x128xf32>
      %10 = vector.shape_cast %9 : vector<1x16x128xf32> to vector<16x128xf32>
      %11 = tpu.iota {dimensions = array<i32: 0>} : vector<16x128xi32>
      %12 = tpu.iota {dimensions = array<i32: 1>} : vector<16x128xi32>
      %c128_i32 = arith.constant 128 : i32
      %13 = vector.broadcast %c128_i32 : i32 to vector<16x128xi32>
      %14 = arith.muli %11, %13 : vector<16x128xi32>
      %15 = arith.addi %14, %12 : vector<16x128xi32>
      %16 = arith.subi %1, %2 : i32
      %17 = vector.broadcast %16 : i32 to vector<16x128xi32>
      %18 = arith.cmpi slt, %15, %17 : vector<16x128xi32>
      %cst = arith.constant 0.000000e+00 : f32
      %19 = vector.broadcast %cst : f32 to vector<16x128xf32>
      %20 = arith.select %18, %10, %19 : vector<16x128xi1>, vector<16x128xf32>
      %21 = arith.truncf %20 : vector<16x128xf32> to vector<16x128xbf16>
      %c0_3 = arith.constant 0 : index
      %c0_4 = arith.constant 0 : index
      %22 = vector.load %arg4[%c0_3, %c0_4] : memref<128x256xbf16, #tpu.memory_space<vmem>>, vector<128x256xbf16>
      %cst_5 = arith.constant dense<0.000000e+00> : vector<16x256xf32>
      %23 = tpu.matmul %21, %22, %cst_5 {dimension_numbers = #tpu.dot_dimension_numbers<[1], [0], [0], [1], [0, 0, 1, 1], [], []>} : vector<16x128xbf16>, vector<128x256xbf16>, vector<16x256xf32> -> vector<16x256xf32>
      %c0_6 = arith.constant 0 : index
      %c0_7 = arith.constant 0 : index
      %24 = vector.load %arg5[%c0_6, %c0_7] : memref<1x256xf32, #tpu.memory_space<vmem>>, vector<1x256xf32>
      %25 = vector.broadcast %24 : vector<1x256xf32> to vector<16x256xf32>
      %26 = arith.addf %23, %25 : vector<16x256xf32>
      %27 = arith.truncf %26 : vector<16x256xf32> to vector<16x256xbf16>
      %c0_8 = arith.constant 0 : index
      %c0_9 = arith.constant 0 : index
      %28 = vector.load %arg6[%c0_8, %c0_9] : memref<256x256xbf16, #tpu.memory_space<vmem>>, vector<256x256xbf16>
      %cst_10 = arith.constant dense<0.000000e+00> : vector<16x256xf32>
      %29 = tpu.matmul %27, %28, %cst_10 {dimension_numbers = #tpu.dot_dimension_numbers<[1], [0], [0], [1], [0, 0, 1, 1], [], []>} : vector<16x256xbf16>, vector<256x256xbf16>, vector<16x256xf32> -> vector<16x256xf32>
      %c0_11 = arith.constant 0 : index
      %c0_12 = arith.constant 0 : index
      %30 = vector.load %arg7[%c0_11, %c0_12] : memref<1x256xf32, #tpu.memory_space<vmem>>, vector<1x256xf32>
      %31 = vector.broadcast %30 : vector<1x256xf32> to vector<16x256xf32>
      %32 = arith.addf %29, %31 : vector<16x256xf32>
      %33 = math.tanh %32 : vector<16x256xf32>
      %34 = arith.truncf %33 : vector<16x256xf32> to vector<16x256xbf16>
      %c0_13 = arith.constant 0 : index
      %c0_14 = arith.constant 0 : index
      %35 = vector.load %arg8[%c0_13, %c0_14] : memref<256x256xbf16, #tpu.memory_space<vmem>>, vector<256x256xbf16>
      %cst_15 = arith.constant dense<0.000000e+00> : vector<16x256xf32>
      %36 = tpu.matmul %34, %35, %cst_15 {dimension_numbers = #tpu.dot_dimension_numbers<[1], [0], [0], [1], [0, 0, 1, 1], [], []>} : vector<16x256xbf16>, vector<256x256xbf16>, vector<16x256xf32> -> vector<16x256xf32>
      %c0_16 = arith.constant 0 : index
      %c0_17 = arith.constant 0 : index
      %37 = vector.load %arg9[%c0_16, %c0_17] : memref<1x256xf32, #tpu.memory_space<vmem>>, vector<1x256xf32>
      %38 = vector.broadcast %37 : vector<1x256xf32> to vector<16x256xf32>
      %39 = arith.addf %36, %38 : vector<16x256xf32>
      %40 = math.tanh %39 : vector<16x256xf32>
      %41 = arith.truncf %26 : vector<16x256xf32> to vector<16x256xbf16>
      %42 = arith.extf %41 : vector<16x256xbf16> to vector<16x256xf32>
      %43 = arith.subf %26, %42 : vector<16x256xf32>
      %44 = arith.truncf %43 : vector<16x256xf32> to vector<16x256xbf16>
      %c0_18 = arith.constant 0 : index
      %c0_19 = arith.constant 0 : index
      %45 = vector.load %arg10[%c0_18, %c0_19] : memref<256x256xbf16, #tpu.memory_space<vmem>>, vector<256x256xbf16>
      %cst_20 = arith.constant dense<0.000000e+00> : vector<16x256xf32>
      %46 = tpu.matmul %41, %45, %cst_20 {dimension_numbers = #tpu.dot_dimension_numbers<[1], [0], [0], [1], [0, 0, 1, 1], [], []>} : vector<16x256xbf16>, vector<256x256xbf16>, vector<16x256xf32> -> vector<16x256xf32>
      %cst_21 = arith.constant dense<0.000000e+00> : vector<16x256xf32>
      %47 = tpu.matmul %44, %45, %cst_21 {dimension_numbers = #tpu.dot_dimension_numbers<[1], [0], [0], [1], [0, 0, 1, 1], [], []>} : vector<16x256xbf16>, vector<256x256xbf16>, vector<16x256xf32> -> vector<16x256xf32>
      %48 = arith.addf %46, %47 : vector<16x256xf32>
      %49 = arith.subf %26, %48 : vector<16x256xf32>
      %50 = arith.mulf %49, %49 : vector<16x256xf32>
      %51 = arith.truncf %50 : vector<16x256xf32> to vector<16x256xbf16>
      %52 = arith.extf %51 : vector<16x256xbf16> to vector<16x256xf32>
      %53 = arith.subf %50, %52 : vector<16x256xf32>
      %54 = arith.truncf %53 : vector<16x256xf32> to vector<16x256xbf16>
      %c0_22 = arith.constant 0 : index
      %c0_23 = arith.constant 0 : index
      %55 = vector.load %arg10[%c0_22, %c0_23] : memref<256x256xbf16, #tpu.memory_space<vmem>>, vector<256x256xbf16>
      %cst_24 = arith.constant dense<0.000000e+00> : vector<16x256xf32>
      %56 = tpu.matmul %51, %55, %cst_24 {dimension_numbers = #tpu.dot_dimension_numbers<[1], [0], [0], [1], [0, 0, 1, 1], [], []>} : vector<16x256xbf16>, vector<256x256xbf16>, vector<16x256xf32> -> vector<16x256xf32>
      %cst_25 = arith.constant dense<0.000000e+00> : vector<16x256xf32>
      %57 = tpu.matmul %54, %55, %cst_25 {dimension_numbers = #tpu.dot_dimension_numbers<[1], [0], [0], [1], [0, 0, 1, 1], [], []>} : vector<16x256xbf16>, vector<256x256xbf16>, vector<16x256xf32> -> vector<16x256xf32>
      %58 = arith.addf %56, %57 : vector<16x256xf32>
      %cst_26 = arith.constant 9.99999974E-6 : f32
      %59 = vector.broadcast %cst_26 : f32 to vector<16x256xf32>
      %60 = arith.addf %58, %59 : vector<16x256xf32>
      %61 = math.rsqrt %60 : vector<16x256xf32>
      %62 = arith.mulf %49, %61 : vector<16x256xf32>
      %63 = arith.truncf %62 : vector<16x256xf32> to vector<16x256xbf16>
      %c0_27 = arith.constant 0 : index
      %c0_28 = arith.constant 0 : index
      %c0_29 = arith.constant 0 : index
      %64 = vector.load %arg11[%c0_27, %c0_28, %c0_29] : memref<1x16x256xbf16, #tpu.memory_space<vmem>>, vector<1x16x256xbf16>
      %65 = vector.shape_cast %64 : vector<1x16x256xbf16> to vector<16x256xbf16>
      %66 = vector.shape_cast %63 : vector<16x256xbf16> to vector<1x16x256xbf16>
      tpu.vector_store %arg11[%c0_27, %c0_28, %c0_29], %66 {strides = array<i32>} : memref<1x16x256xbf16, #tpu.memory_space<vmem>>, vector<1x16x256xbf16>,
      %67 = arith.truncf %33 : vector<16x256xf32> to vector<16x256xbf16>
      %68 = arith.extf %67 : vector<16x256xbf16> to vector<16x256xf32>
      %69 = arith.subf %33, %68 : vector<16x256xf32>
      %70 = arith.truncf %69 : vector<16x256xf32> to vector<16x256xbf16>
      %c0_30 = arith.constant 0 : index
      %c0_31 = arith.constant 0 : index
      %71 = vector.load %arg10[%c0_30, %c0_31] : memref<256x256xbf16, #tpu.memory_space<vmem>>, vector<256x256xbf16>
      %cst_32 = arith.constant dense<0.000000e+00> : vector<16x256xf32>
      %72 = tpu.matmul %67, %71, %cst_32 {dimension_numbers = #tpu.dot_dimension_numbers<[1], [0], [0], [1], [0, 0, 1, 1], [], []>} : vector<16x256xbf16>, vector<256x256xbf16>, vector<16x256xf32> -> vector<16x256xf32>
      %cst_33 = arith.constant dense<0.000000e+00> : vector<16x256xf32>
      %73 = tpu.matmul %70, %71, %cst_33 {dimension_numbers = #tpu.dot_dimension_numbers<[1], [0], [0], [1], [0, 0, 1, 1], [], []>} : vector<16x256xbf16>, vector<256x256xbf16>, vector<16x256xf32> -> vector<16x256xf32>
      %74 = arith.addf %72, %73 : vector<16x256xf32>
      %75 = arith.subf %33, %74 : vector<16x256xf32>
      %76 = arith.mulf %75, %75 : vector<16x256xf32>
      %77 = arith.truncf %76 : vector<16x256xf32> to vector<16x256xbf16>
      %78 = arith.extf %77 : vector<16x256xbf16> to vector<16x256xf32>
      %79 = arith.subf %76, %78 : vector<16x256xf32>
      %80 = arith.truncf %79 : vector<16x256xf32> to vector<16x256xbf16>
      %c0_34 = arith.constant 0 : index
      %c0_35 = arith.constant 0 : index
      %81 = vector.load %arg10[%c0_34, %c0_35] : memref<256x256xbf16, #tpu.memory_space<vmem>>, vector<256x256xbf16>
      %cst_36 = arith.constant dense<0.000000e+00> : vector<16x256xf32>
      %82 = tpu.matmul %77, %81, %cst_36 {dimension_numbers = #tpu.dot_dimension_numbers<[1], [0], [0], [1], [0, 0, 1, 1], [], []>} : vector<16x256xbf16>, vector<256x256xbf16>, vector<16x256xf32> -> vector<16x256xf32>
      %cst_37 = arith.constant dense<0.000000e+00> : vector<16x256xf32>
      %83 = tpu.matmul %80, %81, %cst_37 {dimension_numbers = #tpu.dot_dimension_numbers<[1], [0], [0], [1], [0, 0, 1, 1], [], []>} : vector<16x256xbf16>, vector<256x256xbf16>, vector<16x256xf32> -> vector<16x256xf32>
      %84 = arith.addf %82, %83 : vector<16x256xf32>
      %cst_38 = arith.constant 9.99999974E-6 : f32
      %85 = vector.broadcast %cst_38 : f32 to vector<16x256xf32>
      %86 = arith.addf %84, %85 : vector<16x256xf32>
      %87 = math.rsqrt %86 : vector<16x256xf32>
      %88 = arith.mulf %75, %87 : vector<16x256xf32>
      %89 = arith.truncf %88 : vector<16x256xf32> to vector<16x256xbf16>
      %c0_39 = arith.constant 0 : index
      %c0_40 = arith.constant 0 : index
      %c0_41 = arith.constant 0 : index
      %90 = vector.load %arg12[%c0_39, %c0_40, %c0_41] : memref<1x16x256xbf16, #tpu.memory_space<vmem>>, vector<1x16x256xbf16>
      %91 = vector.shape_cast %90 : vector<1x16x256xbf16> to vector<16x256xbf16>
      %92 = vector.shape_cast %89 : vector<16x256xbf16> to vector<1x16x256xbf16>
      tpu.vector_store %arg12[%c0_39, %c0_40, %c0_41], %92 {strides = array<i32>} : memref<1x16x256xbf16, #tpu.memory_space<vmem>>, vector<1x16x256xbf16>,
      %93 = arith.truncf %40 : vector<16x256xf32> to vector<16x256xbf16>
      %94 = arith.extf %93 : vector<16x256xbf16> to vector<16x256xf32>
      %95 = arith.subf %40, %94 : vector<16x256xf32>
      %96 = arith.truncf %95 : vector<16x256xf32> to vector<16x256xbf16>
      %c0_42 = arith.constant 0 : index
      %c0_43 = arith.constant 0 : index
      %97 = vector.load %arg10[%c0_42, %c0_43] : memref<256x256xbf16, #tpu.memory_space<vmem>>, vector<256x256xbf16>
      %cst_44 = arith.constant dense<0.000000e+00> : vector<16x256xf32>
      %98 = tpu.matmul %93, %97, %cst_44 {dimension_numbers = #tpu.dot_dimension_numbers<[1], [0], [0], [1], [0, 0, 1, 1], [], []>} : vector<16x256xbf16>, vector<256x256xbf16>, vector<16x256xf32> -> vector<16x256xf32>
      %cst_45 = arith.constant dense<0.000000e+00> : vector<16x256xf32>
      %99 = tpu.matmul %96, %97, %cst_45 {dimension_numbers = #tpu.dot_dimension_numbers<[1], [0], [0], [1], [0, 0, 1, 1], [], []>} : vector<16x256xbf16>, vector<256x256xbf16>, vector<16x256xf32> -> vector<16x256xf32>
      %100 = arith.addf %98, %99 : vector<16x256xf32>
      %101 = arith.subf %40, %100 : vector<16x256xf32>
      %102 = arith.mulf %101, %101 : vector<16x256xf32>
      %103 = arith.truncf %102 : vector<16x256xf32> to vector<16x256xbf16>
      %104 = arith.extf %103 : vector<16x256xbf16> to vector<16x256xf32>
      %105 = arith.subf %102, %104 : vector<16x256xf32>
      %106 = arith.truncf %105 : vector<16x256xf32> to vector<16x256xbf16>
      %c0_46 = arith.constant 0 : index
      %c0_47 = arith.constant 0 : index
      %107 = vector.load %arg10[%c0_46, %c0_47] : memref<256x256xbf16, #tpu.memory_space<vmem>>, vector<256x256xbf16>
      %cst_48 = arith.constant dense<0.000000e+00> : vector<16x256xf32>
      %108 = tpu.matmul %103, %107, %cst_48 {dimension_numbers = #tpu.dot_dimension_numbers<[1], [0], [0], [1], [0, 0, 1, 1], [], []>} : vector<16x256xbf16>, vector<256x256xbf16>, vector<16x256xf32> -> vector<16x256xf32>
      %cst_49 = arith.constant dense<0.000000e+00> : vector<16x256xf32>
      %109 = tpu.matmul %106, %107, %cst_49 {dimension_numbers = #tpu.dot_dimension_numbers<[1], [0], [0], [1], [0, 0, 1, 1], [], []>} : vector<16x256xbf16>, vector<256x256xbf16>, vector<16x256xf32> -> vector<16x256xf32>
      %110 = arith.addf %108, %109 : vector<16x256xf32>
      %cst_50 = arith.constant 9.99999974E-6 : f32
      %111 = vector.broadcast %cst_50 : f32 to vector<16x256xf32>
      %112 = arith.addf %110, %111 : vector<16x256xf32>
      %113 = math.rsqrt %112 : vector<16x256xf32>
      %114 = arith.mulf %101, %113 : vector<16x256xf32>
      %115 = arith.truncf %114 : vector<16x256xf32> to vector<16x256xbf16>
      %c0_51 = arith.constant 0 : index
      %c0_52 = arith.constant 0 : index
      %c0_53 = arith.constant 0 : index
      %116 = vector.load %arg13[%c0_51, %c0_52, %c0_53] : memref<1x16x256xbf16, #tpu.memory_space<vmem>>, vector<1x16x256xbf16>
      %117 = vector.shape_cast %116 : vector<1x16x256xbf16> to vector<16x256xbf16>
      %118 = vector.shape_cast %115 : vector<16x256xbf16> to vector<1x16x256xbf16>
      tpu.vector_store %arg13[%c0_51, %c0_52, %c0_53], %118 {strides = array<i32>} : memref<1x16x256xbf16, #tpu.memory_space<vmem>>, vector<1x16x256xbf16>,
    } else {
    }
    return
  }
  func.func @transform_0(%arg0: i32, %arg1: i32, %arg2: memref<2xi32, #tpu.memory_space<smem>>) -> (i32, i32, i32) {
    %c0_i32 = arith.constant 0 : i32
    %c0_i32_0 = arith.constant 0 : i32
    return %arg0, %arg1, %c0_i32 : i32, i32, i32
  }
  func.func @transform_1(%arg0: i32, %arg1: i32, %arg2: memref<2xi32, #tpu.memory_space<smem>>) -> (i32, i32) {
    %c0_i32 = arith.constant 0 : i32
    %c0_i32_0 = arith.constant 0 : i32
    %c0_i32_1 = arith.constant 0 : i32
    return %c0_i32, %c0_i32_0 : i32, i32
  }
  func.func @transform_2(%arg0: i32, %arg1: i32, %arg2: memref<2xi32, #tpu.memory_space<smem>>) -> (i32, i32) {
    %c0_i32 = arith.constant 0 : i32
    %c0_i32_0 = arith.constant 0 : i32
    %c0_i32_1 = arith.constant 0 : i32
    return %c0_i32, %c0_i32_0 : i32, i32
  }
  func.func @transform_3(%arg0: i32, %arg1: i32, %arg2: memref<2xi32, #tpu.memory_space<smem>>) -> (i32, i32) {
    %c0_i32 = arith.constant 0 : i32
    %c0_i32_0 = arith.constant 0 : i32
    %c0_i32_1 = arith.constant 0 : i32
    return %c0_i32, %c0_i32_0 : i32, i32
  }
  func.func @transform_4(%arg0: i32, %arg1: i32, %arg2: memref<2xi32, #tpu.memory_space<smem>>) -> (i32, i32) {
    %c0_i32 = arith.constant 0 : i32
    %c0_i32_0 = arith.constant 0 : i32
    %c0_i32_1 = arith.constant 0 : i32
    return %c0_i32, %c0_i32_0 : i32, i32
  }
  func.func @transform_5(%arg0: i32, %arg1: i32, %arg2: memref<2xi32, #tpu.memory_space<smem>>) -> (i32, i32) {
    %c0_i32 = arith.constant 0 : i32
    %c0_i32_0 = arith.constant 0 : i32
    %c0_i32_1 = arith.constant 0 : i32
    return %c0_i32, %c0_i32_0 : i32, i32
  }
  func.func @transform_6(%arg0: i32, %arg1: i32, %arg2: memref<2xi32, #tpu.memory_space<smem>>) -> (i32, i32) {
    %c0_i32 = arith.constant 0 : i32
    %c0_i32_0 = arith.constant 0 : i32
    %c0_i32_1 = arith.constant 0 : i32
    return %c0_i32, %c0_i32_0 : i32, i32
  }
  func.func @transform_7(%arg0: i32, %arg1: i32, %arg2: memref<2xi32, #tpu.memory_space<smem>>) -> (i32, i32) {
    %c0_i32 = arith.constant 0 : i32
    %c0_i32_0 = arith.constant 0 : i32
    %c0_i32_1 = arith.constant 0 : i32
    return %c0_i32, %c0_i32_0 : i32, i32
  }
  func.func @transform_8(%arg0: i32, %arg1: i32, %arg2: memref<2xi32, #tpu.memory_space<smem>>) -> (i32, i32, i32) {
    %c0_i32 = arith.constant 0 : i32
    %c0_i32_0 = arith.constant 0 : i32
    return %arg0, %arg1, %c0_i32 : i32, i32, i32
  }
  func.func @transform_9(%arg0: i32, %arg1: i32, %arg2: memref<2xi32, #tpu.memory_space<smem>>) -> (i32, i32, i32) {
    %c0_i32 = arith.constant 0 : i32
    %c0_i32_0 = arith.constant 0 : i32
    return %arg0, %arg1, %c0_i32 : i32, i32, i32
  }
  func.func @transform_10(%arg0: i32, %arg1: i32, %arg2: memref<2xi32, #tpu.memory_space<smem>>) -> (i32, i32, i32) {
    %c0_i32 = arith.constant 0 : i32
    %c0_i32_0 = arith.constant 0 : i32
    return %arg0, %arg1, %c0_i32 : i32, i32, i32
  }
}

</mosaic_0001>

<bundles_post_ra>
// kernel: tpu_custom_call.1
= control target key start
LH: loop header
LB: loop body
LE: loop exit
PB: predicated region body
PF: predicated region fallthrough
CT: control target
= control target key end

     0   :  { %s4403_s20 = smov [#allocation3]   ;;  %s5568_s0 = inlined_call_operand.hbm [shape: s32[2], index: 0, kind: input, shape index: {}]   ;;  %s5569_s1 = inlined_call_operand.hbm [shape: f32[2,16,128], index: 1, kind: input, shape index: {}]   ;;  %s5570_s2 = inlined_call_operand.hbm [shape: bf16[128,256], index: 2, kind: input, shape index: {}]   ;;  %s5571_s3 = inlined_call_operand.vmem [shape: f32[1,256], index: 3, kind: input, shape index: {}]   ;;  %s5572_s4 = inlined_call_operand.hbm [shape: bf16[256,256], index: 4, kind: input, shape index: {}]   ;;  %s5573_s5 = inlined_call_operand.vmem [shape: f32[1,256], index: 5, kind: input, shape index: {}]   ;;  %s5574_s6 = inlined_call_operand.hbm [shape: bf16[256,256], index: 6, kind: input, shape index: {}]   ;;  %s5575_s7 = inlined_call_operand.vmem [shape: f32[1,256], index: 7, kind: input, shape index: {}]   ;;  %s5576_s8 = inlined_call_operand.hbm [shape: bf16[256,256], index: 8, kind: input, shape index: {}]   ;;  %s5577_s9 = inlined_call_operand.hbm [shape: bf16[2,16,256], index: 9, kind: output, shape index: {0}]   ;;  %s5578_s10 = inlined_call_operand.hbm [shape: bf16[2,16,256], index: 10, kind: output, shape index: {1}]   ;;  %s5579_s11 = inlined_call_operand.hbm [shape: bf16[2,16,256], index: 11, kind: output, shape index: {2}]  }
   0x1   :  { %5589 = sst [smem:[#allocation26_spill]] %s5569_s1  ;;  %s18_s19 = sshll.u32 %s5568_s0, 4  ;;  %s19_s19 = int_to_ptr.hbm [resolvable:$true] %s18_s19 }
   0x2   :  { %5590 = sst [smem:[#allocation27_spill]] %s5570_s2 }
   0x3   :  { %5591 = sst [smem:[#allocation28_spill]] %s5572_s4 }
   0x4   :  { %5592 = sst [smem:[#allocation29_spill]] %s5574_s6 }
   0x5   :  { %5593 = sst [smem:[#allocation30_spill]] %s5576_s8 }
   0x6   :  { %21 = dma.hbm_to_smem %s19_s19, 16, %s4403_s20, [#allocation2] }
   0x7   :  { %4357 = dma.done.wait [#allocation2], 16 }
   0x8   :  { %4358 = vsyncadd [#allocation2], 4294967280 }
   0x9   :  { %24 = sfence }
   0xa   :  { %25 = vsyncpa [#allocation5], 0 }
   0xb   :  { %27 = vsyncpa [#allocation5 + $0x1], 0 }
   0xc   :  { %28 = vsyncpa [#allocation8], 0 }
   0xd   :  { %29 = vsyncpa [#allocation11], 0 }
   0xe   :  { %30 = vsyncpa [#allocation6], 0 }
   0xf   :  { %32 = vsyncpa [#allocation6 + $0x1], 0 }
  0x10   :  { %33 = vsyncpa [#allocation15], 0 }
  0x11   :  { %35 = vsyncpa [#allocation15 + $0x1], 0  ;;  %s4476_s21 = smov 0   ;;  %s4478_s22 = smov 0  }
  0x12   :  { %s4480_s23 = smov 0   ;;  %s4482_s0 = smov 0  }
  0x13   :  { %s4484_s24 = smov 0   ;;  %s4486_s25 = smov 0  }
  0x14 LB: > { %5594 = sst [smem:[#allocation23_spill]] %s4381_s21  ;;  %s4507_s26 = sadd.s32 4294967295, %s4401_s25   ;;  %s4401_s25 = sphi %s4486_s25, %s41_s25   ;;  %s4397_s24 = sphi %s4484_s24, %s5623_s24   ;;  %s4393_s0 = sphi %s4482_s0, %s5622_s0   ;;  %s4389_s23 = sphi %s4480_s23, %s5621_s23   ;;  %s4385_s22 = sphi %s4478_s22, %s5620_s22   ;;  %s4381_s21 = sphi %s4476_s21, %s5619_s21  }
  0x15   : > { %s5580_s27 = sadd.s32 4294967294, %s4401_s25   ;;  %p75_p0 = scmp.ne.s32.totalorder %s4385_s22, %s4381_s21 }
  0x16   : > { %p76_p1 = scmp.eq.s32.totalorder %s4507_s26, 0  ;;  %p254_p2 = scmp.eq.s32.totalorder %s5580_s27, 1 }
  0x17   : > { %p3005_p4 = scmp.ge.s32.totalorder %s4401_s25, 1  ;;  %p317_p6 = scmp.lt.s32.totalorder %s4401_s25, 3 }
  0x18   : > { %p4517_p3 = por %p76_p1, %p75_p0  ;;  %p4522_p5 = por %p254_p2, %p75_p0 }
  0x19   : > { %s5598_s2 = sld [smem:[#allocation27_spill]]  ;;  %p4530_p7 = pnand %p3005_p4, %p317_p6 }
  0x1a   : > { %s5596_s29 = scalar_select %p4522_p5, 1, 0 }
  0x1b   : > { %p3952_p8 = pneg %p4530_p7  ;;  %s4404_s15 = smov [#allocation7]  }
  0x1c   : > { %5597 = sst [smem:[#allocation24_spill]] %s5596_s29  ;;  %s330_s16 = sshll.u32 %s4404_s15, 4  ;;  %s331_s16 = int_to_ptr.vmem [resolvable:$true] %s330_s16 }
  0x1d   : > { %p4538_p9 = pnand %p3952_p8, %p76_p1  ;;  %p3010_p10 = scmp.ge.s32.totalorder %s4401_s25, 2 }
  0x1e   : > { %s5601_s6 = sld [smem:[#allocation29_spill]]  ;;  %s5583_s30 = smov 128  }
  0x1f   : > { %s328_s13 = sshll.u32 %s5598_s2, 4  ;;  %s5584_s12 = smov 8   ;;  %s329_s13 = int_to_ptr.hbm [resolvable:$true] %s328_s13 }
  0x20   : > { %3955 = dma.hbm_to_vmem [thread:$0]  (!%p4538_p9), %s329_s13, 2048, %s331_s16, [#allocation8], %s5583_s30, %s5583_s30, %s5584_s12  }
  0x21   : > { %s4407_s15 = smov [#allocation10]   ;;  %s5602_s4 = sld [smem:[#allocation28_spill]] }
  0x22   : > { %s364_s27 = sshll.u32 %s4407_s15, 4  ;;  %s5603_s8 = sld [smem:[#allocation30_spill]]  ;;  %s365_s27 = int_to_ptr.vmem [resolvable:$true] %s364_s27 }
  0x23   : > { %s4408_s19 = smov [#allocation9]   ;;  %s4409_s2 = smov [#allocation12]  }
  0x24   : > { %s362_s20 = sshll.u32 %s5601_s6, 4  ;;  %s347_s15 = sshll.u32 %s4408_s19, 4  ;;  %s363_s20 = int_to_ptr.hbm [resolvable:$true] %s362_s20  ;;  %s348_s15 = int_to_ptr.vmem [resolvable:$true] %s347_s15 }
  0x25   : > { %3961 = dma.hbm_to_vmem [thread:$0]  (!%p4538_p9), %s363_s20, 4096, %s365_s27, [#allocation11], %s5583_s30, %s5583_s30, %s5584_s12  }
  0x26   : > { %s381_s29 = sshll.u32 %s4409_s2, 4  ;;  %p248_p11 = scmp.eq.s32.totalorder %s4507_s26, 1  ;;  %s382_s29 = int_to_ptr.vmem [resolvable:$true] %s381_s29 }
  0x27   : > { %s345_s21 = sshll.u32 %s5602_s4, 4  ;;  %s53_s27 = sadd.s32 1, %s4397_s24  ;;  %s346_s21 = int_to_ptr.hbm [resolvable:$true] %s345_s21 }
  0x28   : > { %s379_s18 = sshll.u32 %s5603_s8, 4  ;;  %p55_p12 = scmp.ge.s32.totalorder %s53_s27, 2  ;;  %s380_s18 = int_to_ptr.hbm [resolvable:$true] %s379_s18 }
  0x29   : > { %3958 = dma.hbm_to_vmem [thread:$0]  (!%p4538_p9), %s346_s21, 4096, %s348_s15, [#allocation8], %s5583_s30, %s5583_s30, %s5584_s12  }
  0x2a   : > { %3964 = dma.hbm_to_vmem [thread:$0]  (!%p4538_p9), %s380_s18, 4096, %s382_s29, [#allocation11], %s5583_s30, %s5583_s30, %s5584_s12  }
  0x2b   : > { %s62_s20 = sadd.s32 1, %s4389_s23  ;;  %p69_p13 = scmp.ne.s32.totalorder %s4389_s23, %s4385_s22 }
  0x2c   : > { %p70_p0 = scmp.eq.s32.totalorder %s4401_s25, 0  ;;  %s5625_s27 = smov (%p55_p12, %s53_s27), 0 }
  0x2d   : > { %5604 = sst [smem:[#allocation25_spill]] %s5625_s27  ;;  %p4580_p2 = por %p248_p11, %p69_p13 }
  0x2e   : > { %p3983_p4 = scmp.lt.s32.totalorder %s4401_s25, 2  ;;  %s57_s17 = ssub.s32 %s4397_s24, %s5625_s27 }
  0x2f   : > { %s395_s13 = sand.u32 1, %s4389_s23   ;;  %p60_p6 = scmp.eq.s32.totalorder %s57_s17, 0 }
  0x30   : > { %p71_p8 = por %p70_p0, %p69_p13  ;;  %s3011_s16 = sshll.u32 %s395_s13, 4 }
  0x31   : > { %s3748_s18 = sshll.u32 %s4397_s24, 4  ;;  %s5606_s1 = sld [smem:[#allocation26_spill]] }
  0x32   : > { %s4590_s19 = scalar_select %p60_p6, %s4389_s23, %s62_s20  }
  0x33   : > { %s399_s12 = scalar_lea.vmem [#allocation4], %s3011_s16  ;;  %p3966_p9 = pnand %p3983_p4, %p71_p8 }
  0x34   : > { %s409_s4 = sshll.u32 %s399_s12, 4  ;;  %s396_s6 = scalar_lea.sflag [#allocation5], %s395_s13  ;;  %s410_s4 = int_to_ptr.vmem [resolvable:$true] %s409_s4 }
  0x35   : > { %s5607_s8 = smov 8   ;;  %s5608_s27 = smov 128  }
  0x36   : > { %421 = sbr.rel (%p4530_p7) target bundleno = 1285 (0x505), region = 52  ;;  %s4603_s20 = sand.u32 (!%p4530_p7), 1, %s4385_s22  }
  0x37   : > { %s406_s29 = scalar_lea.hbm %s5606_s1, %s3748_s18  ;;  %s4606_s17 = sshll.u32 (!%p4530_p7), %s4603_s20, 4 }
  0x38   : > { %s407_s30 = sshll.u32 %s406_s29, 4  ;;  %s424_s12 = scalar_lea.sflag (!%p4530_p7), [#allocation5], %s4603_s20  ;;  %s408_s30 = int_to_ptr.hbm [resolvable:$true] %s407_s30 }
  0x39   : > { %3968 = dma.hbm_to_vmem [thread:$0]  (!%p3966_p9), %s408_s30, 256, %s410_s4, %s396_s6, %s5608_s27, %s5608_s27, %s5607_s8  }
  0x3a   : > { %s427_s16 = scalar_lea.vmem (!%p4530_p7), [#allocation4], %s4606_s17 }
  0x3b   : > { %4360 = dma.done.wait (%p4517_p3), %s424_s12, 256  }
  0x3c   : > { %4362 = vsyncadd (%p4517_p3), %s424_s12, 4294967040 }
  0x3d   : > { %4364 = dma.done.wait (%p76_p1), [#allocation8], 6144  }
  0x3e   : > { %4366 = vsyncadd (%p76_p1), [#allocation8], 4294961152 }
  0x3f   : > { %4368 = dma.done.wait (%p76_p1), [#allocation11], 8192  }
  0x40   : > { %4370 = vsyncadd (%p76_p1), [#allocation11], 4294959104  ;;  %s4623_s4 = sld [smem:[#allocation3 + %s4393_s0]]  ;;  %s4626_s6 = scalar_lea.vmem [#allocation13], %s4606_s17 }
  0x41   : > { %s4629_s8 = scalar_lea.vmem [#allocation14], %s4606_s17  ;;  %s4632_s28 = scalar_lea.vmem [#allocation16], %s4606_s17 }
  0x46   : > { %p3024_p3 = scmp.gt.s32.totalorder %s4623_s4, 0 }
  0x48   : > { %505 = sbr.rel (%p3024_p3) target bundleno = 84 (0x54), region = 76 }
  0x4d   : > { %v4410_v0 = vmov 0  }
  0x4e   : > { %506 = vst [vmem:[%s4626_s6] sm:$0xff] %v4410_v0 }
  0x4f   : > { %507 = vst [vmem:[%s4626_s6 + $0x8] sm:$0xff] %v4410_v0 }
  0x50   : > { %508 = vst [vmem:[%s4629_s8] sm:$0xff] %v4410_v0 }
  0x51   : > { %509 = vst [vmem:[%s4629_s8 + $0x8] sm:$0xff] %v4410_v0 }
  0x52   : > { %510 = vst [vmem:[%s4632_s28] sm:$0xff] %v4410_v0 }
  0x53   : > { %511 = vst [vmem:[%s4632_s28 + $0x8] sm:$0xff] %v4410_v0 }
  0x54 PF: > { %p3026_p1 = scmp.le.s32.totalorder %s4623_s4, 0 }
  0x56   : > { %515 = sbr.rel (%p3026_p1) target bundleno = 1241 (0x4d9), region = 80 }
  0x5b   : > { %v3085_v1 = vld [vmem:[#allocation7 + $0x70] sm:$0xf]  ;;  %v3764_v2 = vld [vmem:[#allocation7 + $0x74] sm:$0xf0]  ;;  %v3763_v3 = vld [vmem:[#allocation7 + $0x74] sm:$0xf]  ;;  %v518_v21 = vlaneseq }
  0x5c   : > { %v3086_v4 = vor.u32 %v3764_v2, %v3085_v1  ;;  %v3087_v5 = vld [vmem:[#allocation7 + $0x78] sm:$0xf0]  ;;  %v3077_v6 = vld [vmem:[#allocation7 + $0x60] sm:$0xf]  ;;  %v3762_v7 = vld [vmem:[#allocation7 + $0x64] sm:$0xf0] }
  0x5d   : > { %v3090_v8 = vor.u32 %v3763_v3, %v3087_v5  ;;  %v3761_v9 = vld [vmem:[#allocation7 + $0x64] sm:$0xf]  ;;  %v3079_v10 = vld [vmem:[#allocation7 + $0x68] sm:$0xf0]  ;;  %v3078_v11 = vor.u32 %v3762_v7, %v3077_v6  ;;  %v3069_v13 = vld [vmem:[#allocation7 + $0x50] sm:$0xf] }
  0x5e   : > { %636 = vmatpush.bf16.msra.mxu0 %v3086_v4  ;;  %v3082_v12 = vor.u32 %v3761_v9, %v3079_v10  ;;  %v3760_v14 = vld [vmem:[#allocation7 + $0x54] sm:$0xf0]  ;;  %v3759_v15 = vld [vmem:[#allocation7 + $0x54] sm:$0xf]  ;;  %v3071_v16 = vld [vmem:[#allocation7 + $0x58] sm:$0xf0] }
  0x5f   : > { %650 = vmatpush.bf16.msra.mxu1 %v3090_v8  ;;  %v3070_v17 = vor.u32 %v3760_v14, %v3069_v13  ;;  %v3074_v18 = vor.u32 %v3759_v15, %v3071_v16  ;;  %v3061_v19 = vld [vmem:[#allocation7 + $0x40] sm:$0xf]  ;;  %v3758_v20 = vld [vmem:[#allocation7 + $0x44] sm:$0xf0]  ;;  %v3757_v22 = vld [vmem:[#allocation7 + $0x44] sm:$0xf]  ;;  %v528_v15 = vstv %s4623_s4 }
  0x60   : > { %v3063_v23 = vld [vmem:[#allocation7 + $0x48] sm:$0xf0]  ;;  %v3053_v24 = vld [vmem:[#allocation7 + $0x30] sm:$0xf]  ;;  %v3062_v25 = vor.u32 %v3758_v20, %v3061_v19  ;;  %v3756_v26 = vld [vmem:[#allocation7 + $0x34] sm:$0xf0] }
  0x61   : > { %v3155_v27 = vld [vmem:[#allocation9 + $0x70] sm:$0xf]  ;;  %v3780_v28 = vld [vmem:[#allocation9 + $0x74] sm:$0xf0]  ;;  %v3066_v29 = vor.u32 %v3757_v22, %v3063_v23  ;;  %v519_v30 = vshrl.u32 %v518_v21, 7  ;;  %v3054_v39 = vor.u32 %v3756_v26, %v3053_v24  ;;  %v522_v59 = vand.u32 127, %v518_v21 }
  0x62   : > { %637 = vmatpush.bf16.msra.mxu0 %v3078_v11  ;;  %v3156_v31 = vor.u32 %v3780_v28, %v3155_v27  ;;  %v3219_v32 = vld [vmem:[#allocation9 + $0xf0] sm:$0xf]  ;;  %v3796_v33 = vld [vmem:[#allocation9 + $0xf4] sm:$0xf0]  ;;  %v3755_v34 = vld [vmem:[#allocation7 + $0x34] sm:$0xf] }
  0x63   : > { %651 = vmatpush.bf16.msra.mxu1 %v3082_v12  ;;  %v3055_v35 = vld [vmem:[#allocation7 + $0x38] sm:$0xf0]  ;;  %v3220_v36 = vor.u32 %v3796_v33, %v3219_v32  ;;  %v3045_v37 = vld [vmem:[#allocation7 + $0x20] sm:$0xf]  ;;  %v3778_v40 = vld [vmem:[#allocation9 + $0x64] sm:$0xf0] }
  0x64   : > { %874 = vmatpush.bf16.msra.mxu2 %v3156_v31  ;;  %v3147_v38 = vld [vmem:[#allocation9 + $0x60] sm:$0xf]  ;;  %v3794_v42 = vld [vmem:[#allocation9 + $0xe4] sm:$0xf0]  ;;  %v3058_v43 = vor.u32 %v3755_v34, %v3055_v35  ;;  %v3753_v45 = vld [vmem:[#allocation7 + $0x24] sm:$0xf] }
  0x65   : > { %888 = vmatpush.bf16.msra.mxu3 %v3220_v36  ;;  %v3211_v41 = vld [vmem:[#allocation9 + $0xe0] sm:$0xf]  ;;  %v3754_v44 = vld [vmem:[#allocation7 + $0x24] sm:$0xf0]  ;;  %v520_v46 = vadd.s32 8, %v519_v30  ;;  %v3148_v47 = vor.u32 %v3778_v40, %v3147_v38  ;;  %v523_v62 = vmul.u32 128, %v519_v30 }
  0x66   : > { %638 = vmatpush.bf16.msra.mxu0 %v3070_v17  ;;  %v3212_v48 = vor.u32 %v3794_v42, %v3211_v41  ;;  %v3047_v49 = vld [vmem:[#allocation7 + $0x28] sm:$0xf0]  ;;  %v3139_v50 = vld [vmem:[#allocation9 + $0x50] sm:$0xf]  ;;  %v3776_v51 = vld [vmem:[#allocation9 + $0x54] sm:$0xf0]  ;;  %v3046_v56 = vor.u32 %v3754_v44, %v3045_v37 }
  0x67   : > { %652 = vmatpush.bf16.msra.mxu1 %v3074_v18  ;;  %v3037_v52 = vld [vmem:[#allocation7 + $0x10] sm:$0xf]  ;;  %v3140_v53 = vor.u32 %v3776_v51, %v3139_v50  ;;  %v3792_v55 = vld [vmem:[#allocation9 + $0xd4] sm:$0xf0]  ;;  %v3751_v58 = vld [vmem:[#allocation7 + $0x14] sm:$0xf]  ;;  %v3050_v61 = vor.u32 %v3753_v45, %v3047_v49  ;;  %v525_v12 = vadd.s32 %v523_v62, %v522_v59 }
  0x68   : > { %875 = vmatpush.bf16.msra.mxu2 %v3148_v47  ;;  %v3203_v54 = vld [vmem:[#allocation9 + $0xd0] sm:$0xf]  ;;  %v3752_v57 = vld [vmem:[#allocation7 + $0x14] sm:$0xf0]  ;;  %v524_v63 = vmul.u32 128, %v520_v46 }
  0x69   : > { %889 = vmatpush.bf16.msra.mxu3 %v3212_v48  ;;  %v3204_v60 = vor.u32 %v3792_v55, %v3203_v54  ;;  %v3131_v0 = vld [vmem:[#allocation9 + $0x40] sm:$0xf]  ;;  %v3774_v1 = vld [vmem:[#allocation9 + $0x44] sm:$0xf0]  ;;  %v3039_v2 = vld [vmem:[#allocation7 + $0x18] sm:$0xf0]  ;;  %v3038_v6 = vor.u32 %v3752_v57, %v3037_v52  ;;  %vm4647_vm0 = vcmp.lt.s32.totalorder %v525_v12, %v528_v15 }
  0x6a   : > { %639 = vmatpush.bf16.msra.mxu0 %v3062_v25  ;;  %v3195_v3 = vld [vmem:[#allocation9 + $0xc0] sm:$0xf]  ;;  %v3790_v4 = vld [vmem:[#allocation9 + $0xc4] sm:$0xf0]  ;;  %v3132_v5 = vor.u32 %v3774_v1, %v3131_v0  ;;  %v3042_v8 = vor.u32 %v3751_v58, %v3039_v2  ;;  %v3749_v11 = vld [vmem:[#allocation7 + $0x4] sm:$0xf]  ;;  %v526_v13 = vadd.s32 %v524_v63, %v522_v59 }
  0x6b   : > { %653 = vmatpush.bf16.msra.mxu1 %v3066_v29  ;;  %v3196_v7 = vor.u32 %v3790_v4, %v3195_v3  ;;  %v3029_v9 = vld [vmem:[#allocation7] sm:$0xf]  ;;  %v3750_v10 = vld [vmem:[#allocation7 + $0x4] sm:$0xf0]  ;;  %v3031_v14 = vld [vmem:[#allocation7 + $0x8] sm:$0xf0] }
  0x6c   : > { %876 = vmatpush.bf16.msra.mxu2 %v3140_v53  ;;  %v3779_v16 = vld [vmem:[#allocation9 + $0x74] sm:$0xf]  ;;  %v3157_v17 = vld [vmem:[#allocation9 + $0x78] sm:$0xf0]  ;;  %v3030_v20 = vor.u32 %v3750_v10, %v3029_v9  ;;  %v3034_v23 = vor.u32 %v3749_v11, %v3031_v14  ;;  %vm4651_vm1 = vcmp.lt.s32.totalorder %v526_v13, %v528_v15  ;;  %v3777_v28 = vld [vmem:[#allocation9 + $0x64] sm:$0xf] }
  0x6d   : > { %890 = vmatpush.bf16.msra.mxu3 %v3204_v60  ;;  %v3795_v18 = vld [vmem:[#allocation9 + $0xf4] sm:$0xf]  ;;  %v3221_v19 = vld [vmem:[#allocation9 + $0xf8] sm:$0xf0]  ;;  %v3160_v26 = vor.u32 %v3779_v16, %v3157_v17  ;;  %v3149_v29 = vld [vmem:[#allocation9 + $0x68] sm:$0xf0] }
  0x6e   : > { %640 = vmatpush.bf16.msra.mxu0 %v3054_v39  ;;  %v516_v21 = vld [vmem:[%s427_s16] sm:$0xff]  ;;  %v517_v22 = vld [vmem:[%s427_s16 + $0x8] sm:$0xff]  ;;  %v3224_v27 = vor.u32 %v3795_v18, %v3221_v19  ;;  %vm3091_vm2 = vmpackc.low %vm4651_vm1, %vm4647_vm0  ;;  %v3152_v33 = vor.u32 %v3777_v28, %v3149_v29 }
  0x6f   : > { %654 = vmatpush.bf16.msra.mxu1 %v3058_v43  ;;  %v3092_v30 = vpack.c.bf16 %v517_v22, %v516_v21  ;;  %v3793_v31 = vld [vmem:[#allocation9 + $0xe4] sm:$0xf]  ;;  %v3213_v32 = vld [vmem:[#allocation9 + $0xe8] sm:$0xf0]  ;;  %v3775_v35 = vld [vmem:[#allocation9 + $0x54] sm:$0xf] }
  0x70   : > { %877 = vmatpush.bf16.msra.mxu2 %v3132_v5  ;;  %v3216_v34 = vor.u32 %v3793_v31, %v3213_v32  ;;  %v3141_v36 = vld [vmem:[#allocation9 + $0x58] sm:$0xf0]  ;;  %v3791_v37 = vld [vmem:[#allocation9 + $0xd4] sm:$0xf]  ;;  %v3773_v41 = vld [vmem:[#allocation9 + $0x44] sm:$0xf] }
  0x71   : > { %891 = vmatpush.bf16.msra.mxu3 %v3196_v7  ;;  %v3205_v38 = vld [vmem:[#allocation9 + $0xd8] sm:$0xf0]  ;;  %v3144_v39 = vor.u32 %v3775_v35, %v3141_v36  ;;  %v3133_v42 = vld [vmem:[#allocation9 + $0x48] sm:$0xf0]  ;;  %v3789_v43 = vld [vmem:[#allocation9 + $0xc4] sm:$0xf] }
  0x72   : > { %641 = vmatpush.bf16.msra.mxu0 %v3046_v56  ;;  %v3208_v40 = vor.u32 %v3791_v37, %v3205_v38  ;;  %v3197_v44 = vld [vmem:[#allocation9 + $0xc8] sm:$0xf0]  ;;  %v3136_v45 = vor.u32 %v3773_v41, %v3133_v42  ;;  %v3123_v47 = vld [vmem:[#allocation9 + $0x30] sm:$0xf]  ;;  %v3772_v48 = vld [vmem:[#allocation9 + $0x34] sm:$0xf0] }
  0x73   : > { %655 = vmatpush.bf16.msra.mxu1 %v3050_v61  ;;  %v3200_v46 = vor.u32 %v3789_v43, %v3197_v44  ;;  %v3124_v49 = vor.u32 %v3772_v48, %v3123_v47  ;;  %v3187_v50 = vld [vmem:[#allocation9 + $0xb0] sm:$0xf]  ;;  %v3788_v51 = vld [vmem:[#allocation9 + $0xb4] sm:$0xf0]  ;;  %v3771_v52 = vld [vmem:[#allocation9 + $0x34] sm:$0xf] }
  0x74   : > { %v3188_v53 = vor.u32 %v3788_v51, %v3187_v50  ;;  %v3125_v54 = vld [vmem:[#allocation9 + $0x38] sm:$0xf0]  ;;  %v3787_v55 = vld [vmem:[#allocation9 + $0xb4] sm:$0xf]  ;;  %v3115_v59 = vld [vmem:[#allocation9 + $0x20] sm:$0xf] }
  0x75   : > { %v3189_v56 = vld [vmem:[#allocation9 + $0xb8] sm:$0xf0]  ;;  %878 = vmatpush.bf16.msra.mxu2 %v3124_v49  ;;  %v3128_v57 = vor.u32 %v3771_v52, %v3125_v54  ;;  %v3770_v60 = vld [vmem:[#allocation9 + $0x24] sm:$0xf0]  ;;  %v3179_v61 = vld [vmem:[#allocation9 + $0xa0] sm:$0xf] }
  0x76   : > { %642 = vmatpush.bf16.msra.mxu0 %v3038_v6  ;;  %v3192_v58 = vor.u32 %v3787_v55, %v3189_v56  ;;  %892 = vmatpush.bf16.msra.mxu3 %v3188_v53  ;;  %v3116_v62 = vor.u32 %v3770_v60, %v3115_v59  ;;  %v3786_v63 = vld [vmem:[#allocation9 + $0xa4] sm:$0xf0]  ;;  %v3769_v0 = vld [vmem:[#allocation9 + $0x24] sm:$0xf]  ;;  %v3117_v1 = vld [vmem:[#allocation9 + $0x28] sm:$0xf0] }
  0x77   : > { %656 = vmatpush.bf16.msra.mxu1 %v3042_v8  ;;  %v3180_v2 = vor.u32 %v3786_v63, %v3179_v61  ;;  %v3120_v3 = vor.u32 %v3769_v0, %v3117_v1  ;;  %v3785_v4 = vld [vmem:[#allocation9 + $0xa4] sm:$0xf]  ;;  %v3181_v5 = vld [vmem:[#allocation9 + $0xa8] sm:$0xf0]  ;;  %v3107_v7 = vld [vmem:[#allocation9 + $0x10] sm:$0xf] }
  0x78   : > { %v3184_v6 = vor.u32 %v3785_v4, %v3181_v5  ;;  %v3768_v8 = vld [vmem:[#allocation9 + $0x14] sm:$0xf0]  ;;  %v3171_v9 = vld [vmem:[#allocation9 + $0x90] sm:$0xf]  ;;  %v3767_v12 = vld [vmem:[#allocation9 + $0x14] sm:$0xf] }
  0x79   : > { %879 = vmatpush.bf16.msra.mxu2 %v3116_v62  ;;  %v3108_v10 = vor.u32 %v3768_v8, %v3107_v7  ;;  %v3784_v11 = vld [vmem:[#allocation9 + $0x94] sm:$0xf0]  ;;  %v3109_v13 = vld [vmem:[#allocation9 + $0x18] sm:$0xf0]  ;;  %v3783_v16 = vld [vmem:[#allocation9 + $0x94] sm:$0xf] }
  0x7a   : > { %643 = vmatpush.bf16.msra.mxu0 %v3030_v20  ;;  %893 = vmatpush.bf16.msra.mxu3 %v3180_v2  ;;  %v3172_v14 = vor.u32 %v3784_v11, %v3171_v9  ;;  %v3112_v15 = vor.u32 %v3767_v12, %v3109_v13  ;;  %v3173_v17 = vld [vmem:[#allocation9 + $0x98] sm:$0xf0]  ;;  %v3099_v19 = vld [vmem:[#allocation9] sm:$0xf]  ;;  %v3766_v20 = vld [vmem:[#allocation9 + $0x4] sm:$0xf0] }
  0x7b   : > { %657 = vmatpush.bf16.msra.mxu1 %v3034_v23  ;;  %v3176_v18 = vor.u32 %v3783_v16, %v3173_v17  ;;  %v3163_v21 = vld [vmem:[#allocation9 + $0x80] sm:$0xf]  ;;  %v3100_v22 = vor.u32 %v3766_v20, %v3099_v19  ;;  %v3782_v23 = vld [vmem:[#allocation9 + $0x84] sm:$0xf0]  ;;  %v3765_v24 = vld [vmem:[#allocation9 + $0x4] sm:$0xf] }
  0x7c   : > { %v3101_v25 = vld [vmem:[#allocation9 + $0x8] sm:$0xf0]  ;;  %v3781_v28 = vld [vmem:[#allocation9 + $0x84] sm:$0xf]  ;;  %v3283_v31 = vld [vmem:[#allocation10 + $0x70] sm:$0xf] }
  0x7d   : > { %3093 = vmatmul.msk.bf16.vlgmr.msra.gmra.mxu0 %vm3091_vm2, %v3092_v30  ;;  %880 = vmatpush.bf16.msra.mxu2 %v3108_v10  ;;  %v3165_v29 = vld [vmem:[#allocation9 + $0x88] sm:$0xf0]  ;;  %v3812_v32 = vld [vmem:[#allocation10 + $0x74] sm:$0xf0]  ;;  %v3811_v36 = vld [vmem:[#allocation10 + $0x74] sm:$0xf] }
  0x7e   : > { %902 = vmatpush.bf16.msrb.mxu0 %v3160_v26  ;;  %3096 = vmatmul.msk.bf16.vlgmr.msra.gmra.mxu1 %vm3091_vm2, %v3092_v30  ;;  %v3164_v26 = vor.u32 %v3782_v23, %v3163_v21  ;;  %v3168_v30 = vor.u32 %v3781_v28, %v3165_v29  ;;  %v3828_v35 = vld [vmem:[#allocation10 + $0xf4] sm:$0xf0]  ;;  %v3285_v37 = vld [vmem:[#allocation10 + $0x78] sm:$0xf0]  ;;  %v3275_v42 = vld [vmem:[#allocation10 + $0x60] sm:$0xf] }
  0x7f   : > { %916 = vmatpush.bf16.msrb.mxu1 %v3224_v27  ;;  %894 = vmatpush.bf16.msra.mxu3 %v3172_v14  ;;  %v3104_v27 = vor.u32 %v3765_v24, %v3101_v25  ;;  %v3349_v41 = vld [vmem:[#allocation10 + $0xf8] sm:$0xf0]  ;;  %v3810_v44 = vld [vmem:[#allocation10 + $0x64] sm:$0xf0]  ;;  %v3809_v49 = vld [vmem:[#allocation10 + $0x64] sm:$0xf] }
  0x80   : > { %v3276_v47 = vor.u32 %v3810_v44, %v3275_v42  ;;  %v3277_v50 = vld [vmem:[#allocation10 + $0x68] sm:$0xf0]  ;;  %v3825_v51 = vld [vmem:[#allocation10 + $0xe4] sm:$0xf]  ;;  %v3267_v54 = vld [vmem:[#allocation10 + $0x50] sm:$0xf] }
  0x81   : > { %881 = vmatpush.bf16.msra.mxu2 %v3100_v22  ;;  %v3280_v52 = vor.u32 %v3809_v49, %v3277_v50  ;;  %v3341_v53 = vld [vmem:[#allocation10 + $0xe8] sm:$0xf0]  ;;  %v3808_v55 = vld [vmem:[#allocation10 + $0x54] sm:$0xf0]  ;;  %v4662_v56 = vld [vmem:[%s5571_s3] sm:$0x3] }
  0x82   : > { %903 = vmatpush.bf16.msrb.mxu0 %v3152_v33  ;;  %v3347_v33 = vld [vmem:[#allocation10 + $0xf0] sm:$0xf]  ;;  %v3824_v59 = vld [vmem:[#allocation10 + $0xd4] sm:$0xf0]  ;;  %v3807_v60 = vld [vmem:[#allocation10 + $0x54] sm:$0xf]  ;;  %v3268_v61 = vor.u32 %v3808_v55, %v3267_v54 }
  0x83   : > { %917 = vmatpush.bf16.msrb.mxu1 %v3216_v34  ;;  %895 = vmatpush.bf16.msra.mxu3 %v3164_v26  ;;  %v3284_v34 = vor.u32 %v3812_v32, %v3283_v31  ;;  %v3348_v38 = vor.u32 %v3828_v35, %v3347_v33  ;;  %v3269_v62 = vld [vmem:[#allocation10 + $0x58] sm:$0xf0]  ;;  %v3823_v63 = vld [vmem:[#allocation10 + $0xd4] sm:$0xf]  ;;  %v3806_v4 = vld [vmem:[#allocation10 + $0x44] sm:$0xf0] }
  0x84   : > { %v3333_v0 = vld [vmem:[#allocation10 + $0xd8] sm:$0xf0]  ;;  %v3272_v2 = vor.u32 %v3807_v60, %v3269_v62  ;;  %v3323_v5 = vld [vmem:[#allocation10 + $0xc0] sm:$0xf]  ;;  %v3822_v7 = vld [vmem:[#allocation10 + $0xc4] sm:$0xf0] }
  0x85   : > { %1144 = vmatpush.bf16.msrb.mxu2 %v3284_v34  ;;  %v3805_v8 = vld [vmem:[#allocation10 + $0x44] sm:$0xf]  ;;  %v3261_v9 = vld [vmem:[#allocation10 + $0x48] sm:$0xf0]  ;;  %v552_v12 = vperm.slane %v4662_v56, 0  ;;  %v553_v13 = vperm.slane %v4662_v56, 1  ;;  %v3324_v16 = vor.u32 %v3822_v7, %v3323_v5 }
  0x86   : > { %904 = vmatpush.bf16.msrb.mxu0 %v3144_v39  ;;  %v3288_v39 = vor.u32 %v3811_v36, %v3285_v37  ;;  %v3821_v10 = vld [vmem:[#allocation10 + $0xc4] sm:$0xf]  ;;  %v3325_v11 = vld [vmem:[#allocation10 + $0xc8] sm:$0xf0]  ;;  %v3264_v17 = vor.u32 %v3805_v8, %v3261_v9  ;;  %v3315_v19 = vld [vmem:[#allocation10 + $0xb0] sm:$0xf] }
  0x87   : > { %918 = vmatpush.bf16.msrb.mxu1 %v3208_v40  ;;  %v3827_v40 = vld [vmem:[#allocation10 + $0xf4] sm:$0xf]  ;;  %1158 = vmatpush.bf16.msrb.mxu3 %v3348_v38  ;;  %v3820_v20 = vld [vmem:[#allocation10 + $0xb4] sm:$0xf0]  ;;  %v3328_v22 = vor.u32 %v3821_v10, %v3325_v11  ;;  %v3253_v24 = vld [vmem:[#allocation10 + $0x38] sm:$0xf0] }
  0x88   : > { %v3352_v43 = vor.u32 %v3827_v40, %v3349_v41  ;;  %v3803_v23 = vld [vmem:[#allocation10 + $0x34] sm:$0xf]  ;;  %v3316_v29 = vor.u32 %v3820_v20, %v3315_v19  ;;  %v3243_v33 = vld [vmem:[#allocation10 + $0x20] sm:$0xf]  ;;  %v3802_v34 = vld [vmem:[#allocation10 + $0x24] sm:$0xf0] }
  0x89   : > { %1145 = vmatpush.bf16.msrb.mxu2 %v3276_v47  ;;  %v3819_v26 = vld [vmem:[#allocation10 + $0xb4] sm:$0xf]  ;;  %v3256_v32 = vor.u32 %v3803_v23, %v3253_v24  ;;  %v3307_v35 = vld [vmem:[#allocation10 + $0xa0] sm:$0xf]  ;;  %v3818_v37 = vld [vmem:[#allocation10 + $0xa4] sm:$0xf0]  ;;  %v3244_v42 = vor.u32 %v3802_v34, %v3243_v33 }
  0x8a   : > { %905 = vmatpush.bf16.msrb.mxu0 %v3136_v45  ;;  %v3339_v45 = vld [vmem:[#allocation10 + $0xe0] sm:$0xf]  ;;  %v3801_v38 = vld [vmem:[#allocation10 + $0x24] sm:$0xf]  ;;  %v3309_v41 = vld [vmem:[#allocation10 + $0xa8] sm:$0xf0]  ;;  %v3308_v44 = vor.u32 %v3818_v37, %v3307_v35 }
  0x8b   : > { %919 = vmatpush.bf16.msrb.mxu1 %v3200_v46  ;;  %v3826_v46 = vld [vmem:[#allocation10 + $0xe4] sm:$0xf0]  ;;  %v3817_v40 = vld [vmem:[#allocation10 + $0xa4] sm:$0xf]  ;;  %v3800_v47 = vld [vmem:[#allocation10 + $0x14] sm:$0xf0] }
  0x8c   : > { %v3340_v48 = vor.u32 %v3826_v46, %v3339_v45  ;;  %v3235_v46 = vld [vmem:[#allocation10 + $0x10] sm:$0xf]  ;;  %v3312_v50 = vor.u32 %v3817_v40, %v3309_v41  ;;  %v3815_v56 = vld [vmem:[#allocation10 + $0x94] sm:$0xf]  ;;  %v3814_v20 = vld [vmem:[#allocation10 + $0x84] sm:$0xf0] }
  0x8d   : > { %1146 = vmatpush.bf16.msrb.mxu2 %v3268_v61  ;;  %v3860_v33 = vld [vmem:[#allocation12 + $0xf4] sm:$0xf0]  ;;  %v3413_v37 = vld [vmem:[#allocation12 + $0x78] sm:$0xf0]  ;;  %v3403_v41 = vld [vmem:[#allocation12 + $0x60] sm:$0xf] }
  0x8e   : > { %906 = vmatpush.bf16.msrb.mxu0 %v3128_v57  ;;  %v3344_v57 = vor.u32 %v3825_v51, %v3341_v53  ;;  %1159 = vmatpush.bf16.msrb.mxu3 %v3340_v48  ;;  %v3299_v48 = vld [vmem:[#allocation10 + $0x90] sm:$0xf]  ;;  %v3816_v51 = vld [vmem:[#allocation10 + $0x94] sm:$0xf0]  ;;  %v3237_v53 = vld [vmem:[#allocation10 + $0x18] sm:$0xf0] }
  0x8f   : > { %920 = vmatpush.bf16.msrb.mxu1 %v3192_v58  ;;  %v3331_v58 = vld [vmem:[#allocation10 + $0xd0] sm:$0xf]  ;;  %v3300_v61 = vor.u32 %v3816_v51, %v3299_v48  ;;  %v3477_v40 = vld [vmem:[#allocation12 + $0xf8] sm:$0xf0]  ;;  %v3841_v48 = vld [vmem:[#allocation12 + $0x64] sm:$0xf] }
  0x90   : > { %v3332_v1 = vor.u32 %v3824_v59, %v3331_v58  ;;  %v3236_v59 = vor.u32 %v3800_v47, %v3235_v46 }
  0x92   : > { %907 = vmatpush.bf16.msrb.mxu0 %v3120_v3  ;;  %v3259_v3 = vld [vmem:[#allocation10 + $0x40] sm:$0xf]  ;;  %1160 = vmatpush.bf16.msrb.mxu3 %v3332_v1 }
  0x93   : > { %921 = vmatpush.bf16.msrb.mxu1 %v3184_v6  ;;  %v3336_v6 = vor.u32 %v3823_v63, %v3333_v0  ;;  %v3260_v14 = vor.u32 %v3806_v4, %v3259_v3 }
  0x95   : > { %1147 = vmatpush.bf16.msrb.mxu2 %v3260_v14 }
  0x96   : > { %908 = vmatpush.bf16.msrb.mxu0 %v3112_v15  ;;  %v3251_v15 = vld [vmem:[#allocation10 + $0x30] sm:$0xf]  ;;  %1161 = vmatpush.bf16.msrb.mxu3 %v3324_v16  ;;  %v3227_v16 = vld [vmem:[#allocation10] sm:$0xf] }
  0x97   : > { %922 = vmatpush.bf16.msrb.mxu1 %v3176_v18  ;;  %v3804_v18 = vld [vmem:[#allocation10 + $0x34] sm:$0xf0] }
  0x98   : > { %v3252_v28 = vor.u32 %v3804_v18, %v3251_v15  ;;  %v3291_v18 = vld [vmem:[#allocation10 + $0x80] sm:$0xf] }
  0x99   : > { %v3292_v23 = vor.u32 %v3814_v20, %v3291_v18  ;;  %v3453_v18 = vld [vmem:[#allocation12 + $0xc8] sm:$0xf0]  ;;  %v3379_v20 = vld [vmem:[#allocation12 + $0x30] sm:$0xf] }
  0x9a   : > { %909 = vmatpush.bf16.msrb.mxu0 %v3104_v27  ;;  %v3317_v27 = vld [vmem:[#allocation10 + $0xb8] sm:$0xf0]  ;;  %1148 = vmatpush.bf16.msrb.mxu2 %v3252_v28 }
  0x9b   : > { %923 = vmatpush.bf16.msrb.mxu1 %v3168_v30  ;;  %v3320_v36 = vor.u32 %v3819_v26, %v3317_v27  ;;  %1162 = vmatpush.bf16.msrb.mxu3 %v3316_v29  ;;  %v3293_v26 = vld [vmem:[#allocation10 + $0x88] sm:$0xf0]  ;;  %v3411_v27 = vld [vmem:[#allocation12 + $0x70] sm:$0xf]  ;;  %v3844_v29 = vld [vmem:[#allocation12 + $0x74] sm:$0xf0] }
  0x9c   : > { %v4694_v34 = vor.u32 %v3844_v29, %v3411_v27  ;;  %v3851_v29 = vld [vmem:[#allocation12 + $0xb4] sm:$0xf] }
  0x9e   : > { %1172 = vmatpush.bf16.msra.mxu0 %v3288_v39  ;;  %v3245_v39 = vld [vmem:[#allocation10 + $0x28] sm:$0xf0]  ;;  %1149 = vmatpush.bf16.msrb.mxu2 %v3244_v42 }
  0x9f   : > { %1186 = vmatpush.bf16.msra.mxu1 %v3352_v43  ;;  %v3248_v45 = vor.u32 %v3801_v38, %v3245_v39  ;;  %1163 = vmatpush.bf16.msrb.mxu3 %v3308_v44  ;;  %v3859_v38 = vld [vmem:[#allocation12 + $0xf4] sm:$0xf]  ;;  %v3467_v44 = vld [vmem:[#allocation12 + $0xe0] sm:$0xf] }
  0xa0   : > { %v4702_v42 = vor.u32 %v3859_v38, %v3477_v40  ;;  %v3435_v38 = vld [vmem:[#allocation12 + $0xa0] sm:$0xf]  ;;  %v3850_v40 = vld [vmem:[#allocation12 + $0xa4] sm:$0xf0] }
  0xa2   : > { %1173 = vmatpush.bf16.msra.mxu0 %v3280_v52  ;;  %v3799_v52 = vld [vmem:[#allocation10 + $0x14] sm:$0xf]  ;;  %1150 = vmatpush.bf16.msrb.mxu2 %v3236_v59 }
  0xa3   : > { %1187 = vmatpush.bf16.msra.mxu1 %v3344_v57  ;;  %v3301_v57 = vld [vmem:[#allocation10 + $0x98] sm:$0xf0]  ;;  %v3240_v62 = vor.u32 %v3799_v52, %v3237_v53  ;;  %1164 = vmatpush.bf16.msrb.mxu3 %v3300_v61  ;;  %v3469_v52 = vld [vmem:[#allocation12 + $0xe8] sm:$0xf0]  ;;  %v3839_v61 = vld [vmem:[#allocation12 + $0x54] sm:$0xf] }
  0xa4   : > { %v3304_v1 = vor.u32 %v3815_v56, %v3301_v57  ;;  %v3840_v56 = vld [vmem:[#allocation12 + $0x54] sm:$0xf0]  ;;  %v3459_v57 = vld [vmem:[#allocation12 + $0xd0] sm:$0xf] }
  0xa6   : > { %1174 = vmatpush.bf16.msra.mxu0 %v3272_v2 }
  0xa7   : > { %1188 = vmatpush.bf16.msra.mxu1 %v3336_v6  ;;  %1165 = vmatpush.bf16.msrb.mxu3 %v3292_v23 }
  0xaa   : > { %1175 = vmatpush.bf16.msra.mxu0 %v3264_v17  ;;  %v3798_v17 = vld [vmem:[#allocation10 + $0x4] sm:$0xf0] }
  0xab   : > { %1189 = vmatpush.bf16.msra.mxu1 %v3328_v22  ;;  %v3228_v19 = vor.u32 %v3798_v17, %v3227_v16  ;;  %v3229_v22 = vld [vmem:[#allocation10 + $0x8] sm:$0xf0]  ;;  %v3853_v17 = vld [vmem:[#allocation12 + $0xc4] sm:$0xf] }
  0xad   : > { %1151 = vmatpush.bf16.msrb.mxu2 %v3228_v19  ;;  %v4736_v19 = vor.u32 %v3853_v17, %v3453_v18  ;;  %v3830_v17 = vld [vmem:[#allocation12 + $0x4] sm:$0xf0]  ;;  %v3419_v18 = vld [vmem:[#allocation12 + $0x80] sm:$0xf] }
  0xae   : > { %1176 = vmatpush.bf16.msra.mxu0 %v3256_v32  ;;  %v3475_v32 = vld [vmem:[#allocation12 + $0xf0] sm:$0xf] }
  0xaf   : > { %1190 = vmatpush.bf16.msra.mxu1 %v3320_v36  ;;  %v4696_v35 = vor.u32 %v3860_v33, %v3475_v32  ;;  %v3843_v36 = vld [vmem:[#allocation12 + $0x74] sm:$0xf]  ;;  %v3445_v32 = vld [vmem:[#allocation12 + $0xb8] sm:$0xf0]  ;;  %v3371_v33 = vld [vmem:[#allocation12 + $0x20] sm:$0xf] }
  0xb0   : > { %v4698_v39 = vor.u32 %v3843_v36, %v3413_v37  ;;  %v4748_v36 = vor.u32 %v3851_v29, %v3445_v32  ;;  %v3834_v37 = vld [vmem:[#allocation12 + $0x24] sm:$0xf0]  ;;  %v3845_v29 = vld [vmem:[#allocation12 + $0x84] sm:$0xf]  ;;  %v3421_v32 = vld [vmem:[#allocation12 + $0x88] sm:$0xf0] }
  0xb2   : > { %1177 = vmatpush.bf16.msra.mxu0 %v3248_v45  ;;  %v3858_v45 = vld [vmem:[#allocation12 + $0xe4] sm:$0xf0] }
  0xb3   : > { %1191 = vmatpush.bf16.msra.mxu1 %v3312_v50  ;;  %v4707_v47 = vor.u32 %v3858_v45, %v3467_v44  ;;  %v3857_v50 = vld [vmem:[#allocation12 + $0xe4] sm:$0xf]  ;;  %v4752_v45 = vor.u32 %v3834_v37, %v3371_v33  ;;  %v4787_v37 = vor.u32 %v3845_v29, %v3421_v32 }
  0xb4   : > { %v4712_v53 = vor.u32 %v3857_v50, %v3469_v52  ;;  %v3849_v44 = vld [vmem:[#allocation12 + $0xa4] sm:$0xf]  ;;  %v3363_v50 = vld [vmem:[#allocation12 + $0x10] sm:$0xf] }
  0xb6   : > { %1178 = vmatpush.bf16.msra.mxu0 %v3240_v62  ;;  %v3397_v62 = vld [vmem:[#allocation12 + $0x58] sm:$0xf0] }
  0xb7   : > { %1192 = vmatpush.bf16.msra.mxu1 %v3304_v1  ;;  %v3855_v1 = vld [vmem:[#allocation12 + $0xd4] sm:$0xf] }
  0xfa   : > { %v645_v21 = vpop.f32.mrf.mxu0 }
  0xfb   : > { %v659_v25 = vpop.f32.mrf.mxu1  ;;  %v4666_v30 = vadd.f32 %v645_v21, %v552_v12  ;;  %v3797_v21 = vld [vmem:[#allocation10 + $0x4] sm:$0xf] }
  0xfc   : > { %v4668_v31 = vadd.f32 %v659_v25, %v553_v13  ;;  %v3232_v24 = vor.u32 %v3797_v21, %v3229_v22  ;;  %v3813_v25 = vld [vmem:[#allocation10 + $0x84] sm:$0xf]  ;;  %v3836_v21 = vld [vmem:[#allocation12 + $0x34] sm:$0xf0]  ;;  %v3443_v22 = vld [vmem:[#allocation12 + $0xb0] sm:$0xf] }
  0xfd   : > { %v3296_v28 = vor.u32 %v3813_v25, %v3293_v26  ;;  %v4740_v23 = vor.u32 %v3836_v21, %v3379_v20  ;;  %v3835_v25 = vld [vmem:[#allocation12 + $0x34] sm:$0xf]  ;;  %v3381_v26 = vld [vmem:[#allocation12 + $0x38] sm:$0xf0]  ;;  %v3846_v21 = vld [vmem:[#allocation12 + $0x84] sm:$0xf0] }
  0xfe   : > { %v664_v43 = vpack.c.bf16 %v4668_v31, %v4666_v30  ;;  %1179 = vmatpush.bf16.msra.mxu0 %v3232_v24  ;;  %v3852_v24 = vld [vmem:[#allocation12 + $0xb4] sm:$0xf0] }
  0xff   : > { %1193 = vmatpush.bf16.msra.mxu1 %v3296_v28  ;;  %v4743_v27 = vor.u32 %v3852_v24, %v3443_v22  ;;  %v4745_v28 = vor.u32 %v3835_v25, %v3381_v26  ;;  %v3829_v22 = vld [vmem:[#allocation12 + $0x4] sm:$0xf]  ;;  %v3357_v24 = vld [vmem:[#allocation12 + $0x8] sm:$0xf0]  ;;  %v4782_v25 = vor.u32 %v3846_v21, %v3419_v18 }
 0x100   : > { %v1205_v60 = vunpack.c.h.bf16 %v664_v43  ;;  %v1204_v63 = vunpack.c.l.bf16 %v664_v43  ;;  %v706_v2 = vunpack.c.l.b16 %v664_v43  ;;  %v707_v3 = vunpack.c.h.b16 %v664_v43  ;;  %v3842_v43 = vld [vmem:[#allocation12 + $0x64] sm:$0xf0] }
 0x101   : > { %v4705_v46 = vor.u32 %v3842_v43, %v3403_v41  ;;  %v3833_v41 = vld [vmem:[#allocation12 + $0x24] sm:$0xf]  ;;  %v3373_v43 = vld [vmem:[#allocation12 + $0x28] sm:$0xf0]  ;;  %v4784_v26 = vor.u32 %v3829_v22, %v3357_v24 }
 0x102   : > { %v647_v49 = vpop.f32.mrf.mxu0  ;;  %v1209_v8 = vsub.f32 %v4668_v31, %v1205_v60  ;;  %v1208_v9 = vsub.f32 %v4666_v30, %v1204_v63  ;;  %v3856_v60 = vld [vmem:[#allocation12 + $0xd4] sm:$0xf0]  ;;  %v4757_v52 = vor.u32 %v3833_v41, %v3373_v43 }
 0x103   : > { %v4672_v54 = vadd.f32 %v647_v49, %v552_v12  ;;  %v661_v55 = vpop.f32.mrf.mxu1  ;;  %v3405_v49 = vld [vmem:[#allocation12 + $0x68] sm:$0xf0]  ;;  %v4719_v63 = vor.u32 %v3856_v60, %v3459_v57  ;;  %v3848_v57 = vld [vmem:[#allocation12 + $0x94] sm:$0xf0] }
 0x104   : > { %v4674_v58 = vadd.f32 %v661_v55, %v553_v13  ;;  %v4710_v51 = vor.u32 %v3841_v48, %v3405_v49  ;;  %v3395_v55 = vld [vmem:[#allocation12 + $0x50] sm:$0xf]  ;;  %v4754_v48 = vor.u32 %v3850_v40, %v3435_v38  ;;  %v3437_v49 = vld [vmem:[#allocation12 + $0xa8] sm:$0xf0] }
 0x105   : > { %v4716_v59 = vor.u32 %v3840_v56, %v3395_v55  ;;  %v3832_v55 = vld [vmem:[#allocation12 + $0x14] sm:$0xf0]  ;;  %v3427_v56 = vld [vmem:[#allocation12 + $0x90] sm:$0xf]  ;;  %v4760_v60 = vor.u32 %v3849_v44, %v3437_v49 }
 0x106   : > { %v665_v0 = vpack.c.bf16 %v4674_v58, %v4672_v54 }
 0x108   : > { %v1207_v4 = vunpack.c.h.bf16 %v665_v0  ;;  %v708_v5 = vunpack.c.l.b16 %v665_v0  ;;  %v709_v6 = vunpack.c.h.b16 %v665_v0  ;;  %v1206_v7 = vunpack.c.l.bf16 %v665_v0 }
 0x109   : > { %v4721_v0 = vor.u32 %v3839_v61, %v3397_v62  ;;  %v3831_v61 = vld [vmem:[#allocation12 + $0x14] sm:$0xf]  ;;  %v3365_v62 = vld [vmem:[#allocation12 + $0x18] sm:$0xf0] }
 0x10a   : > { %v1211_v10 = vsub.f32 %v4674_v58, %v1207_v4  ;;  %v4681_v11 = vpack.c.b16 %v708_v5, %v706_v2  ;;  %v4683_v12 = vpack.c.b16 %v709_v6, %v707_v3  ;;  %v1210_v13 = vsub.f32 %v4672_v54, %v1206_v7  ;;  %v3461_v2 = vld [vmem:[#allocation12 + $0xd8] sm:$0xf0]  ;;  %v3387_v4 = vld [vmem:[#allocation12 + $0x40] sm:$0xf]  ;;  %v3838_v5 = vld [vmem:[#allocation12 + $0x44] sm:$0xf0] }
 0x10b   : > { %v4724_v3 = vor.u32 %v3855_v1, %v3461_v2  ;;  %v3451_v6 = vld [vmem:[#allocation12 + $0xc0] sm:$0xf]  ;;  %v4728_v7 = vor.u32 %v3838_v5, %v3387_v4  ;;  %v3847_v1 = vld [vmem:[#allocation12 + $0x94] sm:$0xf]  ;;  %v3429_v2 = vld [vmem:[#allocation12 + $0x98] sm:$0xf0]  ;;  %v4764_v4 = vor.u32 %v3832_v55, %v3363_v50  ;;  %v4766_v5 = vor.u32 %v3848_v57, %v3427_v56 }
 0x10c   : > { %882 = vmatmul.bf16.vlgmr.msra.gmra.mxu2 %v4681_v11  ;;  %896 = vmatmul.bf16.vlgmr.msra.gmra.mxu3 %v4683_v12  ;;  %v4688_v14 = vpack.c.bf16 %v1210_v13, %v1208_v9  ;;  %v4690_v15 = vpack.c.bf16 %v1211_v10, %v1209_v8  ;;  %v3854_v8 = vld [vmem:[#allocation12 + $0xc4] sm:$0xf0]  ;;  %v3837_v9 = vld [vmem:[#allocation12 + $0x44] sm:$0xf]  ;;  %v3389_v10 = vld [vmem:[#allocation12 + $0x48] sm:$0xf0] }
 0x10d   : > { %910 = vmatmul.bf16.vlgmr.msrb.gmra.mxu0 %v4681_v11  ;;  %924 = vmatmul.bf16.vlgmr.msrb.gmra.mxu1 %v4683_v12  ;;  %v4731_v13 = vor.u32 %v3854_v8, %v3451_v6  ;;  %v4733_v16 = vor.u32 %v3837_v9, %v3389_v10  ;;  %v4769_v6 = vor.u32 %v3831_v61, %v3365_v62  ;;  %v698_v8 = vld [vmem:[%s5573_s5] sm:$0x3]  ;;  %v3355_v10 = vld [vmem:[#allocation12] sm:$0xf] }
 0x10e   : > { %1406 = vmatpush.bf16.msra.mxu2 %v4694_v34  ;;  %1420 = vmatpush.bf16.msra.mxu3 %v4696_v35  ;;  %v4775_v9 = vor.u32 %v3847_v1, %v3429_v2  ;;  %v4779_v20 = vor.u32 %v3830_v17, %v3355_v10  ;;  %v701_v38 = vperm.slane %v698_v8, 1  ;;  %v700_v41 = vperm.slane %v698_v8, 0 }
 0x10f   : > { %1434 = vmatpush.bf16.msrb.mxu0 %v4698_v39  ;;  %1448 = vmatpush.bf16.msrb.mxu1 %v4702_v42 }
 0x112   : > { %1407 = vmatpush.bf16.msra.mxu2 %v4705_v46  ;;  %1421 = vmatpush.bf16.msra.mxu3 %v4707_v47 }
 0x113   : > { %1435 = vmatpush.bf16.msrb.mxu0 %v4710_v51  ;;  %1449 = vmatpush.bf16.msrb.mxu1 %v4712_v53 }
 0x116   : > { %1408 = vmatpush.bf16.msra.mxu2 %v4716_v59  ;;  %1422 = vmatpush.bf16.msra.mxu3 %v4719_v63 }
 0x117   : > { %1436 = vmatpush.bf16.msrb.mxu0 %v4721_v0  ;;  %1450 = vmatpush.bf16.msrb.mxu1 %v4724_v3 }
 0x11a   : > { %1409 = vmatpush.bf16.msra.mxu2 %v4728_v7  ;;  %1423 = vmatpush.bf16.msra.mxu3 %v4731_v13 }
 0x11b   : > { %1437 = vmatpush.bf16.msrb.mxu0 %v4733_v16  ;;  %1451 = vmatpush.bf16.msrb.mxu1 %v4736_v19 }
 0x11e   : > { %1410 = vmatpush.bf16.msra.mxu2 %v4740_v23  ;;  %1424 = vmatpush.bf16.msra.mxu3 %v4743_v27 }
 0x11f   : > { %1438 = vmatpush.bf16.msrb.mxu0 %v4745_v28  ;;  %1452 = vmatpush.bf16.msrb.mxu1 %v4748_v36 }
 0x122   : > { %1411 = vmatpush.bf16.msra.mxu2 %v4752_v45  ;;  %1425 = vmatpush.bf16.msra.mxu3 %v4754_v48 }
 0x123   : > { %1439 = vmatpush.bf16.msrb.mxu0 %v4757_v52  ;;  %1453 = vmatpush.bf16.msrb.mxu1 %v4760_v60 }
 0x126   : > { %1412 = vmatpush.bf16.msra.mxu2 %v4764_v4  ;;  %1426 = vmatpush.bf16.msra.mxu3 %v4766_v5 }
 0x127   : > { %1440 = vmatpush.bf16.msrb.mxu0 %v4769_v6  ;;  %1454 = vmatpush.bf16.msrb.mxu1 %v4775_v9 }
 0x12a   : > { %1413 = vmatpush.bf16.msra.mxu2 %v4779_v20  ;;  %1427 = vmatpush.bf16.msra.mxu3 %v4782_v25 }
 0x12b   : > { %1441 = vmatpush.bf16.msrb.mxu0 %v4784_v26  ;;  %1455 = vmatpush.bf16.msrb.mxu1 %v4787_v37 }
 0x18a   : > { %v911_v33 = vpop.f32.mrf.mxu0  ;;  %v925_v40 = vpop.f32.mrf.mxu1 }
 0x18b   : > { %v912_v43 = vadd.f32 %v911_v33, %v701_v38 }
 0x18d   : > { %v926_v57 = vadd.f32 %v925_v40, %v912_v43 }
 0x18f   : > { %v883_v44 = vpop.f32.mrf.mxu2  ;;  %v897_v49 = vpop.f32.mrf.mxu3 }
 0x190   : > { %v884_v50 = vadd.f32 %v883_v44, %v700_v41 }
 0x192   : > { %v898_v55 = vadd.f32 %v897_v49, %v884_v50  ;;  %v913_v56 = vpop.f32.mrf.mxu0  ;;  %v927_v62 = vpop.f32.mrf.mxu1 }
 0x193   : > { %v914_v61 = vadd.f32 %v913_v56, %v701_v38 }
 0x194   : > { %4047 = vtanh.f32 %v898_v55 }
 0x195   : > { %4049 = vtanh.f32 %v926_v57  ;;  %v928_v1 = vadd.f32 %v927_v62, %v914_v61 }
 0x197   : > { %v885_v2 = vpop.f32.mrf.mxu2  ;;  %v899_v10 = vpop.f32.mrf.mxu3  ;;  %4051 = vtanh.f32 %v928_v1 }
 0x198   : > { %v886_v8 = vadd.f32 %v885_v2, %v700_v41 }
 0x19a   : > { %v900_v17 = vadd.f32 %v899_v10, %v886_v8  ;;  %v4793_v18 = vpop.eup %4047 }
 0x19b   : > { %v4795_v21 = vpop.eup %4049 }
 0x19c   : > { %4053 = vtanh.f32 %v900_v17  ;;  %v934_v22 = vpack.c.bf16 %v4795_v21, %v4793_v18 }
 0x19d   : > { %v4799_v24 = vpop.eup %4051 }
 0x19e   : > { %v1712_v32 = vunpack.c.l.bf16 %v934_v22  ;;  %v1713_v33 = vunpack.c.h.bf16 %v934_v22  ;;  %v976_v40 = vunpack.c.l.b16 %v934_v22  ;;  %v977_v41 = vunpack.c.h.b16 %v934_v22 }
 0x1a0   : > { %v1716_v55 = vsub.f32 %v4793_v18, %v1712_v32  ;;  %v1717_v56 = vsub.f32 %v4795_v21, %v1713_v33 }
 0x1a2   : > { %v4801_v29 = vpop.eup %4053 }
 0x1a3   : > { %v935_v38 = vpack.c.bf16 %v4799_v24, %v4801_v29 }
 0x1a5   : > { %v978_v43 = vunpack.c.l.b16 %v935_v38  ;;  %v979_v44 = vunpack.c.h.b16 %v935_v38  ;;  %v1714_v49 = vunpack.c.l.bf16 %v935_v38  ;;  %v1715_v50 = vunpack.c.h.bf16 %v935_v38 }
 0x1a7   : > { %v4807_v57 = vpack.c.b16 %v978_v43, %v976_v40  ;;  %v4809_v61 = vpack.c.b16 %v979_v44, %v977_v41  ;;  %v1718_v62 = vsub.f32 %v4801_v29, %v1714_v49  ;;  %v1719_v1 = vsub.f32 %v4799_v24, %v1715_v50 }
 0x1a9   : > { %1152 = vmatmul.bf16.vlgmr.msrb.gmra.mxu2 %v4807_v57  ;;  %1166 = vmatmul.bf16.vlgmr.msrb.gmra.mxu3 %v4809_v61  ;;  %v4815_v2 = vpack.c.bf16 %v1718_v62, %v1716_v55  ;;  %v4817_v8 = vpack.c.bf16 %v1719_v1, %v1717_v56 }
 0x1aa   : > { %1180 = vmatmul.bf16.vlgmr.msra.gmra.mxu0 %v4807_v57  ;;  %1194 = vmatmul.bf16.vlgmr.msra.gmra.mxu1 %v4809_v61 }
 0x1ab   : > { %1462 = vmatpush.bf16.msrb.mxu2 %v4694_v34  ;;  %1476 = vmatpush.bf16.msrb.mxu3 %v4696_v35 }
 0x1ac   : > { %1490 = vmatpush.bf16.msra.mxu0 %v4698_v39  ;;  %1504 = vmatpush.bf16.msra.mxu1 %v4702_v42 }
 0x1af   : > { %1463 = vmatpush.bf16.msrb.mxu2 %v4705_v46  ;;  %1477 = vmatpush.bf16.msrb.mxu3 %v4707_v47 }
 0x1b0   : > { %1491 = vmatpush.bf16.msra.mxu0 %v4710_v51  ;;  %1505 = vmatpush.bf16.msra.mxu1 %v4712_v53 }
 0x1b3   : > { %1464 = vmatpush.bf16.msrb.mxu2 %v4716_v59  ;;  %1478 = vmatpush.bf16.msrb.mxu3 %v4719_v63 }
 0x1b4   : > { %1492 = vmatpush.bf16.msra.mxu0 %v4721_v0  ;;  %1506 = vmatpush.bf16.msra.mxu1 %v4724_v3 }
 0x1b7   : > { %1465 = vmatpush.bf16.msrb.mxu2 %v4728_v7  ;;  %1479 = vmatpush.bf16.msrb.mxu3 %v4731_v13 }
 0x1b8   : > { %1493 = vmatpush.bf16.msra.mxu0 %v4733_v16  ;;  %1507 = vmatpush.bf16.msra.mxu1 %v4736_v19 }
 0x1b9   : > { %1414 = vmatmul.bf16.vlgmr.msra.gmra.mxu2 %v4688_v14  ;;  %1428 = vmatmul.bf16.vlgmr.msra.gmra.mxu3 %v4690_v15 }
 0x1ba   : > { %1442 = vmatmul.bf16.vlgmr.msrb.gmra.mxu0 %v4688_v14  ;;  %1456 = vmatmul.bf16.vlgmr.msrb.gmra.mxu1 %v4690_v15 }
 0x1bb   : > { %1466 = vmatpush.bf16.msrb.mxu2 %v4740_v23  ;;  %1480 = vmatpush.bf16.msrb.mxu3 %v4743_v27 }
 0x1bc   : > { %1494 = vmatpush.bf16.msra.mxu0 %v4745_v28  ;;  %1508 = vmatpush.bf16.msra.mxu1 %v4748_v36 }
 0x1bf   : > { %1467 = vmatpush.bf16.msrb.mxu2 %v4752_v45  ;;  %1481 = vmatpush.bf16.msrb.mxu3 %v4754_v48 }
 0x1c0   : > { %1495 = vmatpush.bf16.msra.mxu0 %v4757_v52  ;;  %1509 = vmatpush.bf16.msra.mxu1 %v4760_v60 }
 0x1c3   : > { %1468 = vmatpush.bf16.msrb.mxu2 %v4764_v4  ;;  %1482 = vmatpush.bf16.msrb.mxu3 %v4766_v5 }
 0x1c4   : > { %1496 = vmatpush.bf16.msra.mxu0 %v4769_v6  ;;  %1510 = vmatpush.bf16.msra.mxu1 %v4775_v9 }
 0x1c7   : > { %1469 = vmatpush.bf16.msrb.mxu2 %v4779_v20  ;;  %1483 = vmatpush.bf16.msrb.mxu3 %v4782_v25 }
 0x1c8   : > { %1497 = vmatpush.bf16.msra.mxu0 %v4784_v26  ;;  %1511 = vmatpush.bf16.msra.mxu1 %v4787_v37 }
 0x1ca   : > { %1470 = vmatmul.bf16.vlgmr.msrb.gmra.mxu2 %v4681_v11  ;;  %1484 = vmatmul.bf16.vlgmr.msrb.gmra.mxu3 %v4683_v12 }
 0x1cb   : > { %1538 = vmatpush.bf16.msra.mxu2 %v4694_v34  ;;  %1552 = vmatpush.bf16.msra.mxu3 %v4696_v35 }
 0x1cc   : > { %1498 = vmatmul.bf16.vlgmr.msra.gmra.mxu0 %v4681_v11  ;;  %1512 = vmatmul.bf16.vlgmr.msra.gmra.mxu1 %v4683_v12  ;;  %v4928_v11 = vld [vmem:[%s5575_s7] sm:$0x3] }
 0x1cd   : > { %1566 = vmatpush.bf16.msrb.mxu0 %v4698_v39  ;;  %1580 = vmatpush.bf16.msrb.mxu1 %v4702_v42  ;;  %v5586_v12 = vperm.slane %v4928_v11, 1 }
 0x1cf   : > { %1539 = vmatpush.bf16.msra.mxu2 %v4705_v46  ;;  %1553 = vmatpush.bf16.msra.mxu3 %v4707_v47 }
 0x1d1   : > { %1567 = vmatpush.bf16.msrb.mxu0 %v4710_v51  ;;  %1581 = vmatpush.bf16.msrb.mxu1 %v4712_v53 }
 0x1d3   : > { %1540 = vmatpush.bf16.msra.mxu2 %v4716_v59  ;;  %1554 = vmatpush.bf16.msra.mxu3 %v4719_v63 }
 0x1d5   : > { %1568 = vmatpush.bf16.msrb.mxu0 %v4721_v0  ;;  %1582 = vmatpush.bf16.msrb.mxu1 %v4724_v3 }
 0x1d7   : > { %1541 = vmatpush.bf16.msra.mxu2 %v4728_v7  ;;  %1555 = vmatpush.bf16.msra.mxu3 %v4731_v13 }
 0x1d9   : > { %1569 = vmatpush.bf16.msrb.mxu0 %v4733_v16  ;;  %1583 = vmatpush.bf16.msrb.mxu1 %v4736_v19 }
 0x1db   : > { %1542 = vmatpush.bf16.msra.mxu2 %v4740_v23  ;;  %1556 = vmatpush.bf16.msra.mxu3 %v4743_v27 }
 0x1dd   : > { %1570 = vmatpush.bf16.msrb.mxu0 %v4745_v28  ;;  %1584 = vmatpush.bf16.msrb.mxu1 %v4748_v36 }
 0x1df   : > { %1543 = vmatpush.bf16.msra.mxu2 %v4752_v45  ;;  %1557 = vmatpush.bf16.msra.mxu3 %v4754_v48 }
 0x1e1   : > { %1571 = vmatpush.bf16.msrb.mxu0 %v4757_v52  ;;  %1585 = vmatpush.bf16.msrb.mxu1 %v4760_v60 }
 0x1e3   : > { %1544 = vmatpush.bf16.msra.mxu2 %v4764_v4  ;;  %1558 = vmatpush.bf16.msra.mxu3 %v4766_v5 }
 0x1e5   : > { %1572 = vmatpush.bf16.msrb.mxu0 %v4769_v6  ;;  %1586 = vmatpush.bf16.msrb.mxu1 %v4775_v9 }
 0x1e7   : > { %1545 = vmatpush.bf16.msra.mxu2 %v4779_v20  ;;  %1559 = vmatpush.bf16.msra.mxu3 %v4782_v25 }
 0x1e9   : > { %1573 = vmatpush.bf16.msrb.mxu0 %v4784_v26  ;;  %1587 = vmatpush.bf16.msrb.mxu1 %v4787_v37 }
 0x1eb   : > { %1604 = vmatpush.bf16.msrb.mxu2 %v4694_v34  ;;  %1618 = vmatpush.bf16.msrb.mxu3 %v4696_v35  ;;  %v970_v35 = vperm.slane %v4928_v11, 0 }
 0x1ed   : > { %1632 = vmatpush.bf16.msra.mxu0 %v4698_v39  ;;  %1646 = vmatpush.bf16.msra.mxu1 %v4702_v42 }
 0x1ef   : > { %1605 = vmatpush.bf16.msrb.mxu2 %v4705_v46  ;;  %1619 = vmatpush.bf16.msrb.mxu3 %v4707_v47 }
 0x1f1   : > { %1633 = vmatpush.bf16.msra.mxu0 %v4710_v51  ;;  %1647 = vmatpush.bf16.msra.mxu1 %v4712_v53 }
 0x1f3   : > { %1606 = vmatpush.bf16.msrb.mxu2 %v4716_v59  ;;  %1620 = vmatpush.bf16.msrb.mxu3 %v4719_v63 }
 0x1f5   : > { %1634 = vmatpush.bf16.msra.mxu0 %v4721_v0  ;;  %1648 = vmatpush.bf16.msra.mxu1 %v4724_v3 }
 0x1f7   : > { %1607 = vmatpush.bf16.msrb.mxu2 %v4728_v7  ;;  %1621 = vmatpush.bf16.msrb.mxu3 %v4731_v13 }
 0x1f9   : > { %1635 = vmatpush.bf16.msra.mxu0 %v4733_v16  ;;  %1649 = vmatpush.bf16.msra.mxu1 %v4736_v19 }
 0x1fb   : > { %1608 = vmatpush.bf16.msrb.mxu2 %v4740_v23  ;;  %1622 = vmatpush.bf16.msrb.mxu3 %v4743_v27 }
 0x1fd   : > { %1636 = vmatpush.bf16.msra.mxu0 %v4745_v28  ;;  %1650 = vmatpush.bf16.msra.mxu1 %v4748_v36 }
 0x1ff   : > { %1609 = vmatpush.bf16.msrb.mxu2 %v4752_v45  ;;  %1623 = vmatpush.bf16.msrb.mxu3 %v4754_v48 }
 0x201   : > { %1637 = vmatpush.bf16.msra.mxu0 %v4757_v52  ;;  %1651 = vmatpush.bf16.msra.mxu1 %v4760_v60 }
 0x203   : > { %1610 = vmatpush.bf16.msrb.mxu2 %v4764_v4  ;;  %1624 = vmatpush.bf16.msrb.mxu3 %v4766_v5 }
 0x205   : > { %1638 = vmatpush.bf16.msra.mxu0 %v4769_v6  ;;  %1652 = vmatpush.bf16.msra.mxu1 %v4775_v9 }
 0x207   : > { %1611 = vmatpush.bf16.msrb.mxu2 %v4779_v20  ;;  %1625 = vmatpush.bf16.msrb.mxu3 %v4782_v25 }
 0x209   : > { %1639 = vmatpush.bf16.msra.mxu0 %v4784_v26  ;;  %1653 = vmatpush.bf16.msra.mxu1 %v4787_v37 }
 0x227   : > { %v1181_v14 = vpop.f32.mrf.mxu0  ;;  %v1195_v15 = vpop.f32.mrf.mxu1 }
 0x228   : > { %v1182_v34 = vadd.f32 %v1181_v14, %v5586_v12  ;;  %v3549_v12 = vld [vmem:[#allocation12 + $0x88] sm:$0xf0] }
 0x22a   : > { %v4934_v39 = vadd.f32 %v1195_v15, %v1182_v34  ;;  %v3539_v34 = vld [vmem:[#allocation12 + $0x70] sm:$0xf] }
 0x22c   : > { %v1153_v42 = vpop.f32.mrf.mxu2  ;;  %v1167_v46 = vpop.f32.mrf.mxu3 }
 0x22d   : > { %v1154_v47 = vadd.f32 %v1153_v42, %v970_v35  ;;  %v3876_v42 = vld [vmem:[#allocation12 + $0x74] sm:$0xf0] }
 0x22f   : > { %v4938_v51 = vadd.f32 %v1167_v46, %v1154_v47  ;;  %v4940_v53 = vpop.f32.mrf.mxu0  ;;  %v4942_v59 = vpop.f32.mrf.mxu1  ;;  %v3892_v46 = vld [vmem:[#allocation12 + $0xf4] sm:$0xf0]  ;;  %v3875_v47 = vld [vmem:[#allocation12 + $0x74] sm:$0xf] }
 0x234   : > { %v4944_v63 = vpop.f32.mrf.mxu2  ;;  %v4946_v0 = vpop.f32.mrf.mxu3 }
 0x237   : > { %v1443_v3 = vpop.f32.mrf.mxu0  ;;  %v1457_v7 = vpop.f32.mrf.mxu1 }
 0x238   : > { %v1458_v48 = vadd.f32 %v1457_v7, %v1443_v3 }
 0x23c   : > { %v1415_v13 = vpop.f32.mrf.mxu2  ;;  %v1429_v16 = vpop.f32.mrf.mxu3 }
 0x23d   : > { %v1430_v52 = vadd.f32 %v1429_v16, %v1415_v13 }
 0x23f   : > { %v1445_v19 = vpop.f32.mrf.mxu0  ;;  %v1459_v23 = vpop.f32.mrf.mxu1 }
 0x240   : > { %v1460_v9 = vadd.f32 %v1459_v23, %v1445_v19  ;;  %v3541_v19 = vld [vmem:[#allocation12 + $0x78] sm:$0xf0]  ;;  %v3891_v23 = vld [vmem:[#allocation12 + $0xf4] sm:$0xf] }
 0x244   : > { %v1417_v27 = vpop.f32.mrf.mxu2  ;;  %v1431_v28 = vpop.f32.mrf.mxu3 }
 0x245   : > { %v1432_v22 = vadd.f32 %v1431_v28, %v1417_v27  ;;  %v3605_v27 = vld [vmem:[#allocation12 + $0xf8] sm:$0xf0] }
 0x249   : > { %v1499_v36 = vpop.f32.mrf.mxu0  ;;  %v1513_v45 = vpop.f32.mrf.mxu1 }
 0x24a   : > { %v1500_v60 = vadd.f32 %v1499_v36, %v1458_v48 }
 0x24c   : > { %v1514_v20 = vadd.f32 %v1513_v45, %v1500_v60  ;;  %v4976_v45 = vor.u32 %v3876_v42, %v3539_v34  ;;  %v3874_v60 = vld [vmem:[#allocation12 + $0x64] sm:$0xf0] }
 0x24d   : > { %v1471_v4 = vpop.f32.mrf.mxu2  ;;  %v1485_v5 = vpop.f32.mrf.mxu3  ;;  %v3870_v34 = vld [vmem:[#allocation12 + $0x44] sm:$0xf0] }
 0x24e   : > { %v1472_v6 = vadd.f32 %v1471_v4, %v1430_v52  ;;  %v4952_v32 = vsub.f32 %v4668_v31, %v1514_v20  ;;  %v3531_v52 = vld [vmem:[#allocation12 + $0x60] sm:$0xf]  ;;  %v4980_v4 = vor.u32 %v3875_v47, %v3541_v19  ;;  %v3873_v20 = vld [vmem:[#allocation12 + $0x64] sm:$0xf]  ;;  %v3886_v47 = vld [vmem:[#allocation12 + $0xc4] sm:$0xf0] }
 0x250   : > { %v1486_v25 = vadd.f32 %v1485_v5, %v1472_v6  ;;  %v1523_v44 = vmul.f32 %v4952_v32, %v4952_v32  ;;  %v4982_v5 = vor.u32 %v3891_v23, %v3605_v27  ;;  %v3595_v6 = vld [vmem:[#allocation12 + $0xe0] sm:$0xf] }
 0x251   : > { %v1501_v26 = vpop.f32.mrf.mxu0  ;;  %v1515_v17 = vpop.f32.mrf.mxu1 }
 0x252   : > { %v1502_v37 = vadd.f32 %v1501_v26, %v1460_v9  ;;  %v4949_v10 = vsub.f32 %v4666_v30, %v1486_v25  ;;  %v3890_v9 = vld [vmem:[#allocation12 + $0xe4] sm:$0xf0]  ;;  %v3533_v25 = vld [vmem:[#allocation12 + $0x68] sm:$0xf0]  ;;  %v3889_v26 = vld [vmem:[#allocation12 + $0xe4] sm:$0xf] }
 0x254   : > { %v1516_v33 = vadd.f32 %v1515_v17, %v1502_v37  ;;  %v1522_v40 = vmul.f32 %v4949_v10, %v4949_v10  ;;  %v3597_v37 = vld [vmem:[#allocation12 + $0xe8] sm:$0xf0]  ;;  %v4986_v17 = vor.u32 %v3874_v60, %v3531_v52  ;;  %v3868_v52 = vld [vmem:[#allocation12 + $0x34] sm:$0xf0] }
 0x255   : > { %v1473_v38 = vpop.f32.mrf.mxu2  ;;  %v1487_v43 = vpop.f32.mrf.mxu3 }
 0x256   : > { %v1474_v41 = vadd.f32 %v1473_v38, %v1432_v22  ;;  %v4959_v49 = vsub.f32 %v4674_v58, %v1516_v33  ;;  %v4961_v50 = vpack.c.bf16 %v1523_v44, %v1522_v40  ;;  %v4988_v22 = vor.u32 %v3890_v9, %v3595_v6  ;;  %v3523_v33 = vld [vmem:[#allocation12 + $0x50] sm:$0xf]  ;;  %v3872_v38 = vld [vmem:[#allocation12 + $0x54] sm:$0xf0] }
 0x257   : > { %v3571_v9 = vld [vmem:[#allocation12 + $0xb0] sm:$0xf] }
 0x258   : > { %v1488_v30 = vadd.f32 %v1487_v43, %v1474_v41  ;;  %v1525_v31 = vmul.f32 %v4959_v49, %v4959_v49  ;;  %v1528_v62 = vunpack.c.l.bf16 %v4961_v50  ;;  %v1529_v14 = vunpack.c.h.bf16 %v4961_v50  ;;  %v3587_v43 = vld [vmem:[#allocation12 + $0xd0] sm:$0xf] }
 0x259   : > { %v4994_v41 = vor.u32 %v3889_v26, %v3597_v37  ;;  %v1596_v26 = vunpack.c.l.b16 %v4961_v50  ;;  %v1597_v37 = vunpack.c.h.b16 %v4961_v50 }
 0x25a   : > { %v4964_v55 = vsub.f32 %v4672_v54, %v1488_v30  ;;  %v3603_v54 = vld [vmem:[#allocation12 + $0xf0] sm:$0xf]  ;;  %v1532_v3 = vsub.f32 %v1522_v40, %v1528_v62  ;;  %v1533_v13 = vsub.f32 %v1523_v44, %v1529_v14  ;;  %v4992_v40 = vor.u32 %v3873_v20, %v3533_v25  ;;  %v3888_v44 = vld [vmem:[#allocation12 + $0xd4] sm:$0xf0]  ;;  %v3871_v30 = vld [vmem:[#allocation12 + $0x54] sm:$0xf] }
 0x25b   : > { %v4978_v48 = vor.u32 %v3892_v46, %v3603_v54  ;;  %v3589_v62 = vld [vmem:[#allocation12 + $0xd8] sm:$0xf0]  ;;  %v4998_v14 = vor.u32 %v3872_v38, %v3523_v33  ;;  %v3579_v46 = vld [vmem:[#allocation12 + $0xc0] sm:$0xf]  ;;  %v3884_v20 = vld [vmem:[#allocation12 + $0xb4] sm:$0xf0] }
 0x25c   : > { %v1524_v56 = vmul.f32 %v4964_v55, %v4964_v55  ;;  %v5012_v23 = vor.u32 %v3886_v47, %v3579_v46  ;;  %v3867_v25 = vld [vmem:[#allocation12 + $0x34] sm:$0xf]  ;;  %v3509_v33 = vld [vmem:[#allocation12 + $0x38] sm:$0xf0]  ;;  %v3882_v46 = vld [vmem:[#allocation12 + $0xa4] sm:$0xf0] }
 0x25d   : > { %v3883_v38 = vld [vmem:[#allocation12 + $0xb4] sm:$0xf]  ;;  %v5032_v50 = vor.u32 %v3867_v25, %v3509_v33  ;;  %v3865_v47 = vld [vmem:[#allocation12 + $0x24] sm:$0xf]  ;;  %v3880_v25 = vld [vmem:[#allocation12 + $0x94] sm:$0xf0] }
 0x25e   : > { %v4971_v1 = vpack.c.bf16 %v1525_v31, %v1524_v56  ;;  %v3879_v33 = vld [vmem:[#allocation12 + $0x94] sm:$0xf] }
 0x260   : > { %v1530_v58 = vunpack.c.l.bf16 %v4971_v1  ;;  %v1531_v15 = vunpack.c.h.bf16 %v4971_v1  ;;  %v1598_v27 = vunpack.c.l.b16 %v4971_v1 }
 0x262   : > { %v1534_v7 = vsub.f32 %v1524_v56, %v1530_v58  ;;  %v1535_v16 = vsub.f32 %v1525_v31, %v1531_v15  ;;  %v3525_v31 = vld [vmem:[#allocation12 + $0x58] sm:$0xf0]  ;;  %v3887_v56 = vld [vmem:[#allocation12 + $0xd4] sm:$0xf]  ;;  %v5000_v58 = vor.u32 %v3888_v44, %v3587_v43  ;;  %v3515_v15 = vld [vmem:[#allocation12 + $0x40] sm:$0xf]  ;;  %v1600_v44 = vpack.c.b16 %v1598_v27, %v1596_v26 }
 0x263   : > { %v5004_v42 = vor.u32 %v3871_v30, %v3525_v31  ;;  %v5006_v54 = vor.u32 %v3887_v56, %v3589_v62  ;;  %v5010_v19 = vor.u32 %v3870_v34, %v3515_v15  ;;  %v5028_v31 = vor.u32 %v3884_v20, %v3571_v9  ;;  %v3499_v56 = vld [vmem:[#allocation12 + $0x20] sm:$0xf]  ;;  %v3866_v62 = vld [vmem:[#allocation12 + $0x24] sm:$0xf0]  ;;  %v3555_v20 = vld [vmem:[#allocation12 + $0x90] sm:$0xf] }
 0x264   : > { %v1536_v28 = vpack.c.bf16 %v1534_v7, %v1532_v3  ;;  %v1537_v36 = vpack.c.bf16 %v1535_v16, %v1533_v13  ;;  %v3869_v3 = vld [vmem:[#allocation12 + $0x44] sm:$0xf]  ;;  %v3517_v7 = vld [vmem:[#allocation12 + $0x48] sm:$0xf0]  ;;  %v3563_v34 = vld [vmem:[#allocation12 + $0xa0] sm:$0xf] }
 0x265   : > { %v3885_v13 = vld [vmem:[#allocation12 + $0xc4] sm:$0xf]  ;;  %v3581_v16 = vld [vmem:[#allocation12 + $0xc8] sm:$0xf0]  ;;  %v5018_v60 = vor.u32 %v3869_v3, %v3517_v7  ;;  %v5040_v27 = vor.u32 %v3882_v46, %v3563_v34  ;;  %v3863_v26 = vld [vmem:[#allocation12 + $0x14] sm:$0xf] }
 0x266   : > { %1546 = vmatmul.bf16.vlgmr.msra.gmra.mxu2 %v1536_v28  ;;  %1560 = vmatmul.bf16.vlgmr.msra.gmra.mxu3 %v1537_v36  ;;  %v5020_v6 = vor.u32 %v3885_v13, %v3581_v16  ;;  %v3501_v3 = vld [vmem:[#allocation12 + $0x28] sm:$0xf0]  ;;  %v3881_v7 = vld [vmem:[#allocation12 + $0xa4] sm:$0xf]  ;;  %v5038_v16 = vor.u32 %v3866_v62, %v3499_v56  ;;  %v3862_v56 = vld [vmem:[#allocation12 + $0x4] sm:$0xf0] }
 0x267   : > { %1574 = vmatmul.bf16.vlgmr.msrb.gmra.mxu0 %v1536_v28  ;;  %1588 = vmatmul.bf16.vlgmr.msrb.gmra.mxu1 %v1537_v36  ;;  %v1599_v28 = vunpack.c.h.b16 %v4971_v1  ;;  %v3507_v36 = vld [vmem:[#allocation12 + $0x30] sm:$0xf]  ;;  %v3573_v1 = vld [vmem:[#allocation12 + $0xb8] sm:$0xf0]  ;;  %v3565_v13 = vld [vmem:[#allocation12 + $0xa8] sm:$0xf0] }
 0x268   : > { %1914 = vmatpush.bf16.msra.mxu2 %v4976_v45  ;;  %1928 = vmatpush.bf16.msra.mxu3 %v4978_v48  ;;  %v5024_v43 = vor.u32 %v3868_v52, %v3507_v36  ;;  %v5034_v15 = vor.u32 %v3883_v38, %v3573_v1  ;;  %v3864_v36 = vld [vmem:[#allocation12 + $0x14] sm:$0xf0]  ;;  %v5044_v52 = vor.u32 %v3865_v47, %v3501_v3  ;;  %v3557_v38 = vld [vmem:[#allocation12 + $0x98] sm:$0xf0]  ;;  %v3547_v46 = vld [vmem:[#allocation12 + $0x80] sm:$0xf] }
 0x269   : > { %1942 = vmatpush.bf16.msrb.mxu0 %v4980_v4  ;;  %1956 = vmatpush.bf16.msrb.mxu1 %v4982_v5  ;;  %v1601_v30 = vpack.c.b16 %v1599_v28, %v1597_v37  ;;  %v3491_v28 = vld [vmem:[#allocation12 + $0x10] sm:$0xf]  ;;  %v5046_v9 = vor.u32 %v3881_v7, %v3565_v13  ;;  %v3493_v37 = vld [vmem:[#allocation12 + $0x18] sm:$0xf0]  ;;  %v5058_v34 = vor.u32 %v3879_v33, %v3557_v38  ;;  %v3878_v47 = vld [vmem:[#allocation12 + $0x84] sm:$0xf0] }
 0x26a   : > { %v5050_v1 = vor.u32 %v3864_v36, %v3491_v28  ;;  %v5056_v62 = vor.u32 %v3863_v26, %v3493_v37  ;;  %v3861_v3 = vld [vmem:[#allocation12 + $0x4] sm:$0xf]  ;;  %v3485_v7 = vld [vmem:[#allocation12 + $0x8] sm:$0xf0]  ;;  %v5064_v36 = vor.u32 %v3878_v47, %v3547_v46 }
 0x26b   : > { %v3877_v13 = vld [vmem:[#allocation12 + $0x84] sm:$0xf] }
 0x26c   : > { %1915 = vmatpush.bf16.msra.mxu2 %v4986_v17  ;;  %1929 = vmatpush.bf16.msra.mxu3 %v4988_v22 }
 0x26d   : > { %1943 = vmatpush.bf16.msrb.mxu0 %v4992_v40  ;;  %1957 = vmatpush.bf16.msrb.mxu1 %v4994_v41 }
 0x270   : > { %1916 = vmatpush.bf16.msra.mxu2 %v4998_v14  ;;  %1930 = vmatpush.bf16.msra.mxu3 %v5000_v58 }
 0x271   : > { %1944 = vmatpush.bf16.msrb.mxu0 %v5004_v42  ;;  %1958 = vmatpush.bf16.msrb.mxu1 %v5006_v54 }
 0x274   : > { %1917 = vmatpush.bf16.msra.mxu2 %v5010_v19  ;;  %1931 = vmatpush.bf16.msra.mxu3 %v5012_v23 }
 0x275   : > { %1945 = vmatpush.bf16.msrb.mxu0 %v5018_v60  ;;  %1959 = vmatpush.bf16.msrb.mxu1 %v5020_v6 }
 0x276   : > { %1612 = vmatmul.bf16.vlgmr.msrb.gmra.mxu2 %v1600_v44  ;;  %1626 = vmatmul.bf16.vlgmr.msrb.gmra.mxu3 %v1601_v30 }
 0x277   : > { %1640 = vmatmul.bf16.vlgmr.msra.gmra.mxu0 %v1600_v44  ;;  %1654 = vmatmul.bf16.vlgmr.msra.gmra.mxu1 %v1601_v30  ;;  %v5052_v44 = vor.u32 %v3880_v25, %v3555_v20  ;;  %v3483_v30 = vld [vmem:[#allocation12] sm:$0xf]  ;;  %v5068_v20 = vor.u32 %v3861_v3, %v3485_v7  ;;  %v5070_v25 = vor.u32 %v3877_v13, %v3549_v12 }
 0x278   : > { %1918 = vmatpush.bf16.msra.mxu2 %v5024_v43  ;;  %1932 = vmatpush.bf16.msra.mxu3 %v5028_v31  ;;  %v5062_v28 = vor.u32 %v3862_v56, %v3483_v30 }
 0x279   : > { %1946 = vmatpush.bf16.msrb.mxu0 %v5032_v50  ;;  %1960 = vmatpush.bf16.msrb.mxu1 %v5034_v15 }
 0x27c   : > { %1919 = vmatpush.bf16.msra.mxu2 %v5038_v16  ;;  %1933 = vmatpush.bf16.msra.mxu3 %v5040_v27 }
 0x27d   : > { %1947 = vmatpush.bf16.msrb.mxu0 %v5044_v52  ;;  %1961 = vmatpush.bf16.msrb.mxu1 %v5046_v9 }
 0x280   : > { %1920 = vmatpush.bf16.msra.mxu2 %v5050_v1  ;;  %1934 = vmatpush.bf16.msra.mxu3 %v5052_v44 }
 0x281   : > { %1948 = vmatpush.bf16.msrb.mxu0 %v5056_v62  ;;  %1962 = vmatpush.bf16.msrb.mxu1 %v5058_v34 }
 0x284   : > { %1921 = vmatpush.bf16.msra.mxu2 %v5062_v28  ;;  %1935 = vmatpush.bf16.msra.mxu3 %v5064_v36 }
 0x285   : > { %1949 = vmatpush.bf16.msrb.mxu0 %v5068_v20  ;;  %1963 = vmatpush.bf16.msrb.mxu1 %v5070_v25 }
 0x287   : > { %1922 = vmatmul.bf16.vlgmr.msra.gmra.mxu2 %v4815_v2  ;;  %1936 = vmatmul.bf16.vlgmr.msra.gmra.mxu3 %v4817_v8 }
 0x288   : > { %1970 = vmatpush.bf16.msrb.mxu2 %v4976_v45  ;;  %1984 = vmatpush.bf16.msrb.mxu3 %v4978_v48 }
 0x289   : > { %1998 = vmatpush.bf16.msra.mxu0 %v4980_v4  ;;  %2012 = vmatpush.bf16.msra.mxu1 %v4982_v5 }
 0x28a   : > { %1950 = vmatmul.bf16.vlgmr.msrb.gmra.mxu0 %v4815_v2  ;;  %1964 = vmatmul.bf16.vlgmr.msrb.gmra.mxu1 %v4817_v8 }
 0x28c   : > { %1971 = vmatpush.bf16.msrb.mxu2 %v4986_v17  ;;  %1985 = vmatpush.bf16.msrb.mxu3 %v4988_v22 }
 0x28d   : > { %1999 = vmatpush.bf16.msra.mxu0 %v4992_v40  ;;  %2013 = vmatpush.bf16.msra.mxu1 %v4994_v41 }
 0x290   : > { %1972 = vmatpush.bf16.msrb.mxu2 %v4998_v14  ;;  %1986 = vmatpush.bf16.msrb.mxu3 %v5000_v58 }
 0x291   : > { %2000 = vmatpush.bf16.msra.mxu0 %v5004_v42  ;;  %2014 = vmatpush.bf16.msra.mxu1 %v5006_v54 }
 0x294   : > { %1973 = vmatpush.bf16.msrb.mxu2 %v5010_v19  ;;  %1987 = vmatpush.bf16.msrb.mxu3 %v5012_v23 }
 0x295   : > { %2001 = vmatpush.bf16.msra.mxu0 %v5018_v60  ;;  %2015 = vmatpush.bf16.msra.mxu1 %v5020_v6 }
 0x298   : > { %1974 = vmatpush.bf16.msrb.mxu2 %v5024_v43  ;;  %1988 = vmatpush.bf16.msrb.mxu3 %v5028_v31 }
 0x299   : > { %2002 = vmatpush.bf16.msra.mxu0 %v5032_v50  ;;  %2016 = vmatpush.bf16.msra.mxu1 %v5034_v15 }
 0x29c   : > { %1975 = vmatpush.bf16.msrb.mxu2 %v5038_v16  ;;  %1989 = vmatpush.bf16.msrb.mxu3 %v5040_v27 }
 0x29d   : > { %2003 = vmatpush.bf16.msra.mxu0 %v5044_v52  ;;  %2017 = vmatpush.bf16.msra.mxu1 %v5046_v9 }
 0x2a0   : > { %1976 = vmatpush.bf16.msrb.mxu2 %v5050_v1  ;;  %1990 = vmatpush.bf16.msrb.mxu3 %v5052_v44 }
 0x2a1   : > { %2004 = vmatpush.bf16.msra.mxu0 %v5056_v62  ;;  %2018 = vmatpush.bf16.msra.mxu1 %v5058_v34 }
 0x2a4   : > { %1977 = vmatpush.bf16.msrb.mxu2 %v5062_v28  ;;  %1991 = vmatpush.bf16.msrb.mxu3 %v5064_v36 }
 0x2a5   : > { %2005 = vmatpush.bf16.msra.mxu0 %v5068_v20  ;;  %2019 = vmatpush.bf16.msra.mxu1 %v5070_v25 }
 0x2a7   : > { %1978 = vmatmul.bf16.vlgmr.msrb.gmra.mxu2 %v4807_v57  ;;  %1992 = vmatmul.bf16.vlgmr.msrb.gmra.mxu3 %v4809_v61 }
 0x2a8   : > { %2046 = vmatpush.bf16.msra.mxu2 %v4976_v45  ;;  %2060 = vmatpush.bf16.msra.mxu3 %v4978_v48 }
 0x2a9   : > { %2006 = vmatmul.bf16.vlgmr.msra.gmra.mxu0 %v4807_v57  ;;  %2020 = vmatmul.bf16.vlgmr.msra.gmra.mxu1 %v4809_v61 }
 0x2aa   : > { %2074 = vmatpush.bf16.msrb.mxu0 %v4980_v4  ;;  %2088 = vmatpush.bf16.msrb.mxu1 %v4982_v5 }
 0x2ac   : > { %2047 = vmatpush.bf16.msra.mxu2 %v4986_v17  ;;  %2061 = vmatpush.bf16.msra.mxu3 %v4988_v22 }
 0x2ae   : > { %2075 = vmatpush.bf16.msrb.mxu0 %v4992_v40  ;;  %2089 = vmatpush.bf16.msrb.mxu1 %v4994_v41 }
 0x2b0   : > { %2048 = vmatpush.bf16.msra.mxu2 %v4998_v14  ;;  %2062 = vmatpush.bf16.msra.mxu3 %v5000_v58 }
 0x2b2   : > { %2076 = vmatpush.bf16.msrb.mxu0 %v5004_v42  ;;  %2090 = vmatpush.bf16.msrb.mxu1 %v5006_v54 }
 0x2b4   : > { %2049 = vmatpush.bf16.msra.mxu2 %v5010_v19  ;;  %2063 = vmatpush.bf16.msra.mxu3 %v5012_v23 }
 0x2b6   : > { %2077 = vmatpush.bf16.msrb.mxu0 %v5018_v60  ;;  %2091 = vmatpush.bf16.msrb.mxu1 %v5020_v6 }
 0x2b8   : > { %2050 = vmatpush.bf16.msra.mxu2 %v5024_v43  ;;  %2064 = vmatpush.bf16.msra.mxu3 %v5028_v31 }
 0x2ba   : > { %2078 = vmatpush.bf16.msrb.mxu0 %v5032_v50  ;;  %2092 = vmatpush.bf16.msrb.mxu1 %v5034_v15 }
 0x2bc   : > { %2051 = vmatpush.bf16.msra.mxu2 %v5038_v16  ;;  %2065 = vmatpush.bf16.msra.mxu3 %v5040_v27 }
 0x2be   : > { %2079 = vmatpush.bf16.msrb.mxu0 %v5044_v52  ;;  %2093 = vmatpush.bf16.msrb.mxu1 %v5046_v9 }
 0x2c0   : > { %2052 = vmatpush.bf16.msra.mxu2 %v5050_v1  ;;  %2066 = vmatpush.bf16.msra.mxu3 %v5052_v44 }
 0x2c2   : > { %2080 = vmatpush.bf16.msrb.mxu0 %v5056_v62  ;;  %2094 = vmatpush.bf16.msrb.mxu1 %v5058_v34 }
 0x2c4   : > { %2053 = vmatpush.bf16.msra.mxu2 %v5062_v28  ;;  %2067 = vmatpush.bf16.msra.mxu3 %v5064_v36 }
 0x2c6   : > { %2081 = vmatpush.bf16.msrb.mxu0 %v5068_v20  ;;  %2095 = vmatpush.bf16.msrb.mxu1 %v5070_v25 }
 0x2c8   : > { %2112 = vmatpush.bf16.msrb.mxu2 %v4976_v45  ;;  %2126 = vmatpush.bf16.msrb.mxu3 %v4978_v48 }
 0x2ca   : > { %2140 = vmatpush.bf16.msra.mxu0 %v4980_v4  ;;  %2154 = vmatpush.bf16.msra.mxu1 %v4982_v5 }
 0x2cc   : > { %2113 = vmatpush.bf16.msrb.mxu2 %v4986_v17  ;;  %2127 = vmatpush.bf16.msrb.mxu3 %v4988_v22 }
 0x2ce   : > { %2141 = vmatpush.bf16.msra.mxu0 %v4992_v40  ;;  %2155 = vmatpush.bf16.msra.mxu1 %v4994_v41 }
 0x2d0   : > { %2114 = vmatpush.bf16.msrb.mxu2 %v4998_v14  ;;  %2128 = vmatpush.bf16.msrb.mxu3 %v5000_v58 }
 0x2d2   : > { %2142 = vmatpush.bf16.msra.mxu0 %v5004_v42  ;;  %2156 = vmatpush.bf16.msra.mxu1 %v5006_v54 }
 0x2d4   : > { %2115 = vmatpush.bf16.msrb.mxu2 %v5010_v19  ;;  %2129 = vmatpush.bf16.msrb.mxu3 %v5012_v23 }
 0x2d6   : > { %2143 = vmatpush.bf16.msra.mxu0 %v5018_v60  ;;  %2157 = vmatpush.bf16.msra.mxu1 %v5020_v6 }
 0x2d8   : > { %2116 = vmatpush.bf16.msrb.mxu2 %v5024_v43  ;;  %2130 = vmatpush.bf16.msrb.mxu3 %v5028_v31 }
 0x2da   : > { %2144 = vmatpush.bf16.msra.mxu0 %v5032_v50  ;;  %2158 = vmatpush.bf16.msra.mxu1 %v5034_v15 }
 0x2dc   : > { %2117 = vmatpush.bf16.msrb.mxu2 %v5038_v16  ;;  %2131 = vmatpush.bf16.msrb.mxu3 %v5040_v27 }
 0x2de   : > { %2145 = vmatpush.bf16.msra.mxu0 %v5044_v52  ;;  %2159 = vmatpush.bf16.msra.mxu1 %v5046_v9 }
 0x2e0   : > { %2118 = vmatpush.bf16.msrb.mxu2 %v5050_v1  ;;  %2132 = vmatpush.bf16.msrb.mxu3 %v5052_v44 }
 0x2e2   : > { %2146 = vmatpush.bf16.msra.mxu0 %v5056_v62  ;;  %2160 = vmatpush.bf16.msra.mxu1 %v5058_v34 }
 0x2e4   : > { %2119 = vmatpush.bf16.msrb.mxu2 %v5062_v28  ;;  %2133 = vmatpush.bf16.msrb.mxu3 %v5064_v36  ;;  %v1575_v57 = vpop.f32.mrf.mxu0  ;;  %v1589_v61 = vpop.f32.mrf.mxu1 }
 0x2e5   : > { %v1590_v5 = vadd.f32 %v1589_v61, %v1575_v57 }
 0x2e6   : > { %2147 = vmatpush.bf16.msra.mxu0 %v5068_v20  ;;  %2161 = vmatpush.bf16.msra.mxu1 %v5070_v25 }
 0x2e9   : > { %v1547_v2 = vpop.f32.mrf.mxu2  ;;  %v1561_v8 = vpop.f32.mrf.mxu3 }
 0x2ea   : > { %v1562_v14 = vadd.f32 %v1561_v8, %v1547_v2 }
 0x2ec   : > { %v1577_v12 = vpop.f32.mrf.mxu0  ;;  %v1591_v45 = vpop.f32.mrf.mxu1 }
 0x2ed   : > { %v1592_v23 = vadd.f32 %v1591_v45, %v1577_v12 }
 0x2f1   : > { %v1549_v48 = vpop.f32.mrf.mxu2  ;;  %v1563_v4 = vpop.f32.mrf.mxu3 }
 0x2f2   : > { %v1564_v16 = vadd.f32 %v1563_v4, %v1549_v48 }
 0x2f4   : > { %v1641_v17 = vpop.f32.mrf.mxu0  ;;  %v1655_v22 = vpop.f32.mrf.mxu1 }
 0x2f5   : > { %v1642_v40 = vadd.f32 %v1641_v17, %v1590_v5 }
 0x2f7   : > { %v1656_v41 = vadd.f32 %v1655_v22, %v1642_v40 }
 0x2f9   : > { %v1661_v58 = vadd.f32 1e-05, %v1656_v41  ;;  %v1613_v42 = vpop.f32.mrf.mxu2  ;;  %v1627_v54 = vpop.f32.mrf.mxu3 }
 0x2fa   : > { %v1614_v19 = vadd.f32 %v1613_v42, %v1562_v14 }
 0x2fb   : > { %4055 = vrsqrt.f32 %v1661_v58  ;;  %vm1680_vm4 = vweird.f32 %v1661_v58 }
 0x2fc   : > { %v1628_v60 = vadd.f32 %v1627_v54, %v1614_v19  ;;  %v1643_v6 = vpop.f32.mrf.mxu0  ;;  %v1657_v50 = vpop.f32.mrf.mxu1 }
 0x2fd   : > { %v1644_v43 = vadd.f32 %v1643_v6, %v1592_v23 }
 0x2fe   : > { %v1660_v31 = vadd.f32 1e-05, %v1628_v60 }
 0x2ff   : > { %v1658_v15 = vadd.f32 %v1657_v50, %v1644_v43 }
 0x300   : > { %4057 = vrsqrt.f32 %v1660_v31  ;;  %vm1670_vm7 = vweird.f32 %v1660_v31 }
 0x301   : > { %v4056_v27 = vpop.eup %4055  ;;  %v1663_v52 = vadd.f32 1e-05, %v1658_v15  ;;  %v1615_v9 = vpop.f32.mrf.mxu2 }
 0x302   : > { %v1675_v26 = vmul.f32 %v4056_v27, %v1661_v58  ;;  %v1616_v37 = vadd.f32 %v1615_v9, %v1564_v16  ;;  %v1629_v33 = vpop.f32.mrf.mxu3  ;;  %vm1681_vm3 = vweird.f32 %v4056_v27 }
 0x303   : > { %4059 = vrsqrt.f32 %v1663_v52  ;;  %vm1682_vm6 = vmor %vm1680_vm4, %vm1681_vm3  ;;  %vm1700_vm10 = vweird.f32 %v1663_v52 }
 0x304   : > { %v1676_v38 = vmul.f32 %v4056_v27, %v1675_v26  ;;  %v1630_v1 = vadd.f32 %v1629_v33, %v1616_v37 }
 0x306   : > { %v4058_v44 = vpop.eup %4057  ;;  %v1677_v30 = vmul.f32 0.5, %v1676_v38  ;;  %v1662_v56 = vadd.f32 1e-05, %v1630_v1 }
 0x307   : > { %v1665_v62 = vmul.f32 %v4058_v44, %v1660_v31  ;;  %vm1671_vm5 = vweird.f32 %v4058_v44  ;;  %v1951_v48 = vpop.f32.mrf.mxu0  ;;  %v1965_v17 = vpop.f32.mrf.mxu1 }
 0x308   : > { %v1678_v34 = vsub.f32 1.5, %v1677_v30  ;;  %4061 = vrsqrt.f32 %v1662_v56  ;;  %vm1672_vm8 = vmor %vm1670_vm7, %vm1671_vm5  ;;  %vm1690_vm13 = vweird.f32 %v1662_v56 }
 0x309   : > { %v4060_v46 = vpop.eup %4059  ;;  %v1666_v47 = vmul.f32 %v4058_v44, %v1665_v62 }
 0x30a   : > { %v1695_v3 = vmul.f32 %v4060_v46, %v1663_v52  ;;  %v1679_v7 = vmul.f32 %v4056_v27, %v1678_v34  ;;  %vm1701_vm9 = vweird.f32 %v4060_v46  ;;  %v1923_v58 = vpop.f32.mrf.mxu2  ;;  %v1937_v42 = vpop.f32.mrf.mxu3 }
 0x30b   : > { %v1667_v13 = vmul.f32 0.5, %v1666_v47  ;;  %vm1702_vm12 = vmor %vm1700_vm10, %vm1701_vm9  ;;  %v1938_v52 = vadd.f32 %v1937_v42, %v1923_v58  ;;  %v3923_v58 = vld [vmem:[#allocation12 + $0xf4] sm:$0xf]  ;;  %v3733_v42 = vld [vmem:[#allocation12 + $0xf8] sm:$0xf0] }
 0x30c   : > { %v1696_v28 = vmul.f32 %v4060_v46, %v1695_v3  ;;  %v1683_v57 = vsel %vm1682_vm6, %v4056_v27, %v1679_v7  ;;  %v1966_v27 = vadd.f32 %v1965_v17, %v1951_v48  ;;  %v3908_v48 = vld [vmem:[#allocation12 + $0x74] sm:$0xf0] }
 0x30d   : > { %v1668_v36 = vsub.f32 1.5, %v1667_v13  ;;  %v1705_v4 = vmul.f32 %v1683_v57, %v4952_v32 }
 0x30e   : > { %v4062_v20 = vpop.eup %4061  ;;  %v1697_v25 = vmul.f32 0.5, %v1696_v28 }
 0x30f   : > { %v1669_v61 = vmul.f32 %v4058_v44, %v1668_v36  ;;  %v1685_v2 = vmul.f32 %v4062_v20, %v1662_v56  ;;  %vm1691_vm11 = vweird.f32 %v4062_v20  ;;  %v1953_v60 = vpop.f32.mrf.mxu0  ;;  %v1967_v43 = vpop.f32.mrf.mxu1 }
 0x310   : > { %v1698_v8 = vsub.f32 1.5, %v1697_v25  ;;  %vm1692_vm14 = vmor %vm1690_vm13, %vm1691_vm11  ;;  %v1968_v38 = vadd.f32 %v1967_v43, %v1953_v60  ;;  %v3906_v60 = vld [vmem:[#allocation12 + $0x64] sm:$0xf0]  ;;  %v5220_v43 = vor.u32 %v3923_v58, %v3733_v42  ;;  %v3637_v42 = vld [vmem:[#allocation12 + $0x38] sm:$0xf0] }
 0x311   : > { %v1673_v12 = vsel %vm1672_vm8, %v4058_v44, %v1669_v61  ;;  %v1686_v45 = vmul.f32 %v4062_v20, %v1685_v2 }
 0x312   : > { %v1704_v5 = vmul.f32 %v1673_v12, %v4949_v10  ;;  %v1699_v22 = vmul.f32 %v4060_v46, %v1698_v8  ;;  %v1925_v31 = vpop.f32.mrf.mxu2  ;;  %v1939_v50 = vpop.f32.mrf.mxu3 }
 0x313   : > { %v1687_v40 = vmul.f32 0.5, %v1686_v45  ;;  %v1940_v62 = vadd.f32 %v1939_v50, %v1925_v31  ;;  %v3667_v45 = vld [vmem:[#allocation12 + $0x70] sm:$0xf]  ;;  %v3723_v31 = vld [vmem:[#allocation12 + $0xe0] sm:$0xf] }
 0x314   : > { %v1708_v41 = vpack.c.bf16 %v1705_v4, %v1704_v5  ;;  %v1703_v54 = vsel %vm1702_vm12, %v4060_v46, %v1699_v22  ;;  %v3924_v4 = vld [vmem:[#allocation12 + $0xf4] sm:$0xf0]  ;;  %v3907_v5 = vld [vmem:[#allocation12 + $0x74] sm:$0xf]  ;;  %v3922_v50 = vld [vmem:[#allocation12 + $0xe4] sm:$0xf0] }
 0x315   : > { %v1688_v14 = vsub.f32 1.5, %v1687_v40  ;;  %v1707_v10 = vmul.f32 %v1703_v54, %v4959_v49 }
 0x316   : > { %1710 = vst [vmem:[%s4626_s6] sm:$0xff] %v1708_v41 }
 0x317   : > { %v1689_v19 = vmul.f32 %v4062_v20, %v1688_v14  ;;  %v3669_v14 = vld [vmem:[#allocation12 + $0x78] sm:$0xf0] }
 0x319   : > { %v1693_v32 = vsel %vm1692_vm14, %v4062_v20, %v1689_v19 }
 0x31a   : > { %v1706_v23 = vmul.f32 %v1693_v32, %v4964_v55  ;;  %v5214_v32 = vor.u32 %v3908_v48, %v3667_v45 }
 0x31c   : > { %v1709_v6 = vpack.c.bf16 %v1707_v10, %v1706_v23  ;;  %v3659_v23 = vld [vmem:[#allocation12 + $0x60] sm:$0xf] }
 0x31e   : > { %1711 = vst [vmem:[%s4626_s6 + $0x8] sm:$0xff] %v1709_v6  ;;  %v5218_v6 = vor.u32 %v3907_v5, %v3669_v14  ;;  %v3635_v5 = vld [vmem:[#allocation12 + $0x30] sm:$0xf]  ;;  %v3899_v14 = vld [vmem:[#allocation12 + $0x34] sm:$0xf] }
 0x326   : > { %v2007_v15 = vpop.f32.mrf.mxu0  ;;  %v2021_v16 = vpop.f32.mrf.mxu1 }
 0x327   : > { %v2008_v9 = vadd.f32 %v2007_v15, %v1966_v27  ;;  %v3905_v15 = vld [vmem:[#allocation12 + $0x64] sm:$0xf] }
 0x328   : > { %v3921_v27 = vld [vmem:[#allocation12 + $0xe4] sm:$0xf] }
 0x329   : > { %v2022_v1 = vadd.f32 %v2021_v16, %v2008_v9  ;;  %v3661_v16 = vld [vmem:[#allocation12 + $0x68] sm:$0xf0]  ;;  %v5224_v9 = vor.u32 %v3906_v60, %v3659_v23 }
 0x32a   : > { %v1979_v26 = vpop.f32.mrf.mxu2  ;;  %v1993_v37 = vpop.f32.mrf.mxu3 }
 0x32b   : > { %v1980_v33 = vadd.f32 %v1979_v26, %v1938_v52  ;;  %v5190_v34 = vsub.f32 %v4795_v21, %v2022_v1  ;;  %v3725_v52 = vld [vmem:[#allocation12 + $0xe8] sm:$0xf0]  ;;  %v5226_v26 = vor.u32 %v3922_v50, %v3723_v31  ;;  %v5233_v1 = vor.u32 %v3905_v15, %v3661_v16  ;;  %v3627_v15 = vld [vmem:[#allocation12 + $0x20] sm:$0xf] }
 0x32d   : > { %v1994_v44 = vadd.f32 %v1993_v37, %v1980_v33  ;;  %v2031_v28 = vmul.f32 %v5190_v34, %v5190_v34  ;;  %v3651_v37 = vld [vmem:[#allocation12 + $0x50] sm:$0xf]  ;;  %v3904_v33 = vld [vmem:[#allocation12 + $0x54] sm:$0xf0] }
 0x32e   : > { %v2009_v49 = vpop.f32.mrf.mxu0  ;;  %v2023_v56 = vpop.f32.mrf.mxu1 }
 0x32f   : > { %v2010_v30 = vadd.f32 %v2009_v49, %v1968_v38  ;;  %v5187_v55 = vsub.f32 %v4793_v18, %v1994_v44  ;;  %v1156_v38 = vadd.f32 %v4944_v63, %v970_v35  ;;  %v5235_v44 = vor.u32 %v3921_v27, %v3725_v52  ;;  %v3715_v49 = vld [vmem:[#allocation12 + $0xd0] sm:$0xf]  ;;  %v3691_v27 = vld [vmem:[#allocation12 + $0xa0] sm:$0xf]  ;;  %v3914_v52 = vld [vmem:[#allocation12 + $0xa4] sm:$0xf0] }
 0x330   : > { %v5242_v35 = vor.u32 %v3904_v33, %v3651_v37  ;;  %v3897_v37 = vld [vmem:[#allocation12 + $0x24] sm:$0xf]  ;;  %v3629_v33 = vld [vmem:[#allocation12 + $0x28] sm:$0xf0] }
 0x331   : > { %v2024_v46 = vadd.f32 %v2023_v56, %v2010_v30  ;;  %v2030_v3 = vmul.f32 %v5187_v55, %v5187_v55  ;;  %v3920_v30 = vld [vmem:[#allocation12 + $0xd4] sm:$0xf0]  ;;  %v3903_v56 = vld [vmem:[#allocation12 + $0x54] sm:$0xf] }
 0x332   : > { %v1981_v47 = vpop.f32.mrf.mxu2  ;;  %v1995_v13 = vpop.f32.mrf.mxu3  ;;  %v5244_v63 = vor.u32 %v3920_v30, %v3715_v49  ;;  %v3693_v49 = vld [vmem:[#allocation12 + $0xa8] sm:$0xf0] }
 0x333   : > { %v1982_v7 = vadd.f32 %v1981_v47, %v1940_v62  ;;  %v5197_v36 = vsub.f32 %v4799_v24, %v2024_v46  ;;  %v5199_v20 = vpack.c.bf16 %v2031_v28, %v2030_v3  ;;  %v3653_v62 = vld [vmem:[#allocation12 + $0x58] sm:$0xf0]  ;;  %v3919_v46 = vld [vmem:[#allocation12 + $0xd4] sm:$0xf] }
 0x334   : > { %v3717_v47 = vld [vmem:[#allocation12 + $0xd8] sm:$0xf0] }
 0x335   : > { %v1996_v18 = vadd.f32 %v1995_v13, %v1982_v7  ;;  %v2033_v21 = vmul.f32 %v5197_v36, %v5197_v36  ;;  %v2036_v61 = vunpack.c.l.bf16 %v5199_v20  ;;  %v2037_v8 = vunpack.c.h.bf16 %v5199_v20  ;;  %v3643_v13 = vld [vmem:[#allocation12 + $0x40] sm:$0xf] }
 0x336   : > { %v2104_v58 = vunpack.c.l.b16 %v5199_v20 }
 0x337   : > { %v5202_v25 = vsub.f32 %v4801_v29, %v1996_v18  ;;  %v3731_v29 = vld [vmem:[#allocation12 + $0xf0] sm:$0xf]  ;;  %v2040_v17 = vsub.f32 %v2030_v3, %v2036_v61  ;;  %v2041_v40 = vsub.f32 %v2031_v28, %v2037_v8  ;;  %v5613_v3 = vperm.slane %v4928_v11, 1  ;;  %v3902_v28 = vld [vmem:[#allocation12 + $0x44] sm:$0xf0] }
 0x338   : > { %v5216_v10 = vor.u32 %v3924_v4, %v3731_v29  ;;  %v1170_v18 = vadd.f32 %v4946_v0, %v1156_v38  ;;  %v5251_v11 = vor.u32 %v3919_v46, %v3717_v47  ;;  %v3901_v61 = vld [vmem:[#allocation12 + $0x44] sm:$0xf]  ;;  %v3645_v8 = vld [vmem:[#allocation12 + $0x48] sm:$0xf0]  ;;  %v5256_v0 = vor.u32 %v3902_v28, %v3643_v13  ;;  %v3619_v46 = vld [vmem:[#allocation12 + $0x10] sm:$0xf] }
 0x339   : > { %v2032_v57 = vmul.f32 %v5202_v25, %v5202_v25  ;;  %v1184_v7 = vadd.f32 %v4940_v53, %v5613_v3  ;;  %v3707_v53 = vld [vmem:[#allocation12 + $0xc0] sm:$0xf]  ;;  %v3913_v38 = vld [vmem:[#allocation12 + $0xa4] sm:$0xf]  ;;  %v3896_v47 = vld [vmem:[#allocation12 + $0x14] sm:$0xf0] }
 0x33a   : > { %4063 = vtanh.f32 %v1170_v18  ;;  %v5300_v13 = vor.u32 %v3913_v38, %v3693_v49  ;;  %v3683_v28 = vld [vmem:[#allocation12 + $0x90] sm:$0xf]  ;;  %v3912_v18 = vld [vmem:[#allocation12 + $0x94] sm:$0xf0] }
 0x33b   : > { %v5209_v2 = vpack.c.bf16 %v2033_v21, %v2032_v57  ;;  %v1198_v45 = vadd.f32 %v4942_v59, %v1184_v7  ;;  %v5264_v59 = vor.u32 %v3901_v61, %v3645_v8  ;;  %4065 = vtanh.f32 %v4938_v51  ;;  %v3898_v51 = vld [vmem:[#allocation12 + $0x24] sm:$0xf0]  ;;  %v3621_v61 = vld [vmem:[#allocation12 + $0x18] sm:$0xf0]  ;;  %v3911_v8 = vld [vmem:[#allocation12 + $0x94] sm:$0xf] }
 0x33c   : > { %v5298_v7 = vor.u32 %v3897_v37, %v3629_v33 }
 0x33d   : > { %v2038_v24 = vunpack.c.l.bf16 %v5209_v2  ;;  %v2039_v12 = vunpack.c.h.bf16 %v5209_v2  ;;  %v2106_v29 = vunpack.c.l.b16 %v5209_v2  ;;  %v2107_v4 = vunpack.c.h.b16 %v5209_v2 }
 0x33e   : > { %v2105_v2 = vunpack.c.h.b16 %v5199_v20  ;;  %4067 = vtanh.f32 %v1198_v45  ;;  %v5280_v20 = vor.u32 %v3899_v14, %v3637_v42  ;;  %v3675_v14 = vld [vmem:[#allocation12 + $0x80] sm:$0xf]  ;;  %v3613_v42 = vld [vmem:[#allocation12 + $0x8] sm:$0xf0] }
 0x33f   : > { %v2042_v22 = vsub.f32 %v2032_v57, %v2038_v24  ;;  %v2043_v41 = vsub.f32 %v2033_v21, %v2039_v12  ;;  %v5249_v21 = vor.u32 %v3903_v56, %v3653_v62  ;;  %v3918_v57 = vld [vmem:[#allocation12 + $0xc4] sm:$0xf0]  ;;  %v3917_v24 = vld [vmem:[#allocation12 + $0xc4] sm:$0xf]  ;;  %v3709_v12 = vld [vmem:[#allocation12 + $0xc8] sm:$0xf0]  ;;  %v2108_v60 = vpack.c.b16 %v2106_v29, %v2104_v58 }
 0x340   : > { %v5258_v48 = vor.u32 %v3918_v57, %v3707_v53  ;;  %v2109_v31 = vpack.c.b16 %v2107_v4, %v2105_v2  ;;  %4069 = vtanh.f32 %v4934_v39  ;;  %v5284_v30 = vpop.eup %4063  ;;  %v5290_v56 = vor.u32 %v3898_v51, %v3627_v15  ;;  %v3895_v53 = vld [vmem:[#allocation12 + $0x14] sm:$0xf]  ;;  %v3910_v58 = vld [vmem:[#allocation12 + $0x84] sm:$0xf0]  ;;  %v3893_v2 = vld [vmem:[#allocation12 + $0x4] sm:$0xf] }
 0x341   : > { %v2044_v54 = vpack.c.bf16 %v2042_v22, %v2040_v17  ;;  %v2045_v19 = vpack.c.bf16 %v2043_v41, %v2041_v40  ;;  %v3900_v17 = vld [vmem:[#allocation12 + $0x34] sm:$0xf0]  ;;  %v5266_v22 = vor.u32 %v3917_v24, %v3709_v12  ;;  %v3699_v40 = vld [vmem:[#allocation12 + $0xb0] sm:$0xf]  ;;  %v5286_v39 = vpop.eup %4065  ;;  %v5292_v62 = vor.u32 %v3914_v52, %v3691_v27  ;;  %v3685_v24 = vld [vmem:[#allocation12 + $0x98] sm:$0xf0] }
 0x342   : > { %v3916_v41 = vld [vmem:[#allocation12 + $0xb4] sm:$0xf0]  ;;  %v5271_v23 = vor.u32 %v3900_v17, %v3635_v5  ;;  %v5314_v29 = vor.u32 %v3896_v47, %v3619_v46  ;;  %v5316_v4 = vor.u32 %v3912_v18, %v3683_v28  ;;  %v3611_v5 = vld [vmem:[#allocation12] sm:$0xf]  ;;  %v3894_v17 = vld [vmem:[#allocation12 + $0x4] sm:$0xf0]  ;;  %v5330_v51 = vor.u32 %v3910_v58, %v3675_v14 }
 0x343   : > { %2054 = vmatmul.bf16.vlgmr.msra.gmra.mxu2 %v2044_v54  ;;  %2068 = vmatmul.bf16.vlgmr.msra.gmra.mxu3 %v2045_v19  ;;  %v5275_v50 = vor.u32 %v3916_v41, %v3699_v40  ;;  %v5320_v40 = vor.u32 %v3895_v53, %v3621_v61  ;;  %v5322_v41 = vor.u32 %v3911_v8, %v3685_v24 }
 0x344   : > { %2082 = vmatmul.bf16.vlgmr.msrb.gmra.mxu0 %v2044_v54  ;;  %2096 = vmatmul.bf16.vlgmr.msrb.gmra.mxu1 %v2045_v19  ;;  %v3915_v54 = vld [vmem:[#allocation12 + $0xb4] sm:$0xf]  ;;  %v3701_v19 = vld [vmem:[#allocation12 + $0xb8] sm:$0xf0]  ;;  %v5294_v3 = vpop.eup %4067  ;;  %v5328_v15 = vor.u32 %v3894_v17, %v3611_v5  ;;  %v5336_v37 = vor.u32 %v3893_v2, %v3613_v42 }
 0x345   : > { %2424 = vmatpush.bf16.msra.mxu2 %v5214_v32  ;;  %2438 = vmatpush.bf16.msra.mxu3 %v5216_v10  ;;  %v5282_v16 = vor.u32 %v3915_v54, %v3701_v19  ;;  %v5304_v57 = vpack.c.bf16 %v5294_v3, %v5284_v30  ;;  %v3909_v54 = vld [vmem:[#allocation12 + $0x84] sm:$0xf]  ;;  %v3677_v19 = vld [vmem:[#allocation12 + $0x88] sm:$0xf0] }
 0x346   : > { %2452 = vmatpush.bf16.msrb.mxu0 %v5218_v6  ;;  %2466 = vmatpush.bf16.msrb.mxu1 %v5220_v43  ;;  %v5306_v12 = vpop.eup %4069  ;;  %v5338_v33 = vor.u32 %v3909_v54, %v3677_v19 }
 0x347   : > { %v5310_v45 = vpack.c.bf16 %v5306_v12, %v5286_v39  ;;  %v2484_v53 = vunpack.c.l.b16 %v5304_v57  ;;  %v2485_v61 = vunpack.c.h.b16 %v5304_v57 }
 0x349   : > { %2425 = vmatpush.bf16.msra.mxu2 %v5224_v9  ;;  %2439 = vmatpush.bf16.msra.mxu3 %v5226_v26  ;;  %v2222_v27 = vunpack.c.l.bf16 %v5310_v45  ;;  %v2223_v52 = vunpack.c.h.bf16 %v5310_v45  ;;  %v2482_v8 = vunpack.c.l.b16 %v5310_v45  ;;  %v2483_v24 = vunpack.c.h.b16 %v5310_v45 }
 0x34a   : > { %2453 = vmatpush.bf16.msrb.mxu0 %v5233_v1  ;;  %2467 = vmatpush.bf16.msrb.mxu1 %v5235_v44 }
 0x34b   : > { %v2226_v46 = vsub.f32 %v5286_v39, %v2222_v27  ;;  %v2227_v47 = vsub.f32 %v5306_v12, %v2223_v52  ;;  %v2486_v5 = vpack.c.b16 %v2484_v53, %v2482_v8  ;;  %v2487_v17 = vpack.c.b16 %v2485_v61, %v2483_v24 }
 0x34d   : > { %2426 = vmatpush.bf16.msra.mxu2 %v5242_v35  ;;  %2440 = vmatpush.bf16.msra.mxu3 %v5244_v63 }
 0x34e   : > { %2454 = vmatpush.bf16.msrb.mxu0 %v5249_v21  ;;  %2468 = vmatpush.bf16.msrb.mxu1 %v5251_v11 }
 0x351   : > { %2427 = vmatpush.bf16.msra.mxu2 %v5256_v0  ;;  %2441 = vmatpush.bf16.msra.mxu3 %v5258_v48 }
 0x352   : > { %2455 = vmatpush.bf16.msrb.mxu0 %v5264_v59  ;;  %2469 = vmatpush.bf16.msrb.mxu1 %v5266_v22 }
 0x353   : > { %2120 = vmatmul.bf16.vlgmr.msrb.gmra.mxu2 %v2108_v60  ;;  %2134 = vmatmul.bf16.vlgmr.msrb.gmra.mxu3 %v2109_v31 }
 0x354   : > { %2148 = vmatmul.bf16.vlgmr.msra.gmra.mxu0 %v2108_v60  ;;  %2162 = vmatmul.bf16.vlgmr.msra.gmra.mxu1 %v2109_v31  ;;  %v2224_v60 = vunpack.c.l.bf16 %v5304_v57  ;;  %v2225_v31 = vunpack.c.h.bf16 %v5304_v57 }
 0x355   : > { %2428 = vmatpush.bf16.msra.mxu2 %v5271_v23  ;;  %2442 = vmatpush.bf16.msra.mxu3 %v5275_v50 }
 0x356   : > { %2456 = vmatpush.bf16.msrb.mxu0 %v5280_v20  ;;  %2470 = vmatpush.bf16.msrb.mxu1 %v5282_v16  ;;  %v2228_v38 = vsub.f32 %v5284_v30, %v2224_v60  ;;  %v2229_v49 = vsub.f32 %v5294_v3, %v2225_v31 }
 0x358   : > { %v2230_v28 = vpack.c.bf16 %v2228_v38, %v2226_v46  ;;  %v2231_v18 = vpack.c.bf16 %v2229_v49, %v2227_v47 }
 0x359   : > { %2429 = vmatpush.bf16.msra.mxu2 %v5290_v56  ;;  %2443 = vmatpush.bf16.msra.mxu3 %v5292_v62 }
 0x35a   : > { %2457 = vmatpush.bf16.msrb.mxu0 %v5298_v7  ;;  %2471 = vmatpush.bf16.msrb.mxu1 %v5300_v13 }
 0x35d   : > { %2430 = vmatpush.bf16.msra.mxu2 %v5314_v29  ;;  %2444 = vmatpush.bf16.msra.mxu3 %v5316_v4 }
 0x35e   : > { %2458 = vmatpush.bf16.msrb.mxu0 %v5320_v40  ;;  %2472 = vmatpush.bf16.msrb.mxu1 %v5322_v41 }
 0x361   : > { %2431 = vmatpush.bf16.msra.mxu2 %v5328_v15  ;;  %2445 = vmatpush.bf16.msra.mxu3 %v5330_v51 }
 0x362   : > { %2459 = vmatpush.bf16.msrb.mxu0 %v5336_v37  ;;  %2473 = vmatpush.bf16.msrb.mxu1 %v5338_v33 }
 0x364   : > { %2432 = vmatmul.bf16.vlgmr.msra.gmra.mxu2 %v2230_v28  ;;  %2446 = vmatmul.bf16.vlgmr.msra.gmra.mxu3 %v2231_v18 }
 0x365   : > { %2490 = vmatpush.bf16.msrb.mxu2 %v5214_v32  ;;  %2504 = vmatpush.bf16.msrb.mxu3 %v5216_v10 }
 0x366   : > { %2518 = vmatpush.bf16.msra.mxu0 %v5218_v6  ;;  %2532 = vmatpush.bf16.msra.mxu1 %v5220_v43 }
 0x367   : > { %2460 = vmatmul.bf16.vlgmr.msrb.gmra.mxu0 %v2230_v28  ;;  %2474 = vmatmul.bf16.vlgmr.msrb.gmra.mxu1 %v2231_v18 }
 0x369   : > { %2491 = vmatpush.bf16.msrb.mxu2 %v5224_v9  ;;  %2505 = vmatpush.bf16.msrb.mxu3 %v5226_v26 }
 0x36a   : > { %2519 = vmatpush.bf16.msra.mxu0 %v5233_v1  ;;  %2533 = vmatpush.bf16.msra.mxu1 %v5235_v44 }
 0x36d   : > { %2492 = vmatpush.bf16.msrb.mxu2 %v5242_v35  ;;  %2506 = vmatpush.bf16.msrb.mxu3 %v5244_v63 }
 0x36e   : > { %2520 = vmatpush.bf16.msra.mxu0 %v5249_v21  ;;  %2534 = vmatpush.bf16.msra.mxu1 %v5251_v11 }
 0x371   : > { %2493 = vmatpush.bf16.msrb.mxu2 %v5256_v0  ;;  %2507 = vmatpush.bf16.msrb.mxu3 %v5258_v48 }
 0x372   : > { %2521 = vmatpush.bf16.msra.mxu0 %v5264_v59  ;;  %2535 = vmatpush.bf16.msra.mxu1 %v5266_v22 }
 0x375   : > { %2494 = vmatpush.bf16.msrb.mxu2 %v5271_v23  ;;  %2508 = vmatpush.bf16.msrb.mxu3 %v5275_v50 }
 0x376   : > { %2522 = vmatpush.bf16.msra.mxu0 %v5280_v20  ;;  %2536 = vmatpush.bf16.msra.mxu1 %v5282_v16 }
 0x379   : > { %2495 = vmatpush.bf16.msrb.mxu2 %v5290_v56  ;;  %2509 = vmatpush.bf16.msrb.mxu3 %v5292_v62 }
 0x37a   : > { %2523 = vmatpush.bf16.msra.mxu0 %v5298_v7  ;;  %2537 = vmatpush.bf16.msra.mxu1 %v5300_v13 }
 0x37d   : > { %2496 = vmatpush.bf16.msrb.mxu2 %v5314_v29  ;;  %2510 = vmatpush.bf16.msrb.mxu3 %v5316_v4 }
 0x37e   : > { %2524 = vmatpush.bf16.msra.mxu0 %v5320_v40  ;;  %2538 = vmatpush.bf16.msra.mxu1 %v5322_v41 }
 0x381   : > { %2497 = vmatpush.bf16.msrb.mxu2 %v5328_v15  ;;  %2511 = vmatpush.bf16.msrb.mxu3 %v5330_v51 }
 0x382   : > { %2525 = vmatpush.bf16.msra.mxu0 %v5336_v37  ;;  %2539 = vmatpush.bf16.msra.mxu1 %v5338_v33 }
 0x384   : > { %2498 = vmatmul.bf16.vlgmr.msrb.gmra.mxu2 %v2486_v5  ;;  %2512 = vmatmul.bf16.vlgmr.msrb.gmra.mxu3 %v2487_v17 }
 0x385   : > { %2566 = vmatpush.bf16.msra.mxu2 %v5214_v32  ;;  %2580 = vmatpush.bf16.msra.mxu3 %v5216_v10 }
 0x386   : > { %2526 = vmatmul.bf16.vlgmr.msra.gmra.mxu0 %v2486_v5  ;;  %2540 = vmatmul.bf16.vlgmr.msra.gmra.mxu1 %v2487_v17 }
 0x387   : > { %2594 = vmatpush.bf16.msrb.mxu0 %v5218_v6  ;;  %2608 = vmatpush.bf16.msrb.mxu1 %v5220_v43 }
 0x389   : > { %2567 = vmatpush.bf16.msra.mxu2 %v5224_v9  ;;  %2581 = vmatpush.bf16.msra.mxu3 %v5226_v26 }
 0x38b   : > { %2595 = vmatpush.bf16.msrb.mxu0 %v5233_v1  ;;  %2609 = vmatpush.bf16.msrb.mxu1 %v5235_v44 }
 0x38d   : > { %2568 = vmatpush.bf16.msra.mxu2 %v5242_v35  ;;  %2582 = vmatpush.bf16.msra.mxu3 %v5244_v63 }
 0x38f   : > { %2596 = vmatpush.bf16.msrb.mxu0 %v5249_v21  ;;  %2610 = vmatpush.bf16.msrb.mxu1 %v5251_v11 }
 0x391   : > { %2569 = vmatpush.bf16.msra.mxu2 %v5256_v0  ;;  %2583 = vmatpush.bf16.msra.mxu3 %v5258_v48 }
 0x393   : > { %2597 = vmatpush.bf16.msrb.mxu0 %v5264_v59  ;;  %2611 = vmatpush.bf16.msrb.mxu1 %v5266_v22 }
 0x395   : > { %2570 = vmatpush.bf16.msra.mxu2 %v5271_v23  ;;  %2584 = vmatpush.bf16.msra.mxu3 %v5275_v50 }
 0x397   : > { %2598 = vmatpush.bf16.msrb.mxu0 %v5280_v20  ;;  %2612 = vmatpush.bf16.msrb.mxu1 %v5282_v16 }
 0x399   : > { %2571 = vmatpush.bf16.msra.mxu2 %v5290_v56  ;;  %2585 = vmatpush.bf16.msra.mxu3 %v5292_v62 }
 0x39b   : > { %2599 = vmatpush.bf16.msrb.mxu0 %v5298_v7  ;;  %2613 = vmatpush.bf16.msrb.mxu1 %v5300_v13 }
 0x39d   : > { %2572 = vmatpush.bf16.msra.mxu2 %v5314_v29  ;;  %2586 = vmatpush.bf16.msra.mxu3 %v5316_v4 }
 0x39f   : > { %2600 = vmatpush.bf16.msrb.mxu0 %v5320_v40  ;;  %2614 = vmatpush.bf16.msrb.mxu1 %v5322_v41 }
 0x3a1   : > { %2573 = vmatpush.bf16.msra.mxu2 %v5328_v15  ;;  %2587 = vmatpush.bf16.msra.mxu3 %v5330_v51 }
 0x3a3   : > { %2601 = vmatpush.bf16.msrb.mxu0 %v5336_v37  ;;  %2615 = vmatpush.bf16.msrb.mxu1 %v5338_v33 }
 0x3a5   : > { %2632 = vmatpush.bf16.msrb.mxu2 %v5214_v32  ;;  %2646 = vmatpush.bf16.msrb.mxu3 %v5216_v10 }
 0x3a7   : > { %2660 = vmatpush.bf16.msra.mxu0 %v5218_v6  ;;  %2674 = vmatpush.bf16.msra.mxu1 %v5220_v43 }
 0x3a9   : > { %2633 = vmatpush.bf16.msrb.mxu2 %v5224_v9  ;;  %2647 = vmatpush.bf16.msrb.mxu3 %v5226_v26 }
 0x3ab   : > { %2661 = vmatpush.bf16.msra.mxu0 %v5233_v1  ;;  %2675 = vmatpush.bf16.msra.mxu1 %v5235_v44 }
 0x3ad   : > { %2634 = vmatpush.bf16.msrb.mxu2 %v5242_v35  ;;  %2648 = vmatpush.bf16.msrb.mxu3 %v5244_v63 }
 0x3af   : > { %2662 = vmatpush.bf16.msra.mxu0 %v5249_v21  ;;  %2676 = vmatpush.bf16.msra.mxu1 %v5251_v11 }
 0x3b1   : > { %2635 = vmatpush.bf16.msrb.mxu2 %v5256_v0  ;;  %2649 = vmatpush.bf16.msrb.mxu3 %v5258_v48 }
 0x3b3   : > { %2663 = vmatpush.bf16.msra.mxu0 %v5264_v59  ;;  %2677 = vmatpush.bf16.msra.mxu1 %v5266_v22 }
 0x3b5   : > { %2636 = vmatpush.bf16.msrb.mxu2 %v5271_v23  ;;  %2650 = vmatpush.bf16.msrb.mxu3 %v5275_v50 }
 0x3b7   : > { %2664 = vmatpush.bf16.msra.mxu0 %v5280_v20  ;;  %2678 = vmatpush.bf16.msra.mxu1 %v5282_v16 }
 0x3b9   : > { %2637 = vmatpush.bf16.msrb.mxu2 %v5290_v56  ;;  %2651 = vmatpush.bf16.msrb.mxu3 %v5292_v62 }
 0x3bb   : > { %2665 = vmatpush.bf16.msra.mxu0 %v5298_v7  ;;  %2679 = vmatpush.bf16.msra.mxu1 %v5300_v13 }
 0x3bd   : > { %2638 = vmatpush.bf16.msrb.mxu2 %v5314_v29  ;;  %2652 = vmatpush.bf16.msrb.mxu3 %v5316_v4 }
 0x3bf   : > { %2666 = vmatpush.bf16.msra.mxu0 %v5320_v40  ;;  %2680 = vmatpush.bf16.msra.mxu1 %v5322_v41 }
 0x3c1   : > { %2639 = vmatpush.bf16.msrb.mxu2 %v5328_v15  ;;  %2653 = vmatpush.bf16.msrb.mxu3 %v5330_v51  ;;  %v2083_v32 = vpop.f32.mrf.mxu0  ;;  %v2097_v10 = vpop.f32.mrf.mxu1 }
 0x3c2   : > { %v2098_v35 = vadd.f32 %v2097_v10, %v2083_v32 }
 0x3c3   : > { %2667 = vmatpush.bf16.msra.mxu0 %v5336_v37  ;;  %2681 = vmatpush.bf16.msra.mxu1 %v5338_v33 }
 0x3c6   : > { %v2055_v6 = vpop.f32.mrf.mxu2  ;;  %v2069_v43 = vpop.f32.mrf.mxu3 }
 0x3c7   : > { %v2070_v48 = vadd.f32 %v2069_v43, %v2055_v6 }
 0x3c9   : > { %v2085_v9 = vpop.f32.mrf.mxu0  ;;  %v2099_v26 = vpop.f32.mrf.mxu1 }
 0x3ca   : > { %v2100_v20 = vadd.f32 %v2099_v26, %v2085_v9 }
 0x3ce   : > { %v2057_v1 = vpop.f32.mrf.mxu2  ;;  %v2071_v44 = vpop.f32.mrf.mxu3 }
 0x3cf   : > { %v2072_v45 = vadd.f32 %v2071_v44, %v2057_v1 }
 0x3d1   : > { %v2149_v63 = vpop.f32.mrf.mxu0  ;;  %v2163_v21 = vpop.f32.mrf.mxu1 }
 0x3d2   : > { %v2150_v11 = vadd.f32 %v2149_v63, %v2098_v35 }
 0x3d4   : > { %v2164_v0 = vadd.f32 %v2163_v21, %v2150_v11 }
 0x3d6   : > { %v2169_v59 = vadd.f32 1e-05, %v2164_v0  ;;  %v2121_v22 = vpop.f32.mrf.mxu2  ;;  %v2135_v23 = vpop.f32.mrf.mxu3 }
 0x3d7   : > { %v2122_v50 = vadd.f32 %v2121_v22, %v2070_v48 }
 0x3d8   : > { %4071 = vrsqrt.f32 %v2169_v59  ;;  %vm2188_vm0 = vweird.f32 %v2169_v59 }
 0x3d9   : > { %v2136_v16 = vadd.f32 %v2135_v23, %v2122_v50  ;;  %v2151_v56 = vpop.f32.mrf.mxu0  ;;  %v2165_v13 = vpop.f32.mrf.mxu1 }
 0x3da   : > { %v2152_v62 = vadd.f32 %v2151_v56, %v2100_v20 }
 0x3db   : > { %v2168_v7 = vadd.f32 1e-05, %v2136_v16 }
 0x3dc   : > { %v2166_v57 = vadd.f32 %v2165_v13, %v2152_v62 }
 0x3dd   : > { %4073 = vrsqrt.f32 %v2168_v7  ;;  %vm2178_vm3 = vweird.f32 %v2168_v7 }
 0x3de   : > { %v4072_v29 = vpop.eup %4071  ;;  %v2171_v4 = vadd.f32 1e-05, %v2166_v57  ;;  %v2123_v40 = vpop.f32.mrf.mxu2 }
 0x3df   : > { %v2183_v41 = vmul.f32 %v4072_v29, %v2169_v59  ;;  %v2124_v14 = vadd.f32 %v2123_v40, %v2072_v45  ;;  %v2137_v58 = vpop.f32.mrf.mxu3  ;;  %vm2189_vm15 = vweird.f32 %v4072_v29 }
 0x3e0   : > { %4075 = vrsqrt.f32 %v2171_v4  ;;  %vm2190_vm2 = vmor %vm2188_vm0, %vm2189_vm15  ;;  %vm2208_vm6 = vweird.f32 %v2171_v4 }
 0x3e1   : > { %v2184_v2 = vmul.f32 %v4072_v29, %v2183_v41  ;;  %v2138_v42 = vadd.f32 %v2137_v58, %v2124_v14 }
 0x3e3   : > { %v4074_v54 = vpop.eup %4073  ;;  %v2185_v19 = vmul.f32 0.5, %v2184_v2  ;;  %v2170_v60 = vadd.f32 1e-05, %v2138_v42 }
 0x3e4   : > { %v2173_v31 = vmul.f32 %v4074_v54, %v2168_v7  ;;  %vm2179_vm1 = vweird.f32 %v4074_v54  ;;  %v2461_v5 = vpop.f32.mrf.mxu0  ;;  %v2475_v10 = vpop.f32.mrf.mxu1 }
 0x3e5   : > { %v2186_v15 = vsub.f32 1.5, %v2185_v19  ;;  %4077 = vrsqrt.f32 %v2170_v60  ;;  %vm2180_vm4 = vmor %vm2178_vm3, %vm2179_vm1  ;;  %vm2198_vm9 = vweird.f32 %v2170_v60  ;;  %v2476_v20 = vadd.f32 %v2475_v10, %v2461_v5 }
 0x3e6   : > { %v4076_v51 = vpop.eup %4075  ;;  %v2174_v27 = vmul.f32 %v4074_v54, %v2173_v31 }
 0x3e7   : > { %v2203_v52 = vmul.f32 %v4076_v51, %v2171_v4  ;;  %v2187_v37 = vmul.f32 %v4072_v29, %v2186_v15  ;;  %vm2209_vm5 = vweird.f32 %v4076_v51  ;;  %v2433_v1 = vpop.f32.mrf.mxu2  ;;  %v2447_v44 = vpop.f32.mrf.mxu3 }
 0x3e8   : > { %v2175_v33 = vmul.f32 0.5, %v2174_v27  ;;  %vm2210_vm8 = vmor %vm2208_vm6, %vm2209_vm5  ;;  %v2448_v16 = vadd.f32 %v2447_v44, %v2433_v1 }
 0x3e9   : > { %v2204_v38 = vmul.f32 %v4076_v51, %v2203_v52  ;;  %v2191_v28 = vsel %vm2190_vm2, %v4072_v29, %v2187_v37 }
 0x3ea   : > { %v2176_v49 = vsub.f32 1.5, %v2175_v33  ;;  %v2213_v17 = vmul.f32 %v2191_v28, %v5190_v34 }
 0x3eb   : > { %v4078_v46 = vpop.eup %4077  ;;  %v2205_v47 = vmul.f32 0.5, %v2204_v38 }
 0x3ec   : > { %v2177_v18 = vmul.f32 %v4074_v54, %v2176_v49  ;;  %v2193_v53 = vmul.f32 %v4078_v46, %v2170_v60  ;;  %vm2199_vm7 = vweird.f32 %v4078_v46  ;;  %v2463_v11 = vpop.f32.mrf.mxu0  ;;  %v2477_v48 = vpop.f32.mrf.mxu1 }
 0x3ed   : > { %v2206_v61 = vsub.f32 1.5, %v2205_v47  ;;  %vm2200_vm10 = vmor %vm2198_vm9, %vm2199_vm7  ;;  %v2478_v57 = vadd.f32 %v2477_v48, %v2463_v11 }
 0x3ee   : > { %v2181_v8 = vsel %vm2180_vm4, %v4074_v54, %v2177_v18  ;;  %v2194_v24 = vmul.f32 %v4078_v46, %v2193_v53 }
 0x3ef   : > { %v2212_v32 = vmul.f32 %v2181_v8, %v5187_v55  ;;  %v2207_v6 = vmul.f32 %v4076_v51, %v2206_v61  ;;  %v2435_v59 = vpop.f32.mrf.mxu2  ;;  %v2449_v22 = vpop.f32.mrf.mxu3 }
 0x3f0   : > { %v2195_v43 = vmul.f32 0.5, %v2194_v24  ;;  %v2450_v41 = vadd.f32 %v2449_v22, %v2435_v59 }
 0x3f1   : > { %v2216_v9 = vpack.c.bf16 %v2213_v17, %v2212_v32  ;;  %v2211_v35 = vsel %vm2210_vm8, %v4076_v51, %v2207_v6 }
 0x3f2   : > { %v2196_v26 = vsub.f32 1.5, %v2195_v43  ;;  %v2215_v55 = vmul.f32 %v2211_v35, %v5197_v36 }
 0x3f3   : > { %2218 = vst [vmem:[%s4629_s8] sm:$0xff] %v2216_v9 }
 0x3f4   : > { %v2197_v63 = vmul.f32 %v4078_v46, %v2196_v26 }
 0x3f6   : > { %v2201_v34 = vsel %vm2200_vm10, %v4078_v46, %v2197_v63 }
 0x3f7   : > { %v2214_v21 = vmul.f32 %v2201_v34, %v5202_v25 }
 0x3f9   : > { %v2217_v0 = vpack.c.bf16 %v2215_v55, %v2214_v21 }
 0x3fb   : > { %2219 = vst [vmem:[%s4629_s8 + $0x8] sm:$0xff] %v2217_v0 }
 0x403   : > { %v2527_v23 = vpop.f32.mrf.mxu0  ;;  %v2541_v50 = vpop.f32.mrf.mxu1 }
 0x404   : > { %v2528_v56 = vadd.f32 %v2527_v23, %v2476_v20 }
 0x406   : > { %v2542_v45 = vadd.f32 %v2541_v50, %v2528_v56 }
 0x407   : > { %v2499_v62 = vpop.f32.mrf.mxu2  ;;  %v2513_v7 = vpop.f32.mrf.mxu3 }
 0x408   : > { %v2500_v13 = vadd.f32 %v2499_v62, %v2448_v16  ;;  %v5458_v14 = vsub.f32 %v5306_v12, %v2542_v45 }
 0x40a   : > { %v2514_v29 = vadd.f32 %v2513_v7, %v2500_v13  ;;  %v2551_v60 = vmul.f32 %v5458_v14, %v5458_v14 }
 0x40b   : > { %v2529_v36 = vpop.f32.mrf.mxu0  ;;  %v2543_v40 = vpop.f32.mrf.mxu1 }
 0x40c   : > { %v2530_v4 = vadd.f32 %v2529_v36, %v2478_v57  ;;  %v5455_v25 = vsub.f32 %v5286_v39, %v2514_v29 }
 0x40e   : > { %v2544_v58 = vadd.f32 %v2543_v40, %v2530_v4  ;;  %v2550_v42 = vmul.f32 %v5455_v25, %v5455_v25 }
 0x40f   : > { %v2501_v2 = vpop.f32.mrf.mxu2  ;;  %v2515_v19 = vpop.f32.mrf.mxu3 }
 0x410   : > { %v2502_v54 = vadd.f32 %v2501_v2, %v2450_v41  ;;  %v5465_v31 = vsub.f32 %v5294_v3, %v2544_v58  ;;  %v2554_v15 = vpack.c.bf16 %v2551_v60, %v2550_v42 }
 0x412   : > { %v2516_v39 = vadd.f32 %v2515_v19, %v2502_v54  ;;  %v2553_v12 = vmul.f32 %v5465_v31, %v5465_v31  ;;  %v2556_v52 = vunpack.c.l.bf16 %v2554_v15  ;;  %v2557_v37 = vunpack.c.h.bf16 %v2554_v15 }
 0x413   : > { %v2624_v8 = vunpack.c.l.b16 %v2554_v15  ;;  %v2625_v24 = vunpack.c.h.b16 %v2554_v15 }
 0x414   : > { %v5468_v51 = vsub.f32 %v5284_v30, %v2516_v39  ;;  %v2560_v46 = vsub.f32 %v2550_v42, %v2556_v52  ;;  %v2561_v3 = vsub.f32 %v2551_v60, %v2557_v37 }
 0x416   : > { %v2552_v27 = vmul.f32 %v5468_v51, %v5468_v51 }
 0x418   : > { %v2555_v33 = vpack.c.bf16 %v2553_v12, %v2552_v27 }
 0x41a   : > { %v2558_v38 = vunpack.c.l.bf16 %v2555_v33  ;;  %v2559_v49 = vunpack.c.h.bf16 %v2555_v33  ;;  %v2626_v30 = vunpack.c.l.b16 %v2555_v33  ;;  %v2627_v61 = vunpack.c.h.b16 %v2555_v33 }
 0x41c   : > { %v2562_v47 = vsub.f32 %v2552_v27, %v2558_v38  ;;  %v2563_v28 = vsub.f32 %v2553_v12, %v2559_v49  ;;  %v2628_v5 = vpack.c.b16 %v2626_v30, %v2624_v8  ;;  %v2629_v17 = vpack.c.b16 %v2627_v61, %v2625_v24 }
 0x41e   : > { %v2564_v18 = vpack.c.bf16 %v2562_v47, %v2560_v46  ;;  %v2565_v53 = vpack.c.bf16 %v2563_v28, %v2561_v3 }
 0x420   : > { %2574 = vmatmul.bf16.vlgmr.msra.gmra.mxu2 %v2564_v18  ;;  %2588 = vmatmul.bf16.vlgmr.msra.gmra.mxu3 %v2565_v53 }
 0x421   : > { %2602 = vmatmul.bf16.vlgmr.msrb.gmra.mxu0 %v2564_v18  ;;  %2616 = vmatmul.bf16.vlgmr.msrb.gmra.mxu1 %v2565_v53 }
 0x430   : > { %2640 = vmatmul.bf16.vlgmr.msrb.gmra.mxu2 %v2628_v5  ;;  %2654 = vmatmul.bf16.vlgmr.msrb.gmra.mxu3 %v2629_v17 }
 0x431   : > { %2668 = vmatmul.bf16.vlgmr.msra.gmra.mxu0 %v2628_v5  ;;  %2682 = vmatmul.bf16.vlgmr.msra.gmra.mxu1 %v2629_v17 }
 0x49e   : > { %v2603_v32 = vpop.f32.mrf.mxu0  ;;  %v2617_v10 = vpop.f32.mrf.mxu1 }
 0x49f   : > { %v2618_v35 = vadd.f32 %v2617_v10, %v2603_v32 }
 0x4a3   : > { %v2575_v6 = vpop.f32.mrf.mxu2  ;;  %v2589_v43 = vpop.f32.mrf.mxu3 }
 0x4a4   : > { %v2590_v11 = vadd.f32 %v2589_v43, %v2575_v6 }
 0x4a6   : > { %v2605_v9 = vpop.f32.mrf.mxu0  ;;  %v2619_v26 = vpop.f32.mrf.mxu1 }
 0x4a7   : > { %v2620_v23 = vadd.f32 %v2619_v26, %v2605_v9 }
 0x4ab   : > { %v2577_v1 = vpop.f32.mrf.mxu2  ;;  %v2591_v44 = vpop.f32.mrf.mxu3 }
 0x4ac   : > { %v2592_v13 = vadd.f32 %v2591_v44, %v2577_v1 }
 0x4ae   : > { %v2669_v63 = vpop.f32.mrf.mxu0  ;;  %v2683_v34 = vpop.f32.mrf.mxu1 }
 0x4af   : > { %v2670_v55 = vadd.f32 %v2669_v63, %v2618_v35 }
 0x4b1   : > { %v2684_v21 = vadd.f32 %v2683_v34, %v2670_v55 }
 0x4b3   : > { %v2689_v0 = vadd.f32 1e-05, %v2684_v21  ;;  %v2641_v48 = vpop.f32.mrf.mxu2  ;;  %v2655_v59 = vpop.f32.mrf.mxu3 }
 0x4b4   : > { %v2642_v22 = vadd.f32 %v2641_v48, %v2590_v11 }
 0x4b5   : > { %4079 = vrsqrt.f32 %v2689_v0  ;;  %vm2708_vm12 = vweird.f32 %v2689_v0 }
 0x4b6   : > { %v2656_v50 = vadd.f32 %v2655_v59, %v2642_v22  ;;  %v2671_v20 = vpop.f32.mrf.mxu0  ;;  %v2685_v62 = vpop.f32.mrf.mxu1 }
 0x4b7   : > { %v2672_v16 = vadd.f32 %v2671_v20, %v2620_v23 }
 0x4b8   : > { %v2688_v56 = vadd.f32 1e-05, %v2656_v50 }
 0x4b9   : > { %v2686_v7 = vadd.f32 %v2685_v62, %v2672_v16 }
 0x4ba   : > { %4081 = vrsqrt.f32 %v2688_v56  ;;  %vm2698_vm15 = vweird.f32 %v2688_v56 }
 0x4bb   : > { %v4080_v57 = vpop.eup %4079  ;;  %v2691_v45 = vadd.f32 1e-05, %v2686_v7  ;;  %v2643_v29 = vpop.f32.mrf.mxu2 }
 0x4bc   : > { %v2703_v36 = vmul.f32 %v4080_v57, %v2689_v0  ;;  %v2644_v4 = vadd.f32 %v2643_v29, %v2592_v13  ;;  %v2657_v40 = vpop.f32.mrf.mxu3  ;;  %vm2709_vm11 = vweird.f32 %v4080_v57 }
 0x4bd   : > { %4083 = vrsqrt.f32 %v2691_v45  ;;  %vm2710_vm14 = vmor %vm2708_vm12, %vm2709_vm11  ;;  %vm2728_vm2 = vweird.f32 %v2691_v45 }
 0x4be   : > { %v2704_v41 = vmul.f32 %v4080_v57, %v2703_v36  ;;  %v2658_v58 = vadd.f32 %v2657_v40, %v2644_v4 }
 0x4c0   : > { %v4082_v2 = vpop.eup %4081  ;;  %v2705_v42 = vmul.f32 0.5, %v2704_v41  ;;  %v2690_v54 = vadd.f32 1e-05, %v2658_v58 }
 0x4c1   : > { %v2693_v19 = vmul.f32 %v4082_v2, %v2688_v56  ;;  %vm2699_vm13 = vweird.f32 %v4082_v2 }
 0x4c2   : > { %v2706_v60 = vsub.f32 1.5, %v2705_v42  ;;  %4085 = vrsqrt.f32 %v2690_v54  ;;  %vm2700_vm0 = vmor %vm2698_vm15, %vm2699_vm13  ;;  %vm2718_vm5 = vweird.f32 %v2690_v54 }
 0x4c3   : > { %v4084_v39 = vpop.eup %4083  ;;  %v2694_v15 = vmul.f32 %v4082_v2, %v2693_v19 }
 0x4c4   : > { %v2723_v12 = vmul.f32 %v4084_v39, %v2691_v45  ;;  %v2707_v27 = vmul.f32 %v4080_v57, %v2706_v60  ;;  %vm2729_vm1 = vweird.f32 %v4084_v39 }
 0x4c5   : > { %v2695_v52 = vmul.f32 0.5, %v2694_v15  ;;  %vm2730_vm4 = vmor %vm2728_vm2, %vm2729_vm1 }
 0x4c6   : > { %v2724_v37 = vmul.f32 %v4084_v39, %v2723_v12  ;;  %v2711_v46 = vsel %vm2710_vm14, %v4080_v57, %v2707_v27 }
 0x4c7   : > { %v2696_v33 = vsub.f32 1.5, %v2695_v52  ;;  %v2733_v30 = vmul.f32 %v2711_v46, %v5458_v14 }
 0x4c8   : > { %v4086_v38 = vpop.eup %4085  ;;  %v2725_v49 = vmul.f32 0.5, %v2724_v37 }
 0x4c9   : > { %v2697_v47 = vmul.f32 %v4082_v2, %v2696_v33  ;;  %v2713_v3 = vmul.f32 %v4086_v38, %v2690_v54  ;;  %vm2719_vm3 = vweird.f32 %v4086_v38 }
 0x4ca   : > { %v2726_v28 = vsub.f32 1.5, %v2725_v49  ;;  %vm2720_vm6 = vmor %vm2718_vm5, %vm2719_vm3 }
 0x4cb   : > { %v2701_v18 = vsel %vm2700_vm0, %v4082_v2, %v2697_v47  ;;  %v2714_v53 = vmul.f32 %v4086_v38, %v2713_v3 }
 0x4cc   : > { %v2732_v61 = vmul.f32 %v2701_v18, %v5455_v25  ;;  %v2727_v8 = vmul.f32 %v4084_v39, %v2726_v28 }
 0x4cd   : > { %v2715_v24 = vmul.f32 0.5, %v2714_v53 }
 0x4ce   : > { %v2736_v5 = vpack.c.bf16 %v2733_v30, %v2732_v61  ;;  %v2731_v32 = vsel %vm2730_vm4, %v4084_v39, %v2727_v8 }
 0x4cf   : > { %v2716_v17 = vsub.f32 1.5, %v2715_v24  ;;  %v2735_v43 = vmul.f32 %v2731_v32, %v5465_v31 }
 0x4d0   : > { %2738 = vst [vmem:[%s4632_s28] sm:$0xff] %v2736_v5 }
 0x4d1   : > { %v2717_v10 = vmul.f32 %v4086_v38, %v2716_v17 }
 0x4d3   : > { %v2721_v6 = vsel %vm2720_vm6, %v4086_v38, %v2717_v10 }
 0x4d4   : > { %v2734_v14 = vmul.f32 %v2721_v6, %v5468_v51 }
 0x4d6   : > { %v2737_v25 = vpack.c.bf16 %v2735_v43, %v2734_v14 }
 0x4d8   : > { %2739 = vst [vmem:[%s4632_s28 + $0x8] sm:$0xff] %v2737_v25 }
 0x4d9 PF: > { %s2745_s2 = sand.u32 1, %s4507_s26   ;;  %s5482_s29 = sshll.u32 %s4393_s0, 4 }
 0x4da   : > { %s2785_s16 = scalar_lea.hbm %s5578_s10, %s5482_s29  ;;  %s2786_s4 = sshll.u32 %s4629_s8, 4  ;;  %s2787_s4 = int_to_ptr.vmem [resolvable:$true] %s2786_s4 }
 0x4db   : > { %s2788_s14 = sshll.u32 %s2785_s16, 4  ;;  %s5489_s30 = scalar_lea.sflag [#allocation15], %s2745_s2  ;;  %s2789_s14 = int_to_ptr.hbm [resolvable:$true] %s2788_s14 }
 0x4dc   : > { %s4263_s27 = sshra.s32 %s2789_s14, 4  ;;  %s4269_s18 = scalar_lea.hbm %s5578_s10, 32  ;;  %s4264_s27 = int_to_ptr.hbm [resolvable:$true] %s4263_s27 }
 0x4dd   : > { %s4265_s13 = scalar_lea.hbm %s4264_s27, 16  ;;  %p4270_p13 = scmp.lt.s32.totalorder %s4264_s27, %s5578_s10 }
 0x4de   : > { %p4266_p7 = scmp.ne.s32.totalorder %s4264_s27, %s4265_s13  ;;  %p4271_p0 = scmp.lt.s32.totalorder %s4269_s18, %s4265_s13 }
 0x4e0   : > { %p4267_p11 = pnand %p4266_p7, %p4580_p2  ;;  %p4272_p4 = por %p4271_p0, %p4270_p13 }
 0x4e2   : > { %p4268_p12 = pneg %p4267_p11 }
 0x4e4   : > { %p4273_p6 = pnand %p4272_p4, %p4268_p12 }
 0x4e6   : > { %4276 = shalt.err (!%p4273_p6)
}
 0x4e7   : > { %s5587_s8 = smov 128   ;;  %s4412_s2 = smov 8  }
 0x4e8   : > { %3947 = dma.vmem_to_hbm [thread:$0]  (%p4580_p2), %s2787_s4, 256, %s2789_s14, %s5489_s30, %s5587_s8, %s5587_s8, %s4412_s2  }
 0x4e9   : > { %s2765_s27 = scalar_lea.hbm %s5577_s9, %s5482_s29  ;;  %s2766_s13 = sshll.u32 %s4626_s6, 4  ;;  %s2767_s13 = int_to_ptr.vmem [resolvable:$true] %s2766_s13 }
 0x4ea   : > { %s2768_s0 = sshll.u32 %s2765_s27, 4  ;;  %s2741_s26 = scalar_lea.sflag [#allocation6], %s4603_s20  ;;  %s2769_s0 = int_to_ptr.hbm [resolvable:$true] %s2768_s0 }
 0x4eb   : > { %s4291_s18 = sshra.s32 %s2769_s0, 4  ;;  %s4297_s4 = scalar_lea.hbm %s5577_s9, 32  ;;  %s4292_s18 = int_to_ptr.hbm [resolvable:$true] %s4291_s18 }
 0x4ec   : > { %s4293_s15 = scalar_lea.hbm %s4292_s18, 16  ;;  %p4298_p1 = scmp.lt.s32.totalorder %s4292_s18, %s5577_s9 }
 0x4ed   : > { %p4294_p8 = scmp.ne.s32.totalorder %s4292_s18, %s4293_s15  ;;  %p4299_p7 = scmp.lt.s32.totalorder %s4297_s4, %s4293_s15 }
 0x4ef   : > { %p4295_p9 = pnand %p4294_p8, %p4580_p2  ;;  %p4300_p11 = por %p4299_p7, %p4298_p1 }
 0x4f1   : > { %p4296_p3 = pneg %p4295_p9 }
 0x4f3   : > { %p4301_p12 = pnand %p4300_p11, %p4296_p3 }
 0x4f5   : > { %4304 = shalt.err (!%p4301_p12)
}
 0x4f6   : > { %s5614_s20 = smov 128   ;;  %s2805_s12 = scalar_lea.hbm %s5579_s11, %s5482_s29 }
 0x4f7   : > { %3946 = dma.vmem_to_hbm [thread:$0]  (%p4580_p2), %s2767_s13, 256, %s2769_s0, %s2741_s26, %s5614_s20, %s5614_s20, %s4412_s2  }
 0x4f8   : > { %s2806_s16 = sshll.u32 %s4632_s28, 4  ;;  %s2808_s8 = sshll.u32 %s2805_s12, 4  ;;  %s2807_s16 = int_to_ptr.vmem [resolvable:$true] %s2806_s16  ;;  %s2809_s8 = int_to_ptr.hbm [resolvable:$true] %s2808_s8 }
 0x4f9   : > { %s4319_s27 = sshra.s32 %s2809_s8, 4  ;;  %s4325_s4 = scalar_lea.hbm %s5579_s11, 32  ;;  %s4320_s27 = int_to_ptr.hbm [resolvable:$true] %s4319_s27 }
 0x4fa   : > { %s4321_s18 = scalar_lea.hbm %s4320_s27, 16  ;;  %p4326_p6 = scmp.lt.s32.totalorder %s4320_s27, %s5579_s11 }
 0x4fb   : > { %p4322_p13 = scmp.ne.s32.totalorder %s4320_s27, %s4321_s18  ;;  %p4327_p8 = scmp.lt.s32.totalorder %s4325_s4, %s4321_s18 }
 0x4fd   : > { %p4323_p0 = pnand %p4322_p13, %p4580_p2  ;;  %p4328_p9 = por %p4327_p8, %p4326_p6 }
 0x4ff   : > { %p4324_p4 = pneg %p4323_p0 }
 0x501   : > { %p4329_p3 = pnand %p4328_p9, %p4324_p4 }
 0x503   : > { %4332 = shalt.err (!%p4329_p3)
}
 0x504   : > { %3948 = dma.vmem_to_hbm [thread:$0]  (%p4580_p2), %s2807_s16, 256, %s2809_s8, %s5489_s30, %s5614_s20, %s5614_s20, %s4412_s2  }
 0x505 PF: > { %s5615_s28 = sld [smem:[#allocation23_spill]]  ;;  %p3970_p1 = pnand %p3010_p10, %p4522_p5 }
 0x507   : > { %p3971_p7 = pneg %p3970_p1 }
 0x50b   : > { %s2823_s26 = sand.u32 1, %s5615_s28  }
 0x50c   : > { %s2824_s14 = scalar_lea.sflag [#allocation6], %s2823_s26 }
 0x50d   : > { %4372 = dma.done.wait (%p3971_p7), %s2824_s14, 256  }
 0x50e   : > { %4374 = vsyncadd (%p3971_p7), %s2824_s14, 4294967040  ;;  %s5617_s6 = sadd.s32 4294967294, %s4401_s25  }
 0x50f   : > { %s2833_s21 = sand.u32 1, %s5617_s6  }
 0x510   : > { %s2834_s1 = scalar_lea.sflag [#allocation15], %s2833_s21 }
 0x511   : > { %4376 = dma.done.wait (%p3971_p7), %s2834_s1, 512  }
 0x512   : > { %4378 = vsyncadd (%p3971_p7), %s2834_s1, 4294966784  ;;  %s41_s25 = sadd.s32 1, %s4401_s25   ;;  %s5618_s30 = sld [smem:[#allocation25_spill]] }
 0x513   : > { %p38_p2 = scmp.ge.s32.totalorder %s41_s25, 4   ;;  %s5619_s21 = smov %s4385_s22 }
 0x514   : > { %s5620_s22 = smov %s4389_s23  ;;  %s5621_s23 = smov %s4590_s19 }
 0x515   : > { %s5622_s0 = smov %s4397_s24  ;;  %40 = sbr.rel (!%p38_p2) target bundleno = 20 (0x14), region = 153 }
 0x518   : > { %s5623_s24 = smov %s5618_s30 }
 0x51a   :  { %2850 = vsyncpa [#allocation5], 1 }
 0x51b   :  { %2852 = vsyncpa [#allocation5 + $0x1], 1 }
 0x51c   :  { %2853 = vsyncpa [#allocation8], 1 }
 0x51d   :  { %2854 = vsyncpa [#allocation11], 1 }
 0x51e   :  { %2855 = vsyncpa [#allocation6], 1 }
 0x51f   :  { %2857 = vsyncpa [#allocation6 + $0x1], 1 }
 0x520   :  { %2858 = vsyncpa [#allocation15], 1 }
 0x521   :  { %2860 = vsyncpa [#allocation15 + $0x1], 1 }

</bundles_post_ra>
